<compile_context>
chip_gen: v5e
topology: v5e:2x2
jax: 0.10.0
libtpu: 0.0.40
codegen_flags: <defaults>
</compile_context>

<pallas_src>
import jax
import jax.numpy as jnp
from jax import lax
from jax.experimental import pallas as pl
from jax.experimental.pallas import tpu as pltpu


def _make_basic_block_kernel(TH, W, H, Cp, pack_dy):
    """Builds the fused kernel for a (TH rows x full width) output tile."""

    def conv3x3(src, w_ref, rows, cols):
        # src: (rows+2, cols+2, Cp) bf16 (array or Ref).
        # w_ref: (3, 3Cp, Cp) bf16, or dy-packed (3Cp, 3Cp) bf16.
        # dx-shifted slabs concatenated along the lane dim -> contraction K=3Cp.
        dxcat = jnp.concatenate(
            [src[:, dx:dx + cols, :] for dx in range(3)], axis=-1)  # (rows+2, cols, 3Cp)
        if pack_dy:
            # One fat matmul (N = 3Cp fills the 256-wide MXU on v6e/v7x), then
            # sum the three dy output chunks with row-shifted (major) and
            # 128-aligned lane slices.
            res = lax.dot_general(dxcat, w_ref[...],
                                  dimension_numbers=(((2,), (0,)), ((), ())),
                                  preferred_element_type=jnp.float32)
            return (res[0:rows, :, 0:Cp]
                    + res[1:rows + 1, :, Cp:2 * Cp]
                    + res[2:rows + 2, :, 2 * Cp:3 * Cp])
        acc = lax.dot_general(dxcat[0:rows], w_ref[0],
                              dimension_numbers=(((2,), (0,)), ((), ())),
                              preferred_element_type=jnp.float32)
        for dy in (1, 2):
            acc = acc + lax.dot_general(dxcat[dy:dy + rows], w_ref[dy],
                                        dimension_numbers=(((2,), (0,)), ((), ())),
                                        preferred_element_type=jnp.float32)
        return acc                                               # (rows, cols, Cp) f32

    def kernel(x_hbm, w1_ref, w2_ref, s1_ref, b1_ref, s2_ref, b2_ref,
               out_ref, xbuf, in_sem, mid_ref):
        # x_hbm  : (N, H+4, W+4, Cp) f32 in HBM (manual windowed DMA)
        # out_ref: (1, TH, W, Cp)    f32 output tile
        # xbuf   : (2, TH+4, W+4, Cp) f32 VMEM double buffer (input window)
        # mid_ref: (TH+2, W+2, Cp)    bf16 VMEM scratch (padded conv1 output)
        n = pl.program_id(0)
        t = pl.program_id(1)
        T = pl.num_programs(1)
        slot = lax.rem(t, 2)

        def copy_in(tt, s):
            return pltpu.make_async_copy(
                x_hbm.at[n, pl.ds(tt * TH, TH + 4)], xbuf.at[s], in_sem.at[s])

        # Prime the pipeline at the first row tile of this batch element.
        @pl.when(t == 0)
        def _():
            copy_in(0, 0).start()

        copy_in(t, slot).wait()

        # Prefetch the next row tile's window under this tile's compute.
        @pl.when(t + 1 < T)
        def _():
            copy_in(t + 1, 1 - slot).start()

        xwin = xbuf.at[slot]                          # (TH+4, W+4, Cp) f32 window

        # ---- conv1 -> bn1 -> relu on an extended (TH+2, W+2) tile -----------
        src1 = xwin[...].astype(jnp.bfloat16)         # cast once for the MXU
        y = conv3x3(src1, w1_ref, TH + 2, W + 2) * s1_ref[0] + b1_ref[0]
        y = jnp.maximum(y, 0.0)                       # (TH+2, W+2, Cp) f32

        # Zero everything outside the image: those positions are conv2's zero
        # padding (row halo only at the first/last tile, column halo always).
        row_id = lax.broadcasted_iota(jnp.int32, (TH + 2, W + 2, 1), 0) + (t * TH - 1)
        col_id = lax.broadcasted_iota(jnp.int32, (TH + 2, W + 2, 1), 1)
        valid = (row_id >= 0) & (row_id < H) & (col_id >= 1) & (col_id <= W)
        mid_ref[...] = jnp.where(valid, y, 0.0).astype(jnp.bfloat16)  # one aligned store

        # ---- conv2 -> bn2 -> residual add -> relu ---------------------------
        z = conv3x3(mid_ref, w2_ref, TH, W) * s2_ref[0] + b2_ref[0]
        identity = xwin[2:2 + TH, 2:2 + W, :]         # exact f32 skip path, read late
        out_ref[0] = jnp.maximum(z + identity, 0.0).astype(out_ref.dtype)

    return kernel


def _pick_tile_rows(H):
    """Largest row tile <= 32 that evenly divides H (bounds per-step VMEM)."""
    for cand in (32, 28, 16, 14, 8, 7, 4, 2, 1):
        if cand <= H and H % cand == 0:
            return cand
    return H


def basic_block_pallas(x_nchw, w1, w2, bn1, bn2, eps=1e-5,
                       tile_rows=None, pack_dy=None):
    """BasicBlock forward. x_nchw: (N, C, H, W) f32. Returns (N, C, H, W) f32."""
    N, C, H, W = x_nchw.shape
    cout, cin, kh, kw = w1.shape
    assert cin == C and cout == C and kh == 3 and kw == 3, (
        "identity skip requires in_channels == out_channels and 3x3 kernels")
    assert w2.shape == (C, C, 3, 3)

    LANE = 128
    Cp = max(LANE, ((C + LANE - 1) // LANE) * LANE)   # lane-dense channel count

    if tile_rows is None:
        # Per-generation knob: v6e/v5e can afford ~2x larger tiles than v7x.
        tile_rows = _pick_tile_rows(H)
    TH = int(tile_rows)
    assert TH >= 1 and H % TH == 0, "tile_rows must evenly divide H"
    T = H // TH

    if pack_dy is None:
        # dy-packing (N=3Cp) helps the 256-wide MXUs of v6e/v7x; on 128-wide
        # v5-class MXUs it only adds (TH+4)/(TH+2) wasted rows, so skip there.
        try:
            kind = jax.devices()[0].device_kind.lower()
        except Exception:
            kind = ""
        pack_dy = (Cp == LANE) and any(s in kind for s in ("v6", "v7", "6e", "7x"))
    pack_dy = bool(pack_dy)

    # NCHW -> NHWC (module interface), 2-row/2-col halo pad + lane pad.
    x = jnp.transpose(x_nchw, (0, 2, 3, 1)).astype(jnp.float32)
    xpad = jnp.pad(x, ((0, 0), (2, 2), (2, 2), (0, Cp - C)))     # (N, H+4, W+4, Cp)

    def prep_w(w):
        # PyTorch (Cout, Cin, 3, 3) -> (dy, dx, Cin, Cout) -> pad -> bf16
        wk = jnp.transpose(w, (2, 3, 1, 0)).astype(jnp.float32)
        wk = jnp.pad(wk, ((0, 0), (0, 0), (0, Cp - C), (0, Cp - C)))
        wk = wk.reshape(3, 3 * Cp, Cp)                           # [dy, dx*Cp+ci, co]
        if pack_dy:
            wk = jnp.concatenate([wk[0], wk[1], wk[2]], axis=-1)  # [dx*Cp+ci, dy*Cp+co]
        return wk.astype(jnp.bfloat16)

    w1_r, w2_r = prep_w(w1), prep_w(w2)

    def fold_bn(p):
        gamma, beta, mean, var = p
        scale = (gamma / jnp.sqrt(var + eps)).astype(jnp.float32)
        bias = (beta - mean * scale).astype(jnp.float32)
        return (jnp.pad(scale, (0, Cp - C)).reshape(1, Cp),
                jnp.pad(bias, (0, Cp - C)).reshape(1, Cp))

    s1, b1 = fold_bn(bn1)
    s2, b2 = fold_bn(bn2)

    if pack_dy:
        w_spec = pl.BlockSpec((3 * Cp, 3 * Cp), lambda n, t: (0, 0))
    else:
        w_spec = pl.BlockSpec((3, 3 * Cp, Cp), lambda n, t: (0, 0, 0))
    v_spec = pl.BlockSpec((1, Cp), lambda n, t: (0, 0))

    kernel = _make_basic_block_kernel(TH, W, H, Cp, pack_dy)

    out = pl.pallas_call(
        kernel,
        out_shape=jax.ShapeDtypeStruct((N, H, W, Cp), jnp.float32),
        grid_spec=pltpu.PrefetchScalarGridSpec(
            num_scalar_prefetch=0,
            grid=(N, T),
            in_specs=[
                pl.BlockSpec(memory_space=pl.ANY),   # padded input: manual window DMA
                w_spec, w_spec,
                v_spec, v_spec, v_spec, v_spec,
            ],
            out_specs=pl.BlockSpec((1, TH, W, Cp), lambda n, t: (n, t, 0, 0)),
            scratch_shapes=[
                pltpu.VMEM((2, TH + 4, W + 4, Cp), jnp.float32),   # input window x2
                pltpu.SemaphoreType.DMA((2,)),
                pltpu.VMEM((TH + 2, W + 2, Cp), jnp.bfloat16),     # padded conv1 out
            ]),
        compiler_params=pltpu.CompilerParams(
            dimension_semantics=("parallel", "arbitrary"),
            vmem_limit_bytes=32 * 1024 * 1024),
    )(xpad, w1_r, w2_r, s1, b1, s2, b2)

    out = out[..., :C]                                # drop lane padding
    return jnp.transpose(out, (0, 3, 1, 2))           # NHWC -> NCHW


def basic_block_reference(x_nchw, w1, w2, bn1, bn2, eps=1e-5):
    """Plain-JAX f32 reference (same math, NHWC convs via lax.conv)."""
    x = jnp.transpose(x_nchw, (0, 2, 3, 1)).astype(jnp.float32)
    w1_k = jnp.transpose(w1, (2, 3, 1, 0))
    w2_k = jnp.transpose(w2, (2, 3, 1, 0))
    dn = lax.conv_dimension_numbers(x.shape, w1_k.shape, ('NHWC', 'HWIO', 'NHWC'))

    def bn(y, p):
        gamma, beta, mean, var = p
        return (y - mean) / jnp.sqrt(var + eps) * gamma + beta

    identity = x
    y = lax.conv_general_dilated(x, w1_k, (1, 1), 'SAME', dimension_numbers=dn)
    y = jnp.maximum(bn(y, bn1), 0.0)
    y = lax.conv_general_dilated(y, w2_k, (1, 1), 'SAME', dimension_numbers=dn)
    y = bn(y, bn2)
    y = jnp.maximum(y + identity, 0.0)
    return jnp.transpose(y, (0, 3, 1, 2))


if __name__ == "__main__":
    key = jax.random.PRNGKey(0)
    N, C, H, W = 2, 4, 16, 16   # in_channels == out_channels (identity skip)

    k = jax.random.split(key, 8)
    x = jax.random.normal(k[0], (N, C, H, W), jnp.float32)
    # PyTorch conv weight layout (Cout, Cin, 3, 3)
    w1 = 0.1 * jax.random.normal(k[1], (C, C, 3, 3), jnp.float32)
    w2 = 0.1 * jax.random.normal(k[2], (C, C, 3, 3), jnp.float32)
    # BatchNorm params: (gamma, beta, running_mean, running_var)
    bn1 = (1.0 + 0.1 * jax.random.normal(k[3], (C,), jnp.float32),
           0.1 * jax.random.normal(k[4], (C,), jnp.float32),
           0.05 * jax.random.normal(k[5], (C,), jnp.float32),
           jnp.abs(1.0 + 0.1 * jax.random.normal(k[6], (C,), jnp.float32)))
    bn2 = (jnp.ones((C,), jnp.float32),
           jnp.zeros((C,), jnp.float32),
           0.05 * jax.random.normal(k[7], (C,), jnp.float32),
           jnp.ones((C,), jnp.float32))

    ref = jax.block_until_ready(basic_block_reference(x, w1, w2, bn1, bn2))

    # (a) row-tiled (T=2), dy-packing auto-selected for the local chip.
    out_a = jax.block_until_ready(
        basic_block_pallas(x, w1, w2, bn1, bn2, tile_rows=8))
    # (b) finer tiling (T=4, exercises interior tiles) with the 3-matmul path.
    out_b = jax.block_until_ready(
        basic_block_pallas(x, w1, w2, bn1, bn2, tile_rows=4, pack_dy=False))

    for out in (out_a, out_b):
        assert out.shape == (N, C, H, W)
        max_err = float(jnp.max(jnp.abs(out - ref)))
        # bf16 matmul operands with f32 accumulation -> small rounding error.
        assert jnp.allclose(out, ref, atol=2e-2, rtol=2e-2), (
            "mismatch vs reference, max |diff| = %g" % max_err)
    print("KERNEL_OK")
</pallas_src>

<mosaic_0001>
module attributes {stable_mosaic.version = 11 : i64} {
  func.func @kernel(%arg0: i32, %arg1: i32, %arg2: memref<2x20x20x128xf32, #tpu.memory_space<any>>, %arg3: memref<3x384x128xbf16, #tpu.memory_space<vmem>>, %arg4: memref<3x384x128xbf16, #tpu.memory_space<vmem>>, %arg5: memref<1x128xf32, #tpu.memory_space<vmem>>, %arg6: memref<1x128xf32, #tpu.memory_space<vmem>>, %arg7: memref<1x128xf32, #tpu.memory_space<vmem>>, %arg8: memref<1x128xf32, #tpu.memory_space<vmem>>, %arg9: memref<1x8x16x128xf32, #tpu.memory_space<vmem>>, %arg10: memref<2x12x20x128xf32, #tpu.memory_space<vmem>>, %arg11: memref<2x!tpu.dma_semaphore, #tpu.memory_space<semaphore_mem>>, %arg12: memref<10x18x128xbf16, #tpu.memory_space<vmem>>) attributes {dimension_semantics = [#tpu.dimension_semantics<parallel>, #tpu.dimension_semantics<arbitrary>], iteration_bounds = array<i64: 2, 2>, scalar_prefetch = 0 : i64, scratch_operands = 3 : i64, tpu.core_type = #tpu.core_type<tc>, window_params = [{}, {pipeline_mode = #tpu.pipeline_mode<synchronous>, transform_indices = @transform_1, window_bounds = array<i64: 3, 384, 128>}, {pipeline_mode = #tpu.pipeline_mode<synchronous>, transform_indices = @transform_2, window_bounds = array<i64: 3, 384, 128>}, {pipeline_mode = #tpu.pipeline_mode<synchronous>, transform_indices = @transform_3, window_bounds = array<i64: 1, 128>}, {pipeline_mode = #tpu.pipeline_mode<synchronous>, transform_indices = @transform_4, window_bounds = array<i64: 1, 128>}, {pipeline_mode = #tpu.pipeline_mode<synchronous>, transform_indices = @transform_5, window_bounds = array<i64: 1, 128>}, {pipeline_mode = #tpu.pipeline_mode<synchronous>, transform_indices = @transform_6, window_bounds = array<i64: 1, 128>}, {transform_indices = @transform_7, window_bounds = array<i64: 1, 8, 16, 128>}]} {
    %c2_i32 = arith.constant 2 : i32
    %0 = arith.remsi %arg1, %c2_i32 : i32
    %c0_i32 = arith.constant 0 : i32
    %1 = arith.cmpi eq, %arg1, %c0_i32 : i32
    %2 = arith.extui %1 : i1 to i32
    %c0_i32_0 = arith.constant 0 : i32
    %3 = arith.cmpi ne, %2, %c0_i32_0 : i32
    scf.if %3 {
      %c0_i32_69 = arith.constant 0 : i32
      %c0_i32_70 = arith.constant 0 : i32
      %c0_i32_71 = arith.constant 0 : i32
      %c0_i32_72 = arith.constant 0 : i32
      %c0_i32_73 = arith.constant 0 : i32
      %109 = tpu.memref_slice %arg2[%arg0, %c0_i32_71, %c0_i32_72, %c0_i32_73] : memref<2x20x20x128xf32, #tpu.memory_space<any>> -> memref<1x12x20x128xf32, #tpu.memory_space<any>>
      %110 = tpu.memref_squeeze %109 : memref<1x12x20x128xf32, #tpu.memory_space<any>> -> memref<12x20x128xf32, #tpu.memory_space<any>>
      %c0_i32_74 = arith.constant 0 : i32
      %c0_i32_75 = arith.constant 0 : i32
      %c0_i32_76 = arith.constant 0 : i32
      %111 = tpu.memref_slice %arg10[%c0_i32_69, %c0_i32_74, %c0_i32_75, %c0_i32_76] : memref<2x12x20x128xf32, #tpu.memory_space<vmem>> -> memref<1x12x20x128xf32, #tpu.memory_space<vmem>>
      %112 = tpu.memref_squeeze %111 : memref<1x12x20x128xf32, #tpu.memory_space<vmem>> -> memref<12x20x128xf32, #tpu.memory_space<vmem>>
      %113 = tpu.memref_slice %arg11[%c0_i32_70] : memref<2x!tpu.dma_semaphore, #tpu.memory_space<semaphore_mem>> -> memref<1x!tpu.dma_semaphore, #tpu.memory_space<semaphore_mem>>
      %114 = tpu.memref_squeeze %113 : memref<1x!tpu.dma_semaphore, #tpu.memory_space<semaphore_mem>> -> memref<!tpu.dma_semaphore, #tpu.memory_space<semaphore_mem>>
      tpu.enqueue_dma source(%110 : memref<12x20x128xf32, #tpu.memory_space<any>>) target(%112 : memref<12x20x128xf32, #tpu.memory_space<vmem>>) target_semaphore(%114 : memref<!tpu.dma_semaphore, #tpu.memory_space<semaphore_mem>>)
    } else {
    }
    %c8_i32 = arith.constant 8 : i32
    %4 = arith.muli %arg1, %c8_i32 : i32
    %c0_i32_1 = arith.constant 0 : i32
    %c0_i32_2 = arith.constant 0 : i32
    %5 = tpu.memref_slice %arg2[%arg0, %4, %c0_i32_1, %c0_i32_2] : memref<2x20x20x128xf32, #tpu.memory_space<any>> -> memref<1x12x20x128xf32, #tpu.memory_space<any>>
    %6 = tpu.memref_squeeze %5 : memref<1x12x20x128xf32, #tpu.memory_space<any>> -> memref<12x20x128xf32, #tpu.memory_space<any>>
    %c0_i32_3 = arith.constant 0 : i32
    %c0_i32_4 = arith.constant 0 : i32
    %c0_i32_5 = arith.constant 0 : i32
    %7 = tpu.memref_slice %arg10[%0, %c0_i32_3, %c0_i32_4, %c0_i32_5] : memref<2x12x20x128xf32, #tpu.memory_space<vmem>> -> memref<1x12x20x128xf32, #tpu.memory_space<vmem>>
    %8 = tpu.memref_squeeze %7 : memref<1x12x20x128xf32, #tpu.memory_space<vmem>> -> memref<12x20x128xf32, #tpu.memory_space<vmem>>
    %9 = tpu.memref_slice %arg11[%0] : memref<2x!tpu.dma_semaphore, #tpu.memory_space<semaphore_mem>> -> memref<1x!tpu.dma_semaphore, #tpu.memory_space<semaphore_mem>>
    %10 = tpu.memref_squeeze %9 : memref<1x!tpu.dma_semaphore, #tpu.memory_space<semaphore_mem>> -> memref<!tpu.dma_semaphore, #tpu.memory_space<semaphore_mem>>
    tpu.wait_dma2 semaphore(%10 : memref<!tpu.dma_semaphore, #tpu.memory_space<semaphore_mem>>) src(%6 : memref<12x20x128xf32, #tpu.memory_space<any>>) dst(%8 : memref<12x20x128xf32, #tpu.memory_space<vmem>>)
    %c1_i32 = arith.constant 1 : i32
    %11 = arith.addi %arg1, %c1_i32 : i32
    %c2_i32_6 = arith.constant 2 : i32
    %12 = arith.cmpi slt, %11, %c2_i32_6 : i32
    %13 = arith.extui %12 : i1 to i32
    %c0_i32_7 = arith.constant 0 : i32
    %14 = arith.cmpi ne, %13, %c0_i32_7 : i32
    scf.if %14 {
      %c1_i32_69 = arith.constant 1 : i32
      %109 = arith.addi %arg1, %c1_i32_69 : i32
      %c1_i32_70 = arith.constant 1 : i32
      %110 = arith.subi %c1_i32_70, %0 : i32
      %c8_i32_71 = arith.constant 8 : i32
      %111 = arith.muli %109, %c8_i32_71 : i32
      %c0_i32_72 = arith.constant 0 : i32
      %c0_i32_73 = arith.constant 0 : i32
      %112 = tpu.memref_slice %arg2[%arg0, %111, %c0_i32_72, %c0_i32_73] : memref<2x20x20x128xf32, #tpu.memory_space<any>> -> memref<1x12x20x128xf32, #tpu.memory_space<any>>
      %113 = tpu.memref_squeeze %112 : memref<1x12x20x128xf32, #tpu.memory_space<any>> -> memref<12x20x128xf32, #tpu.memory_space<any>>
      %c0_i32_74 = arith.constant 0 : i32
      %c0_i32_75 = arith.constant 0 : i32
      %c0_i32_76 = arith.constant 0 : i32
      %114 = tpu.memref_slice %arg10[%110, %c0_i32_74, %c0_i32_75, %c0_i32_76] : memref<2x12x20x128xf32, #tpu.memory_space<vmem>> -> memref<1x12x20x128xf32, #tpu.memory_space<vmem>>
      %115 = tpu.memref_squeeze %114 : memref<1x12x20x128xf32, #tpu.memory_space<vmem>> -> memref<12x20x128xf32, #tpu.memory_space<vmem>>
      %116 = tpu.memref_slice %arg11[%110] : memref<2x!tpu.dma_semaphore, #tpu.memory_space<semaphore_mem>> -> memref<1x!tpu.dma_semaphore, #tpu.memory_space<semaphore_mem>>
      %117 = tpu.memref_squeeze %116 : memref<1x!tpu.dma_semaphore, #tpu.memory_space<semaphore_mem>> -> memref<!tpu.dma_semaphore, #tpu.memory_space<semaphore_mem>>
      tpu.enqueue_dma source(%113 : memref<12x20x128xf32, #tpu.memory_space<any>>) target(%115 : memref<12x20x128xf32, #tpu.memory_space<vmem>>) target_semaphore(%117 : memref<!tpu.dma_semaphore, #tpu.memory_space<semaphore_mem>>)
    } else {
    }
    %15 = arith.index_cast %0 : i32 to index
    %c0 = arith.constant 0 : index
    %c0_8 = arith.constant 0 : index
    %c0_9 = arith.constant 0 : index
    %16 = vector.load %arg10[%15, %c0, %c0_8, %c0_9] : memref<2x12x20x128xf32, #tpu.memory_space<vmem>>, vector<1x12x20x128xf32>
    %17 = vector.shape_cast %16 : vector<1x12x20x128xf32> to vector<12x20x128xf32>
    %18 = arith.truncf %17 : vector<12x20x128xf32> to vector<12x20x128xbf16>
    %19 = vector.extract_strided_slice %18 {offsets = [0, 0, 0], sizes = [12, 18, 128], strides = [1, 1, 1]} : vector<12x20x128xbf16> to vector<12x18x128xbf16>
    %20 = vector.extract_strided_slice %18 {offsets = [0, 1, 0], sizes = [12, 18, 128], strides = [1, 1, 1]} : vector<12x20x128xbf16> to vector<12x18x128xbf16>
    %21 = vector.extract_strided_slice %18 {offsets = [0, 2, 0], sizes = [12, 18, 128], strides = [1, 1, 1]} : vector<12x20x128xbf16> to vector<12x18x128xbf16>
    %22 = tpu.concatenate %19, %20, %21 in 2 : vector<12x18x128xbf16>, vector<12x18x128xbf16>, vector<12x18x128xbf16> -> vector<12x18x384xbf16>
    %23 = vector.extract_strided_slice %22 {offsets = [0, 0, 0], sizes = [10, 18, 384], strides = [1, 1, 1]} : vector<12x18x384xbf16> to vector<10x18x384xbf16>
    %c0_10 = arith.constant 0 : index
    %c0_11 = arith.constant 0 : index
    %c0_12 = arith.constant 0 : index
    %24 = vector.load %arg3[%c0_10, %c0_11, %c0_12] : memref<3x384x128xbf16, #tpu.memory_space<vmem>>, vector<1x384x128xbf16>
    %25 = vector.shape_cast %24 : vector<1x384x128xbf16> to vector<384x128xbf16>
    %cst = arith.constant dense<0.000000e+00> : vector<10x18x128xf32>
    %26 = tpu.matmul %23, %25, %cst {dimension_numbers = #tpu.dot_dimension_numbers<[2], [0], [0, 1], [1], [0, 0, 0, 1, 1, 1], [], []>} : vector<10x18x384xbf16>, vector<384x128xbf16>, vector<10x18x128xf32> -> vector<10x18x128xf32>
    %27 = vector.extract_strided_slice %22 {offsets = [1, 0, 0], sizes = [10, 18, 384], strides = [1, 1, 1]} : vector<12x18x384xbf16> to vector<10x18x384xbf16>
    %c1 = arith.constant 1 : index
    %c0_13 = arith.constant 0 : index
    %c0_14 = arith.constant 0 : index
    %28 = vector.load %arg3[%c1, %c0_13, %c0_14] : memref<3x384x128xbf16, #tpu.memory_space<vmem>>, vector<1x384x128xbf16>
    %29 = vector.shape_cast %28 : vector<1x384x128xbf16> to vector<384x128xbf16>
    %cst_15 = arith.constant dense<0.000000e+00> : vector<10x18x128xf32>
    %30 = tpu.matmul %27, %29, %cst_15 {dimension_numbers = #tpu.dot_dimension_numbers<[2], [0], [0, 1], [1], [0, 0, 0, 1, 1, 1], [], []>} : vector<10x18x384xbf16>, vector<384x128xbf16>, vector<10x18x128xf32> -> vector<10x18x128xf32>
    %31 = arith.addf %26, %30 : vector<10x18x128xf32>
    %32 = vector.extract_strided_slice %22 {offsets = [2, 0, 0], sizes = [10, 18, 384], strides = [1, 1, 1]} : vector<12x18x384xbf16> to vector<10x18x384xbf16>
    %c2 = arith.constant 2 : index
    %c0_16 = arith.constant 0 : index
    %c0_17 = arith.constant 0 : index
    %33 = vector.load %arg3[%c2, %c0_16, %c0_17] : memref<3x384x128xbf16, #tpu.memory_space<vmem>>, vector<1x384x128xbf16>
    %34 = vector.shape_cast %33 : vector<1x384x128xbf16> to vector<384x128xbf16>
    %cst_18 = arith.constant dense<0.000000e+00> : vector<10x18x128xf32>
    %35 = tpu.matmul %32, %34, %cst_18 {dimension_numbers = #tpu.dot_dimension_numbers<[2], [0], [0, 1], [1], [0, 0, 0, 1, 1, 1], [], []>} : vector<10x18x384xbf16>, vector<384x128xbf16>, vector<10x18x128xf32> -> vector<10x18x128xf32>
    %36 = arith.addf %31, %35 : vector<10x18x128xf32>
    %c0_19 = arith.constant 0 : index
    %c0_20 = arith.constant 0 : index
    %37 = vector.load %arg5[%c0_19, %c0_20] : memref<1x128xf32, #tpu.memory_space<vmem>>, vector<1x128xf32>
    %38 = vector.shape_cast %37 : vector<1x128xf32> to vector<128xf32>
    %39 = vector.shape_cast %38 : vector<128xf32> to vector<1x1x128xf32>
    %40 = vector.broadcast %39 : vector<1x1x128xf32> to vector<10x18x128xf32>
    %41 = arith.mulf %36, %40 : vector<10x18x128xf32>
    %c0_21 = arith.constant 0 : index
    %c0_22 = arith.constant 0 : index
    %42 = vector.load %arg6[%c0_21, %c0_22] : memref<1x128xf32, #tpu.memory_space<vmem>>, vector<1x128xf32>
    %43 = vector.shape_cast %42 : vector<1x128xf32> to vector<128xf32>
    %44 = vector.shape_cast %43 : vector<128xf32> to vector<1x1x128xf32>
    %45 = vector.broadcast %44 : vector<1x1x128xf32> to vector<10x18x128xf32>
    %46 = arith.addf %41, %45 : vector<10x18x128xf32>
    %cst_23 = arith.constant 0.000000e+00 : f32
    %47 = vector.broadcast %cst_23 : f32 to vector<10x18x128xf32>
    %48 = arith.maximumf %46, %47 : vector<10x18x128xf32>
    %49 = tpu.iota {dimensions = array<i32: 0>} : vector<10x18x1xi32>
    %c8_i32_24 = arith.constant 8 : i32
    %50 = arith.muli %arg1, %c8_i32_24 : i32
    %c1_i32_25 = arith.constant 1 : i32
    %51 = arith.subi %50, %c1_i32_25 : i32
    %52 = vector.broadcast %51 : i32 to vector<10x18x1xi32>
    %53 = arith.addi %49, %52 : vector<10x18x1xi32>
    %54 = tpu.iota {dimensions = array<i32: 1>} : vector<10x18x1xi32>
    %c0_i32_26 = arith.constant 0 : i32
    %55 = vector.broadcast %c0_i32_26 : i32 to vector<10x18x1xi32>
    %56 = arith.cmpi sge, %53, %55 : vector<10x18x1xi32>
    %c16_i32 = arith.constant 16 : i32
    %57 = vector.broadcast %c16_i32 : i32 to vector<10x18x1xi32>
    %58 = arith.cmpi slt, %53, %57 : vector<10x18x1xi32>
    %59 = arith.andi %56, %58 : vector<10x18x1xi1>
    %c1_i32_27 = arith.constant 1 : i32
    %60 = vector.broadcast %c1_i32_27 : i32 to vector<10x18x1xi32>
    %61 = arith.cmpi sge, %54, %60 : vector<10x18x1xi32>
    %62 = arith.andi %59, %61 : vector<10x18x1xi1>
    %c16_i32_28 = arith.constant 16 : i32
    %63 = vector.broadcast %c16_i32_28 : i32 to vector<10x18x1xi32>
    %64 = arith.cmpi sle, %54, %63 : vector<10x18x1xi32>
    %65 = arith.andi %62, %64 : vector<10x18x1xi1>
    %cst_29 = arith.constant 0.000000e+00 : f32
    %66 = vector.shape_cast %65 : vector<10x18x1xi1> to vector<10x18x1xi1>
    %67 = vector.broadcast %66 : vector<10x18x1xi1> to vector<10x18x128xi1>
    %68 = vector.broadcast %cst_29 : f32 to vector<10x18x128xf32>
    %69 = arith.select %67, %48, %68 : vector<10x18x128xi1>, vector<10x18x128xf32>
    %70 = arith.truncf %69 : vector<10x18x128xf32> to vector<10x18x128xbf16>
    %c0_30 = arith.constant 0 : index
    %c0_31 = arith.constant 0 : index
    %c0_32 = arith.constant 0 : index
    %71 = vector.load %arg12[%c0_30, %c0_31, %c0_32] : memref<10x18x128xbf16, #tpu.memory_space<vmem>>, vector<10x18x128xbf16>
    tpu.vector_store %arg12[%c0_30, %c0_31, %c0_32], %70 {strides = array<i32>} : memref<10x18x128xbf16, #tpu.memory_space<vmem>>, vector<10x18x128xbf16>,
    %c0_33 = arith.constant 0 : index
    %c0_34 = arith.constant 0 : index
    %c0_35 = arith.constant 0 : index
    %72 = vector.load %arg12[%c0_33, %c0_34, %c0_35] : memref<10x18x128xbf16, #tpu.memory_space<vmem>>, vector<10x16x128xbf16>
    %c0_36 = arith.constant 0 : index
    %c1_37 = arith.constant 1 : index
    %c0_38 = arith.constant 0 : index
    %73 = vector.load %arg12[%c0_36, %c1_37, %c0_38] : memref<10x18x128xbf16, #tpu.memory_space<vmem>>, vector<10x16x128xbf16>
    %c0_39 = arith.constant 0 : index
    %c2_40 = arith.constant 2 : index
    %c0_41 = arith.constant 0 : index
    %74 = vector.load %arg12[%c0_39, %c2_40, %c0_41] : memref<10x18x128xbf16, #tpu.memory_space<vmem>>, vector<10x16x128xbf16>
    %75 = tpu.concatenate %72, %73, %74 in 2 : vector<10x16x128xbf16>, vector<10x16x128xbf16>, vector<10x16x128xbf16> -> vector<10x16x384xbf16>
    %76 = vector.extract_strided_slice %75 {offsets = [0, 0, 0], sizes = [8, 16, 384], strides = [1, 1, 1]} : vector<10x16x384xbf16> to vector<8x16x384xbf16>
    %c0_42 = arith.constant 0 : index
    %c0_43 = arith.constant 0 : index
    %c0_44 = arith.constant 0 : index
    %77 = vector.load %arg4[%c0_42, %c0_43, %c0_44] : memref<3x384x128xbf16, #tpu.memory_space<vmem>>, vector<1x384x128xbf16>
    %78 = vector.shape_cast %77 : vector<1x384x128xbf16> to vector<384x128xbf16>
    %cst_45 = arith.constant dense<0.000000e+00> : vector<8x16x128xf32>
    %79 = tpu.matmul %76, %78, %cst_45 {dimension_numbers = #tpu.dot_dimension_numbers<[2], [0], [0, 1], [1], [0, 0, 0, 1, 1, 1], [], []>} : vector<8x16x384xbf16>, vector<384x128xbf16>, vector<8x16x128xf32> -> vector<8x16x128xf32>
    %80 = vector.extract_strided_slice %75 {offsets = [1, 0, 0], sizes = [8, 16, 384], strides = [1, 1, 1]} : vector<10x16x384xbf16> to vector<8x16x384xbf16>
    %c1_46 = arith.constant 1 : index
    %c0_47 = arith.constant 0 : index
    %c0_48 = arith.constant 0 : index
    %81 = vector.load %arg4[%c1_46, %c0_47, %c0_48] : memref<3x384x128xbf16, #tpu.memory_space<vmem>>, vector<1x384x128xbf16>
    %82 = vector.shape_cast %81 : vector<1x384x128xbf16> to vector<384x128xbf16>
    %cst_49 = arith.constant dense<0.000000e+00> : vector<8x16x128xf32>
    %83 = tpu.matmul %80, %82, %cst_49 {dimension_numbers = #tpu.dot_dimension_numbers<[2], [0], [0, 1], [1], [0, 0, 0, 1, 1, 1], [], []>} : vector<8x16x384xbf16>, vector<384x128xbf16>, vector<8x16x128xf32> -> vector<8x16x128xf32>
    %84 = arith.addf %79, %83 : vector<8x16x128xf32>
    %85 = vector.extract_strided_slice %75 {offsets = [2, 0, 0], sizes = [8, 16, 384], strides = [1, 1, 1]} : vector<10x16x384xbf16> to vector<8x16x384xbf16>
    %c2_50 = arith.constant 2 : index
    %c0_51 = arith.constant 0 : index
    %c0_52 = arith.constant 0 : index
    %86 = vector.load %arg4[%c2_50, %c0_51, %c0_52] : memref<3x384x128xbf16, #tpu.memory_space<vmem>>, vector<1x384x128xbf16>
    %87 = vector.shape_cast %86 : vector<1x384x128xbf16> to vector<384x128xbf16>
    %cst_53 = arith.constant dense<0.000000e+00> : vector<8x16x128xf32>
    %88 = tpu.matmul %85, %87, %cst_53 {dimension_numbers = #tpu.dot_dimension_numbers<[2], [0], [0, 1], [1], [0, 0, 0, 1, 1, 1], [], []>} : vector<8x16x384xbf16>, vector<384x128xbf16>, vector<8x16x128xf32> -> vector<8x16x128xf32>
    %89 = arith.addf %84, %88 : vector<8x16x128xf32>
    %c0_54 = arith.constant 0 : index
    %c0_55 = arith.constant 0 : index
    %90 = vector.load %arg7[%c0_54, %c0_55] : memref<1x128xf32, #tpu.memory_space<vmem>>, vector<1x128xf32>
    %91 = vector.shape_cast %90 : vector<1x128xf32> to vector<128xf32>
    %92 = vector.shape_cast %91 : vector<128xf32> to vector<1x1x128xf32>
    %93 = vector.broadcast %92 : vector<1x1x128xf32> to vector<8x16x128xf32>
    %94 = arith.mulf %89, %93 : vector<8x16x128xf32>
    %c0_56 = arith.constant 0 : index
    %c0_57 = arith.constant 0 : index
    %95 = vector.load %arg8[%c0_56, %c0_57] : memref<1x128xf32, #tpu.memory_space<vmem>>, vector<1x128xf32>
    %96 = vector.shape_cast %95 : vector<1x128xf32> to vector<128xf32>
    %97 = vector.shape_cast %96 : vector<128xf32> to vector<1x1x128xf32>
    %98 = vector.broadcast %97 : vector<1x1x128xf32> to vector<8x16x128xf32>
    %99 = arith.addf %94, %98 : vector<8x16x128xf32>
    %c0_i32_58 = arith.constant 0 : i32
    %c0_i32_59 = arith.constant 0 : i32
    %c0_i32_60 = arith.constant 0 : i32
    %100 = tpu.memref_slice %arg10[%0, %c0_i32_58, %c0_i32_59, %c0_i32_60] : memref<2x12x20x128xf32, #tpu.memory_space<vmem>> -> memref<1x12x20x128xf32, #tpu.memory_space<vmem>>
    %101 = tpu.memref_squeeze %100 : memref<1x12x20x128xf32, #tpu.memory_space<vmem>> -> memref<12x20x128xf32, #tpu.memory_space<vmem>>
    %c2_61 = arith.constant 2 : index
    %c2_62 = arith.constant 2 : index
    %c0_63 = arith.constant 0 : index
    %102 = vector.load %101[%c2_61, %c2_62, %c0_63] : memref<12x20x128xf32, #tpu.memory_space<vmem>>, vector<8x16x128xf32>
    %103 = arith.addf %99, %102 : vector<8x16x128xf32>
    %cst_64 = arith.constant 0.000000e+00 : f32
    %104 = vector.broadcast %cst_64 : f32 to vector<8x16x128xf32>
    %105 = arith.maximumf %103, %104 : vector<8x16x128xf32>
    %c0_65 = arith.constant 0 : index
    %c0_66 = arith.constant 0 : index
    %c0_67 = arith.constant 0 : index
    %c0_68 = arith.constant 0 : index
    %106 = vector.load %arg9[%c0_65, %c0_66, %c0_67, %c0_68] : memref<1x8x16x128xf32, #tpu.memory_space<vmem>>, vector<1x8x16x128xf32>
    %107 = vector.shape_cast %106 : vector<1x8x16x128xf32> to vector<8x16x128xf32>
    %108 = vector.shape_cast %105 : vector<8x16x128xf32> to vector<1x8x16x128xf32>
    tpu.vector_store %arg9[%c0_65, %c0_66, %c0_67, %c0_68], %108 {strides = array<i32>} : memref<1x8x16x128xf32, #tpu.memory_space<vmem>>, vector<1x8x16x128xf32>,
    return
  }
  func.func @transform_1(%arg0: i32, %arg1: i32) -> (i32, i32, i32) {
    %c0_i32 = arith.constant 0 : i32
    %c0_i32_0 = arith.constant 0 : i32
    %c0_i32_1 = arith.constant 0 : i32
    %c0_i32_2 = arith.constant 0 : i32
    return %c0_i32, %c0_i32_0, %c0_i32_1 : i32, i32, i32
  }
  func.func @transform_2(%arg0: i32, %arg1: i32) -> (i32, i32, i32) {
    %c0_i32 = arith.constant 0 : i32
    %c0_i32_0 = arith.constant 0 : i32
    %c0_i32_1 = arith.constant 0 : i32
    %c0_i32_2 = arith.constant 0 : i32
    return %c0_i32, %c0_i32_0, %c0_i32_1 : i32, i32, i32
  }
  func.func @transform_3(%arg0: i32, %arg1: i32) -> (i32, i32) {
    %c0_i32 = arith.constant 0 : i32
    %c0_i32_0 = arith.constant 0 : i32
    %c0_i32_1 = arith.constant 0 : i32
    return %c0_i32, %c0_i32_0 : i32, i32
  }
  func.func @transform_4(%arg0: i32, %arg1: i32) -> (i32, i32) {
    %c0_i32 = arith.constant 0 : i32
    %c0_i32_0 = arith.constant 0 : i32
    %c0_i32_1 = arith.constant 0 : i32
    return %c0_i32, %c0_i32_0 : i32, i32
  }
  func.func @transform_5(%arg0: i32, %arg1: i32) -> (i32, i32) {
    %c0_i32 = arith.constant 0 : i32
    %c0_i32_0 = arith.constant 0 : i32
    %c0_i32_1 = arith.constant 0 : i32
    return %c0_i32, %c0_i32_0 : i32, i32
  }
  func.func @transform_6(%arg0: i32, %arg1: i32) -> (i32, i32) {
    %c0_i32 = arith.constant 0 : i32
    %c0_i32_0 = arith.constant 0 : i32
    %c0_i32_1 = arith.constant 0 : i32
    return %c0_i32, %c0_i32_0 : i32, i32
  }
  func.func @transform_7(%arg0: i32, %arg1: i32) -> (i32, i32, i32, i32) {
    %c0_i32 = arith.constant 0 : i32
    %c0_i32_0 = arith.constant 0 : i32
    %c0_i32_1 = arith.constant 0 : i32
    return %arg0, %arg1, %c0_i32, %c0_i32_0 : i32, i32, i32, i32
  }
}

</mosaic_0001>

<bundles_post_ra>
// kernel: tpu_custom_call.1
= control target key start
LH: loop header
LB: loop body
LE: loop exit
PB: predicated region body
PF: predicated region fallthrough
CT: control target
= control target key end

     0   :  { %12 = vsyncpa [#allocation6], 0  ;;  %s10810_s0 = inlined_call_operand.vmem [shape: f32[2,20,20,128], index: 0, kind: input, shape index: {}]   ;;  %s10811_s1 = inlined_call_operand.vmem [shape: bf16[3,384,128], index: 1, kind: input, shape index: {}]   ;;  %s10812_s2 = inlined_call_operand.vmem [shape: bf16[3,384,128], index: 2, kind: input, shape index: {}]   ;;  %s10813_s3 = inlined_call_operand.vmem [shape: f32[1,128], index: 3, kind: input, shape index: {}]   ;;  %s10814_s4 = inlined_call_operand.vmem [shape: f32[1,128], index: 4, kind: input, shape index: {}]   ;;  %s10815_s5 = inlined_call_operand.vmem [shape: f32[1,128], index: 5, kind: input, shape index: {}]   ;;  %s10816_s6 = inlined_call_operand.vmem [shape: f32[1,128], index: 6, kind: input, shape index: {}]   ;;  %s10817_s7 = inlined_call_operand.hbm [shape: f32[2,16,16,128], index: 7, kind: output, shape index: {}]  }
   0x1   :  { %14 = vsyncpa [#allocation6 + $0x1], 0  ;;  %s7295_s24 = smov 0   ;;  %s7297_s25 = smov 0  }
   0x2   :  { %s7299_s26 = smov 0   ;;  %s7301_s27 = smov 0  }
   0x3   :  { %s7303_s28 = smov 0   ;;  %s7305_s29 = smov 0  }
   0x4   :  { %s7307_s30 = smov 0   ;;  %s7309_s8 = smov 0  }
   0x5 LB: > { %10947 = sst [smem:[#allocation11_spill]] %s7247_s30  ;;  %s5937_s9 = sadd.s32 4294967295, %s7251_s8   ;;  %s7251_s8 = sphi %s7309_s8, %s20_s8   ;;  %s7247_s30 = sphi %s7307_s30, %s11366_s30   ;;  %s7243_s29 = sphi %s7305_s29, %s11371_s29   ;;  %s7239_s28 = sphi %s7303_s28, %s11364_s28   ;;  %s7235_s27 = sphi %s7301_s27, %s11370_s27   ;;  %s7231_s26 = sphi %s7299_s26, %s11369_s26   ;;  %s7227_s25 = sphi %s7297_s25, %s11368_s25   ;;  %s7223_s24 = sphi %s7295_s24, %s11367_s24  }
   0x6   : > { %s5938_s10 = sadd.s32 4294967294, %s7251_s8   ;;  %s29_s11 = sadd.s32 1, %s7243_s29 }
   0x7   : > { %p30_p0 = scmp.ge.s32.totalorder %s29_s11, 2  ;;  %s32_s12 = sadd.s32 1, %s7247_s30 }
   0x8   : > { %p177_p1 = scmp.ne.s32.totalorder %s7231_s26, %s7227_s25  ;;  %p178_p2 = scmp.eq.s32.totalorder %s5937_s9, 3 }
   0x9   : > { %s11373_s11 = smov (%p30_p0, %s29_s11), 0  ;;  %s11375_s12 = smov (!%p30_p0, %s32_s12), %s7247_s30 }
   0xa   : > { %10948 = sst [smem:[#allocation12_spill]] %s11373_s11  ;;  %s163_s13 = ssub.s32 %s7243_s29, %s11373_s11 }
   0xb   : > { %p7346_p3 = por %p178_p2, %p177_p1  ;;  %p34_p4 = scmp.ge.s32.totalorder %s11375_s12, 2 }
   0xc   : > { %p183_p5 = scmp.ne.s32.totalorder %s7227_s25, %s7223_s24  ;;  %p184_p6 = scmp.eq.s32.totalorder %s5938_s10, 3 }
   0xd   : > { %p5940_p7 = scmp.ge.s32.totalorder %s7251_s8, 1  ;;  %s11377_s12 = smov (%p34_p4, %s11375_s12), 0 }
   0xe   : > { %10950 = sst [smem:[#allocation13_spill]] %s11377_s12  ;;  %p7355_p8 = por %p184_p6, %p183_p5 }
   0xf   : > { %p220_p9 = scmp.lt.s32.totalorder %s7251_s8, 5  ;;  %s162_s16 = ssub.s32 %s7247_s30, %s11377_s12 }
  0x10   : > { %s167_s17 = sadd.s32 1, %s7231_s26  ;;  %s164_s18 = sor.u32 %s163_s13, %s162_s16 }
  0x11   : > { %p221_p10 = pnand %p5940_p7, %p220_p9  ;;  %p165_p11 = scmp.eq.s32.totalorder %s164_s18, 0 }
  0x13   : > { %s7364_s19 = scalar_select %p165_p11, %s7231_s26, %s167_s17  }
  0x14   : > { %224 = sbr.rel (%p221_p10) target bundleno = 1347 (0x543), region = 44 }
  0x19   : > { %s10819_s20 = sand.u32 1, %s7227_s25   ;;  %p246_p12 = scmp.lt.s32.totalorder %s7235_s27, 0 }
  0x1a   : > { %s5941_s21 = sshll.u32 %s10819_s20, 7  ;;  %s247_s22 = ssub.s32 0, %s7235_s27 }
  0x1b   : > { %s5942_s23 = smin.u32 %s7235_s27, %s247_s22  ;;  %s7374_s13 = scalar_lea.vmem [#allocation5], %s5941_s21 }
  0x1c   : > { %s249_s9 = sand.u32 1, %s5942_s23   ;;  %p5943_p13 = scmp.ne.s32.totalorder %s7235_s27, 0 }
  0x1d   : > { %s250_s10 = ssub.s32 0, %s249_s9  ;;  %s256_s16 = smul.u32 (!%p5943_p13), 480, %s7239_s28 }
  0x1e   : > { %s11379_s10 = smov (!%p246_p12, %s250_s10), %s249_s9  ;;  %255 = sbr.rel (%p5943_p13) target bundleno = 73 (0x49), region = 48 }
  0x1f   : > { %s7381_s12 = scalar_lea.vmem (!%p5943_p13), %s10810_s0, %s256_s16 }
  0x23   : > { %v270_v0 = vld [vmem:[%s7381_s12] sm:$0xff]  ;;  %v272_v1 = vld [vmem:[%s7381_s12 + $0x8] sm:$0xff]  ;;  %v274_v2 = vld [vmem:[%s7381_s12 + $0x18] sm:$0xff] }
  0x24   : > { %271 = vst [vmem:[#allocation2] sm:$0xff] %v270_v0  ;;  %v276_v3 = vld [vmem:[%s7381_s12 + $0x20] sm:$0xff]  ;;  %v278_v4 = vld [vmem:[%s7381_s12 + $0x30] sm:$0xff]  ;;  %v280_v5 = vld [vmem:[%s7381_s12 + $0x38] sm:$0xff] }
  0x25   : > { %273 = vst [vmem:[#allocation2 + $0x8] sm:$0xff] %v272_v1  ;;  %v282_v6 = vld [vmem:[%s7381_s12 + $0x48] sm:$0xff]  ;;  %v284_v7 = vld [vmem:[%s7381_s12 + $0x50] sm:$0xff]  ;;  %v286_v8 = vld [vmem:[%s7381_s12 + $0x60] sm:$0xff] }
  0x26   : > { %275 = vst [vmem:[#allocation2 + $0x18] sm:$0xff] %v274_v2  ;;  %v288_v9 = vld [vmem:[%s7381_s12 + $0x68] sm:$0xff]  ;;  %v290_v10 = vld [vmem:[%s7381_s12 + $0x78] sm:$0xff]  ;;  %v292_v11 = vld [vmem:[%s7381_s12 + $0x80] sm:$0xff] }
  0x27   : > { %277 = vst [vmem:[#allocation2 + $0x20] sm:$0xff] %v276_v3  ;;  %v294_v12 = vld [vmem:[%s7381_s12 + $0x90] sm:$0xff]  ;;  %v296_v13 = vld [vmem:[%s7381_s12 + $0x98] sm:$0xff]  ;;  %v298_v14 = vld [vmem:[%s7381_s12 + $0xa8] sm:$0xff] }
  0x28   : > { %279 = vst [vmem:[#allocation2 + $0x30] sm:$0xff] %v278_v4  ;;  %v300_v15 = vld [vmem:[%s7381_s12 + $0xb0] sm:$0xff]  ;;  %v302_v16 = vld [vmem:[%s7381_s12 + $0xc0] sm:$0xff]  ;;  %v304_v17 = vld [vmem:[%s7381_s12 + $0xc8] sm:$0xff] }
  0x29   : > { %281 = vst [vmem:[#allocation2 + $0x38] sm:$0xff] %v280_v5  ;;  %v306_v18 = vld [vmem:[%s7381_s12 + $0xd8] sm:$0xff]  ;;  %v308_v19 = vld [vmem:[%s7381_s12 + $0xe0] sm:$0xff]  ;;  %v310_v20 = vld [vmem:[%s7381_s12 + $0xf0] sm:$0xff] }
  0x2a   : > { %283 = vst [vmem:[#allocation2 + $0x48] sm:$0xff] %v282_v6  ;;  %v312_v21 = vld [vmem:[%s7381_s12 + $0xf8] sm:$0xff]  ;;  %v314_v22 = vld [vmem:[%s7381_s12 + $0x108] sm:$0xff]  ;;  %v316_v23 = vld [vmem:[%s7381_s12 + $0x110] sm:$0xff] }
  0x2b   : > { %285 = vst [vmem:[#allocation2 + $0x50] sm:$0xff] %v284_v7  ;;  %v5944_v24 = vld [vmem:[%s7381_s12 + $0x10] sm:$0xf]  ;;  %v5945_v25 = vld [vmem:[%s7381_s12 + $0x28] sm:$0xf] }
  0x2c   : > { %287 = vst [vmem:[#allocation2 + $0x60] sm:$0xff] %v286_v8  ;;  %v5946_v26 = vld [vmem:[%s7381_s12 + $0x40] sm:$0xf]  ;;  %v5947_v27 = vld [vmem:[%s7381_s12 + $0x58] sm:$0xf] }
  0x2d   : > { %289 = vst [vmem:[#allocation2 + $0x68] sm:$0xff] %v288_v9  ;;  %v5948_v28 = vld [vmem:[%s7381_s12 + $0x70] sm:$0xf]  ;;  %v5949_v29 = vld [vmem:[%s7381_s12 + $0x88] sm:$0xf] }
  0x2e   : > { %291 = vst [vmem:[#allocation2 + $0x78] sm:$0xff] %v290_v10  ;;  %v5950_v30 = vld [vmem:[%s7381_s12 + $0xa0] sm:$0xf]  ;;  %v5951_v31 = vld [vmem:[%s7381_s12 + $0xb8] sm:$0xf] }
  0x2f   : > { %293 = vst [vmem:[#allocation2 + $0x80] sm:$0xff] %v292_v11  ;;  %v5952_v32 = vld [vmem:[%s7381_s12 + $0xd0] sm:$0xf]  ;;  %v5953_v33 = vld [vmem:[%s7381_s12 + $0xe8] sm:$0xf] }
  0x30   : > { %295 = vst [vmem:[#allocation2 + $0x90] sm:$0xff] %v294_v12  ;;  %v5954_v34 = vld [vmem:[%s7381_s12 + $0x100] sm:$0xf]  ;;  %v5955_v35 = vld [vmem:[%s7381_s12 + $0x118] sm:$0xf] }
  0x31   : > { %297 = vst [vmem:[#allocation2 + $0x98] sm:$0xff] %v296_v13 }
  0x32   : > { %299 = vst [vmem:[#allocation2 + $0xa8] sm:$0xff] %v298_v14 }
  0x33   : > { %301 = vst [vmem:[#allocation2 + $0xb0] sm:$0xff] %v300_v15 }
  0x34   : > { %303 = vst [vmem:[#allocation2 + $0xc0] sm:$0xff] %v302_v16 }
  0x35   : > { %305 = vst [vmem:[#allocation2 + $0xc8] sm:$0xff] %v304_v17 }
  0x36   : > { %307 = vst [vmem:[#allocation2 + $0xd8] sm:$0xff] %v306_v18 }
  0x37   : > { %309 = vst [vmem:[#allocation2 + $0xe0] sm:$0xff] %v308_v19 }
  0x38   : > { %311 = vst [vmem:[#allocation2 + $0xf0] sm:$0xff] %v310_v20 }
  0x39   : > { %313 = vst [vmem:[#allocation2 + $0xf8] sm:$0xff] %v312_v21 }
  0x3a   : > { %315 = vst [vmem:[#allocation2 + $0x108] sm:$0xff] %v314_v22 }
  0x3b   : > { %317 = vst [vmem:[#allocation2 + $0x110] sm:$0xff] %v316_v23 }
  0x3c   : > { %329 = vst [vmem:[#allocation2 + $0x10] sm:$0xf] %v5944_v24 }
  0x3d   : > { %331 = vst [vmem:[#allocation2 + $0x28] sm:$0xf] %v5945_v25 }
  0x3e   : > { %333 = vst [vmem:[#allocation2 + $0x40] sm:$0xf] %v5946_v26 }
  0x3f   : > { %335 = vst [vmem:[#allocation2 + $0x58] sm:$0xf] %v5947_v27 }
  0x40   : > { %337 = vst [vmem:[#allocation2 + $0x70] sm:$0xf] %v5948_v28 }
  0x41   : > { %339 = vst [vmem:[#allocation2 + $0x88] sm:$0xf] %v5949_v29 }
  0x42   : > { %341 = vst [vmem:[#allocation2 + $0xa0] sm:$0xf] %v5950_v30 }
  0x43   : > { %343 = vst [vmem:[#allocation2 + $0xb8] sm:$0xf] %v5951_v31 }
  0x44   : > { %345 = vst [vmem:[#allocation2 + $0xd0] sm:$0xf] %v5952_v32 }
  0x45   : > { %347 = vst [vmem:[#allocation2 + $0xe8] sm:$0xf] %v5953_v33 }
  0x46   : > { %349 = vst [vmem:[#allocation2 + $0x100] sm:$0xf] %v5954_v34 }
  0x47   : > { %351 = vst [vmem:[#allocation2 + $0x118] sm:$0xf] %v5955_v35 }
  0x48   : > { %355 = vsyncadd [#allocation3], 3840 }
  0x49 PF: > { %s357_s22 = smul.u32 288, %s11379_s10  ;;  %s359_s9 = scalar_lea.sflag [#allocation3], %s11379_s10 }
  0x4b   : > { %s7421_s23 = scalar_lea.vmem [#allocation2], %s357_s22 }
  0x4c   : > { %7215 = dma.done.wait %s359_s9, 3840 }
  0x4d   : > { %7216 = vsyncadd %s359_s9, 4294963456  ;;  %s364_s16 = sadd.s32 1, %s7235_s27 }
  0x4e   : > { %p5957_p0 = scmp.ge.s32.totalorder %s364_s16, 2 }
  0x4f   : > { %s369_s12 = ssub.s32 (!%p5957_p0), 1, %s11379_s10  ;;  %s5875_s17 = smul.u32 (!%p5957_p0), 192, %s7235_s27 }
  0x50   : > { %368 = sbr.rel (%p5957_p0) target bundleno = 123 (0x7b), region = 74  ;;  %s377_s11 = scalar_lea.sflag (!%p5957_p0), [#allocation3], %s369_s12 }
  0x51   : > { %s5876_s18 = smul.u32 (!%p5957_p0), 480, %s7239_s28 }
  0x52   : > { %s375_s20 = smul.u32 (!%p5957_p0), 288, %s369_s12 }
  0x53   : > { %s5877_s21 = sadd.s32 (!%p5957_p0), %s5876_s18, %s5875_s17 }
  0x54   : > { %s7433_s30 = scalar_lea.vmem (!%p5957_p0), %s10810_s0, %s5877_s21  ;;  %s7438_s9 = scalar_lea.vmem (!%p5957_p0), [#allocation2], %s375_s20 }
  0x55   : > { %v5958_v36 = vld [vmem:[%s7433_s30 + $0xc0] sm:$0xff]  ;;  %v5959_v37 = vld [vmem:[%s7433_s30 + $0xc8] sm:$0xff]  ;;  %v5960_v38 = vld [vmem:[%s7433_s30 + $0xd8] sm:$0xff] }
  0x56   : > { %391 = vst [vmem:[%s7438_s9] sm:$0xff] %v5958_v36  ;;  %v5961_v39 = vld [vmem:[%s7433_s30 + $0xe0] sm:$0xff]  ;;  %v5962_v40 = vld [vmem:[%s7433_s30 + $0xf0] sm:$0xff]  ;;  %v5963_v41 = vld [vmem:[%s7433_s30 + $0xf8] sm:$0xff] }
  0x57   : > { %393 = vst [vmem:[%s7438_s9 + $0x8] sm:$0xff] %v5959_v37  ;;  %v5964_v42 = vld [vmem:[%s7433_s30 + $0x108] sm:$0xff]  ;;  %v5965_v43 = vld [vmem:[%s7433_s30 + $0x110] sm:$0xff]  ;;  %v5966_v44 = vld [vmem:[%s7433_s30 + $0x120] sm:$0xff] }
  0x58   : > { %395 = vst [vmem:[%s7438_s9 + $0x18] sm:$0xff] %v5960_v38  ;;  %v5967_v45 = vld [vmem:[%s7433_s30 + $0x128] sm:$0xff]  ;;  %v5968_v46 = vld [vmem:[%s7433_s30 + $0x138] sm:$0xff]  ;;  %v5969_v47 = vld [vmem:[%s7433_s30 + $0x140] sm:$0xff] }
  0x59   : > { %397 = vst [vmem:[%s7438_s9 + $0x20] sm:$0xff] %v5961_v39  ;;  %v5970_v48 = vld [vmem:[%s7433_s30 + $0x150] sm:$0xff]  ;;  %v5971_v49 = vld [vmem:[%s7433_s30 + $0x158] sm:$0xff]  ;;  %v5972_v50 = vld [vmem:[%s7433_s30 + $0x168] sm:$0xff] }
  0x5a   : > { %399 = vst [vmem:[%s7438_s9 + $0x30] sm:$0xff] %v5962_v40  ;;  %v5973_v51 = vld [vmem:[%s7433_s30 + $0x170] sm:$0xff]  ;;  %v5974_v52 = vld [vmem:[%s7433_s30 + $0x180] sm:$0xff]  ;;  %v5975_v53 = vld [vmem:[%s7433_s30 + $0x188] sm:$0xff] }
  0x5b   : > { %401 = vst [vmem:[%s7438_s9 + $0x38] sm:$0xff] %v5963_v41  ;;  %v5976_v54 = vld [vmem:[%s7433_s30 + $0x198] sm:$0xff]  ;;  %v5977_v55 = vld [vmem:[%s7433_s30 + $0x1a0] sm:$0xff]  ;;  %v5978_v56 = vld [vmem:[%s7433_s30 + $0x1b0] sm:$0xff] }
  0x5c   : > { %403 = vst [vmem:[%s7438_s9 + $0x48] sm:$0xff] %v5964_v42  ;;  %v5979_v57 = vld [vmem:[%s7433_s30 + $0x1b8] sm:$0xff]  ;;  %v5980_v58 = vld [vmem:[%s7433_s30 + $0x1c8] sm:$0xff]  ;;  %v5981_v59 = vld [vmem:[%s7433_s30 + $0x1d0] sm:$0xff] }
  0x5d   : > { %405 = vst [vmem:[%s7438_s9 + $0x50] sm:$0xff] %v5965_v43  ;;  %v5982_v60 = vld [vmem:[%s7433_s30 + $0xd0] sm:$0xf]  ;;  %v5984_v61 = vld [vmem:[%s7433_s30 + $0xe8] sm:$0xf] }
  0x5e   : > { %407 = vst [vmem:[%s7438_s9 + $0x60] sm:$0xff] %v5966_v44  ;;  %v5986_v62 = vld [vmem:[%s7433_s30 + $0x100] sm:$0xf]  ;;  %v5988_v63 = vld [vmem:[%s7433_s30 + $0x118] sm:$0xf] }
  0x5f   : > { %409 = vst [vmem:[%s7438_s9 + $0x68] sm:$0xff] %v5967_v45  ;;  %v5990_v0 = vld [vmem:[%s7433_s30 + $0x130] sm:$0xf]  ;;  %v5992_v1 = vld [vmem:[%s7433_s30 + $0x148] sm:$0xf] }
  0x60   : > { %411 = vst [vmem:[%s7438_s9 + $0x78] sm:$0xff] %v5968_v46  ;;  %v5994_v2 = vld [vmem:[%s7433_s30 + $0x160] sm:$0xf]  ;;  %v5996_v3 = vld [vmem:[%s7433_s30 + $0x178] sm:$0xf] }
  0x61   : > { %413 = vst [vmem:[%s7438_s9 + $0x80] sm:$0xff] %v5969_v47  ;;  %v5998_v4 = vld [vmem:[%s7433_s30 + $0x190] sm:$0xf]  ;;  %v6000_v5 = vld [vmem:[%s7433_s30 + $0x1a8] sm:$0xf] }
  0x62   : > { %415 = vst [vmem:[%s7438_s9 + $0x90] sm:$0xff] %v5970_v48  ;;  %v6002_v6 = vld [vmem:[%s7433_s30 + $0x1c0] sm:$0xf]  ;;  %v6004_v7 = vld [vmem:[%s7433_s30 + $0x1d8] sm:$0xf] }
  0x63   : > { %417 = vst [vmem:[%s7438_s9 + $0x98] sm:$0xff] %v5971_v49 }
  0x64   : > { %419 = vst [vmem:[%s7438_s9 + $0xa8] sm:$0xff] %v5972_v50 }
  0x65   : > { %421 = vst [vmem:[%s7438_s9 + $0xb0] sm:$0xff] %v5973_v51 }
  0x66   : > { %423 = vst [vmem:[%s7438_s9 + $0xc0] sm:$0xff] %v5974_v52 }
  0x67   : > { %425 = vst [vmem:[%s7438_s9 + $0xc8] sm:$0xff] %v5975_v53 }
  0x68   : > { %427 = vst [vmem:[%s7438_s9 + $0xd8] sm:$0xff] %v5976_v54 }
  0x69   : > { %429 = vst [vmem:[%s7438_s9 + $0xe0] sm:$0xff] %v5977_v55 }
  0x6a   : > { %431 = vst [vmem:[%s7438_s9 + $0xf0] sm:$0xff] %v5978_v56 }
  0x6b   : > { %433 = vst [vmem:[%s7438_s9 + $0xf8] sm:$0xff] %v5979_v57 }
  0x6c   : > { %435 = vst [vmem:[%s7438_s9 + $0x108] sm:$0xff] %v5980_v58 }
  0x6d   : > { %437 = vst [vmem:[%s7438_s9 + $0x110] sm:$0xff] %v5981_v59 }
  0x6e   : > { %5983 = vst [vmem:[%s7438_s9 + $0x10] sm:$0xf] %v5982_v60 }
  0x6f   : > { %5985 = vst [vmem:[%s7438_s9 + $0x28] sm:$0xf] %v5984_v61 }
  0x70   : > { %5987 = vst [vmem:[%s7438_s9 + $0x40] sm:$0xf] %v5986_v62 }
  0x71   : > { %5989 = vst [vmem:[%s7438_s9 + $0x58] sm:$0xf] %v5988_v63 }
  0x72   : > { %5991 = vst [vmem:[%s7438_s9 + $0x70] sm:$0xf] %v5990_v0 }
  0x73   : > { %5993 = vst [vmem:[%s7438_s9 + $0x88] sm:$0xf] %v5992_v1 }
  0x74   : > { %5995 = vst [vmem:[%s7438_s9 + $0xa0] sm:$0xf] %v5994_v2 }
  0x75   : > { %5997 = vst [vmem:[%s7438_s9 + $0xb8] sm:$0xf] %v5996_v3 }
  0x76   : > { %5999 = vst [vmem:[%s7438_s9 + $0xd0] sm:$0xf] %v5998_v4 }
  0x77   : > { %6001 = vst [vmem:[%s7438_s9 + $0xe8] sm:$0xf] %v6000_v5 }
  0x78   : > { %6003 = vst [vmem:[%s7438_s9 + $0x100] sm:$0xf] %v6002_v6 }
  0x79   : > { %6005 = vst [vmem:[%s7438_s9 + $0x118] sm:$0xf] %v6004_v7 }
  0x7a   : > { %475 = vsyncadd %s377_s11, 3840 }
  0x7b PF: > { %v6831_v8 = vld [vmem:[%s10811_s1 + $0xf8] sm:$0xff]  ;;  %v6830_v11 = vld [vmem:[%s10811_s1 + $0xf0] sm:$0xff]  ;;  %v6829_v14 = vld [vmem:[%s10811_s1 + $0xe8] sm:$0xff]  ;;  %vm10823_vm0 = vsmask.f32 7424  ;;  %vm10822_vm1 = vcmask 1046528  }
  0x7c   : > { %v6839_v9 = vld [vmem:[%s10811_s1 + $0x138] sm:$0xff]  ;;  %1758 = vmatpush.bf16.msra.mxu0 %v6831_v8  ;;  %v6838_v12 = vld [vmem:[%s10811_s1 + $0x130] sm:$0xff]  ;;  %v6837_v15 = vld [vmem:[%s10811_s1 + $0x128] sm:$0xff]  ;;  %vm999_vm2 = vcmask 1040384   ;;  %vm1005_vm3 = vcmask 1041409   ;;  %vm1011_vm4 = vcmask 1042434  }
  0x7d   : > { %v7520_v10 = vld [vmem:[%s10811_s1 + $0x178] sm:$0xff]  ;;  %1826 = vmatpush.bf16.msra.mxu1 %v6839_v9  ;;  %v7532_v13 = vld [vmem:[%s10811_s1 + $0x170] sm:$0xff]  ;;  %7013 = vmatpush.bf16.msra.mxu3 %v6839_v9  ;;  %v7544_v16 = vld [vmem:[%s10811_s1 + $0x168] sm:$0xff]  ;;  %vm1002_vm5 = vcmask 1041408   ;;  %vm1007_vm6 = vcmask 1042433   ;;  %vm1013_vm7 = vcmask 1043458  }
  0x7e   : > { %1894 = vmatpush.bf16.msra.mxu2 %v7520_v10  ;;  %v6828_v17 = vld [vmem:[%s10811_s1 + $0xe0] sm:$0xff]  ;;  %v6827_v43 = vld [vmem:[%s10811_s1 + $0xd8] sm:$0xff]  ;;  %vm1017_vm8 = vcmask 1043459   ;;  %vm1019_vm9 = vcmask 1044483   ;;  %vm1023_vm10 = vcmask 1044484   ;;  %v6826_v60 = vld [vmem:[%s10811_s1 + $0xd0] sm:$0xff] }
  0x7f   : > { %v6836_v27 = vld [vmem:[%s10811_s1 + $0x120] sm:$0xff]  ;;  %v6835_v44 = vld [vmem:[%s10811_s1 + $0x118] sm:$0xff]  ;;  %v6834_v61 = vld [vmem:[%s10811_s1 + $0x110] sm:$0xff]  ;;  %vm10827_vm11 = vcmask 1045508   ;;  %vm1029_vm12 = vcmask 1045509   ;;  %vm1031_vm13 = vcmask 1046533  }
  0x80   : > { %1759 = vmatpush.bf16.msra.mxu0 %v6830_v11  ;;  %v479_v18 = vld [vmem:[%s7421_s23 + $0x18] sm:$0xff]  ;;  %v480_v19 = vld [vmem:[%s7421_s23 + $0x20] sm:$0xff]  ;;  %v481_v20 = vld [vmem:[%s7421_s23 + $0x28] sm:$0xf]  ;;  %vm10836_vm14 = vcmask 1046534   ;;  %vm10824_vm15 = vcmask 1045504  }
  0x81   : > { %1827 = vmatpush.bf16.msra.mxu1 %v6838_v12  ;;  %7014 = vmatpush.bf16.msra.mxu3 %v6838_v12  ;;  %v515_v21 = vpack.c.bf16 %v479_v18, %v479_v18  ;;  %v516_v22 = vpack.c.bf16 %v480_v19, %v480_v19  ;;  %v517_v23 = vpack.c.bf16 %v481_v20, %v481_v20  ;;  %v482_v24 = vld [vmem:[%s7421_s23 + $0x30] sm:$0xff]  ;;  %v483_v25 = vld [vmem:[%s7421_s23 + $0x38] sm:$0xff]  ;;  %v484_v26 = vld [vmem:[%s7421_s23 + $0x40] sm:$0xf]  ;;  %s11242_s9 = sshll.u32 %s7235_s27, 3  ;;  %s5827_s17 = sshll.u32 %s7374_s13, 4  ;;  %s5828_s17 = int_to_ptr.vmem [resolvable:$true] %s5827_s17 }
  0x82   : > { %1895 = vmatpush.bf16.msra.mxu2 %v7532_v13  ;;  %v7561_v28 = vld [vmem:[%s10811_s1 + $0x160] sm:$0xff]  ;;  %v518_v29 = vpack.c.bf16 %v482_v24, %v482_v24  ;;  %v519_v30 = vpack.c.bf16 %v483_v25, %v483_v25  ;;  %v520_v31 = vpack.c.bf16 %v484_v26, %v484_v26  ;;  %v485_v32 = vld [vmem:[%s7421_s23 + $0x48] sm:$0xff]  ;;  %v486_v36 = vld [vmem:[%s7421_s23 + $0x50] sm:$0xff]  ;;  %s6390_s11 = sadd.s32 4294967295, %s11242_s9  ;;  %s6944_s9 = sshll.u32 %s7235_s27, 4 }
  0x83   : > { %v587_v33 = vunpack.c.l.b16 %v515_v21  ;;  %v588_v34 = vunpack.c.l.b16 %v516_v22  ;;  %v589_v35 = vunpack.c.l.b16 %v517_v23  ;;  %v521_v42 = vpack.c.bf16 %v485_v32, %v485_v32  ;;  %v7579_v45 = vld [vmem:[%s10811_s1 + $0x158] sm:$0xff]  ;;  %v487_v53 = vld [vmem:[%s7421_s23 + $0x58] sm:$0xf]  ;;  %v7608_v2 = vld [vmem:[%s10811_s1 + $0x150] sm:$0xff]  ;;  %s11363_s22 = sand.u32 1, %s7227_s25  }
  0x84   : > { %1760 = vmatpush.bf16.msra.mxu0 %v6829_v14  ;;  %v590_v37 = vunpack.c.l.b16 %v518_v29  ;;  %v591_v38 = vunpack.c.l.b16 %v519_v30  ;;  %v592_v39 = vunpack.c.l.b16 %v520_v31  ;;  %v522_v48 = vpack.c.bf16 %v486_v36, %v486_v36  ;;  %v6825_v11 = vld [vmem:[%s10811_s1 + $0xc8] sm:$0xff]  ;;  %s5812_s30 = scalar_lea.sflag [#allocation6], %s11363_s22 }
  0x85   : > { %1828 = vmatpush.bf16.msra.mxu1 %v6837_v15  ;;  %7015 = vmatpush.bf16.msra.mxu3 %v6837_v15  ;;  %v7566_v40 = vpack.c.b16 %v588_v34, %v587_v33  ;;  %v7568_v41 = vpack.c.b16 %v589_v35, %v589_v35  ;;  %v523_v0 = vpack.c.bf16 %v487_v53, %v487_v53  ;;  %v593_v1 = vunpack.c.l.b16 %v521_v42  ;;  %v6833_v12 = vld [vmem:[%s10811_s1 + $0x108] sm:$0xff]  ;;  %v6832_v33 = vld [vmem:[%s10811_s1 + $0x100] sm:$0xff] }
  0x86   : > { %1896 = vmatpush.bf16.msra.mxu2 %v7544_v16  ;;  %v7581_v46 = vpack.c.b16 %v591_v38, %v590_v37  ;;  %v7583_v47 = vpack.c.b16 %v592_v39, %v592_v39  ;;  %v594_v6 = vunpack.c.l.b16 %v522_v48  ;;  %v7626_v18 = vld [vmem:[%s10811_s1 + $0x148] sm:$0xff]  ;;  %v7670_v38 = vld [vmem:[%s10811_s1 + $0x140] sm:$0xff]  ;;  %v6815_v48 = vld [vmem:[%s10811_s1 + $0x78] sm:$0xff] }
  0x87   : > { %v661_v49 = vshrl.u32 %v7566_v40, 16  ;;  %v663_v50 = vshll.u32 %v7566_v40, 16  ;;  %v668_v51 = vshll.u32 %v7568_v41, 16  ;;  %v829_v52 = vrot.slane %v7566_v40, 1 }
  0x88   : > { %1761 = vmatpush.bf16.msra.mxu0 %v6828_v17  ;;  %v830_v54 = vrot.slane %v7568_v41, 1  ;;  %v676_v55 = vshrl.u32 %v7581_v46, 16  ;;  %v678_v56 = vshll.u32 %v7581_v46, 16  ;;  %v683_v59 = vshll.u32 %v7583_v47, 16 }
  0x89   : > { %1829 = vmatpush.bf16.msra.mxu1 %v6836_v27  ;;  %7016 = vmatpush.bf16.msra.mxu3 %v6836_v27  ;;  %v665_v57 = vrot.slane %v663_v50, 1  ;;  %v670_v58 = vrot.slane %v668_v51, 1  ;;  %v672_v4 = vshrl.u32 %v7568_v41, 16  ;;  %v832_v15 = vrot.slane %v7581_v46, 1  ;;  %v6824_v27 = vld [vmem:[%s10811_s1 + $0xc0] sm:$0xff] }
  0x8a   : > { %1897 = vmatpush.bf16.msra.mxu2 %v7561_v28  ;;  %v831_v62 = vsel %vm10822_vm1, %v829_v52, %v830_v54  ;;  %v680_v63 = vrot.slane %v678_v56, 1  ;;  %v7611_v5 = vrot.slane %v683_v59, 1  ;;  %vm1043_vm1 = vcmask 1046529   ;;  %v6814_v59 = vld [vmem:[%s10811_s1 + $0x70] sm:$0xff] }
  0x8b   : > { %v666_v3 = vor.u32 %v665_v57, %v661_v49  ;;  %v960_v9 = vrot.slane %v831_v62, 6  ;;  %v833_v17 = vrot.slane %v7583_v47, 1  ;;  %v7628_v19 = vor.u32 %v672_v4, %v670_v58  ;;  %v488_v4 = vld [vmem:[%s7421_s23 + $0x60] sm:$0xff] }
  0x8c   : > { %1762 = vmatpush.bf16.msra.mxu0 %v6827_v43  ;;  %v681_v7 = vor.u32 %v680_v63, %v676_v55  ;;  %v595_v21 = vunpack.c.l.b16 %v523_v0  ;;  %v7632_v22 = vpack.c.b16 %v594_v6, %v593_v1  ;;  %v687_v62 = vshrl.u32 %v7583_v47, 16 }
  0x8d   : > { %1830 = vmatpush.bf16.msra.mxu1 %v6835_v44  ;;  %7017 = vmatpush.bf16.msra.mxu3 %v6835_v44  ;;  %v671_v8 = vsel %vm10823_vm0, %v666_v3, %v670_v58  ;;  %v961_v58 = vrot.slane %v7628_v19, 7  ;;  %v962_v0 = vrot.slane %v830_v54, 6  ;;  %v524_v19 = vpack.c.bf16 %v488_v4, %v488_v4 }
  0x8e   : > { %1898 = vmatpush.bf16.msra.mxu2 %v7579_v45  ;;  %v959_v14 = vrot.slane %v671_v8, 7  ;;  %v686_v20 = vsel %vm10823_vm0, %v681_v7, %v7611_v5  ;;  %vm10952_vm0 = vcmask 1046528   ;;  %v691_v3 = vshrl.u32 %v7632_v22, 16 }
  0x8f   : > { %v834_v56 = vsel %vm10952_vm0, %v832_v15, %v833_v17  ;;  %v7706_v57 = vrot.slane %v686_v20, 7  ;;  %v1048_v6 = vsel %vm999_vm2, %v7568_v41, %v961_v58  ;;  %v490_v15 = vld [vmem:[%s7421_s23 + $0x70] sm:$0xf] }
  0x90   : > { %1763 = vmatpush.bf16.msra.mxu0 %v6826_v60  ;;  %v1001_v23 = vsel %vm999_vm2, %v7566_v40, %v959_v14  ;;  %v1006_v24 = vsel %vm1005_vm3, %v7566_v40, %v959_v14  ;;  %v1012_v25 = vsel %vm1011_vm4, %v7566_v40, %v959_v14  ;;  %v1018_v26 = vsel %vm1017_vm8, %v7566_v40, %v959_v14 }
  0x91   : > { %1831 = vmatpush.bf16.msra.mxu1 %v6834_v61  ;;  %7018 = vmatpush.bf16.msra.mxu3 %v6834_v61  ;;  %v7646_v29 = vsel %vm1002_vm5, %v1001_v23, %v960_v9  ;;  %v7649_v30 = vsel %vm1007_vm6, %v1006_v24, %v960_v9  ;;  %v7652_v31 = vsel %vm1013_vm7, %v1012_v25, %v960_v9  ;;  %v693_v61 = vshll.u32 %v7632_v22, 16 }
  0x92   : > { %1899 = vmatpush.bf16.msra.mxu2 %v7608_v2  ;;  %v7655_v32 = vsel %vm1019_vm9, %v1018_v26, %v960_v9  ;;  %v10832_v34 = vrot.slane %v7649_v30, 1  ;;  %v10831_v35 = vrot.slane %v7652_v31, 2  ;;  %v1024_v37 = vsel %vm1023_vm10, %v7566_v40, %v959_v14  ;;  %1375 = vst [vmem:[#allocation1] ss:$9 sm:$0xff] %v7646_v29 }
  0x93   : > { %v10830_v36 = vrot.slane %v7655_v32, 3  ;;  %v7673_v39 = vsel %vm10827_vm11, %v1024_v37, %v960_v9  ;;  %v1030_v42 = vsel %vm1029_vm12, %v7566_v40, %v959_v14  ;;  %v1036_v43 = vsel %vm10836_vm14, %v7566_v40, %v959_v14 }
  0x94   : > { %1764 = vmatpush.bf16.msra.mxu0 %v6825_v11  ;;  %v1042_v44 = vsel %vm10952_vm0, %v959_v14, %v7566_v40  ;;  %v10829_v49 = vrot.slane %v7673_v39, 4  ;;  %v7686_v50 = vsel %vm1031_vm13, %v1030_v42, %v960_v9  ;;  %v7689_v51 = vsel %vm10824_vm15, %v960_v9, %v1036_v43  ;;  %1378 = vst [vmem:[#allocation1 + $0x1] ss:$9 sm:$0xff] %v10832_v34 }
  0x95   : > { %1832 = vmatpush.bf16.msra.mxu1 %v6833_v12  ;;  %v7692_v52 = vsel %vm1043_vm1, %v960_v9, %v1042_v44  ;;  %7019 = vmatpush.bf16.msra.mxu3 %v6833_v12  ;;  %v10828_v40 = vrot.slane %v7686_v50, 5  ;;  %v10826_v53 = vrot.slane %v7689_v51, 6  ;;  %1381 = vst [vmem:[#allocation1 + $0x2] ss:$9 sm:$0xff] %v10831_v35  ;;  %v7715_v60 = vpack.c.b16 %v595_v21, %v595_v21  ;;  %v489_v9 = vld [vmem:[%s7421_s23 + $0x68] sm:$0xff] }
  0x96   : > { %1900 = vmatpush.bf16.msra.mxu2 %v7626_v18  ;;  %v10825_v55 = vrot.slane %v7692_v52, 7  ;;  %1384 = vst [vmem:[#allocation1 + $0x3] ss:$9 sm:$0xff] %v10830_v36  ;;  %v7723_v63 = vrot.slane %v834_v56, 6  ;;  %v1055_v1 = vsel %vm1005_vm3, %v7581_v46, %v7706_v57  ;;  %v1059_v7 = vsel %vm1011_vm4, %v7581_v46, %v7706_v57 }
  0x97   : > { %1387 = vst [vmem:[#allocation1 + $0x4] ss:$9 sm:$0xff] %v10829_v49  ;;  %v695_v8 = vrot.slane %v693_v61, 1  ;;  %v698_v54 = vshll.u32 %v7715_v60, 16  ;;  %v1063_v11 = vsel %vm1017_vm8, %v7581_v46, %v7706_v57  ;;  %v689_v12 = vor.u32 %v687_v62, %v7611_v5 }
  0x98   : > { %1765 = vmatpush.bf16.msra.mxu0 %v6824_v27  ;;  %1390 = vst [vmem:[#allocation1 + $0x5] ss:$9 sm:$0xff] %v10828_v40  ;;  %v1056_v41 = vsel %vm1007_vm6, %v1055_v1, %v7723_v63  ;;  %v1067_v14 = vsel %vm1023_vm10, %v7581_v46, %v7706_v57  ;;  %v7756_v20 = vsel %vm1002_vm5, %v1048_v6, %v962_v0  ;;  %v835_v1 = vrot.slane %v7632_v22, 1 }
  0x99   : > { %1833 = vmatpush.bf16.msra.mxu1 %v6832_v33  ;;  %7020 = vmatpush.bf16.msra.mxu3 %v6832_v33  ;;  %1393 = vst [vmem:[#allocation1 + $0x6] ss:$9 sm:$0xff] %v10826_v53  ;;  %v1060_v21 = vsel %vm1013_vm7, %v1059_v7, %v7723_v63  ;;  %v1071_v5 = vsel %vm1029_vm12, %v7581_v46, %v7706_v57  ;;  %v7769_v27 = vrot.slane %v698_v54, 1  ;;  %v7775_v37 = vrot.slane %v1056_v41, 1 }
  0x9a   : > { %1901 = vmatpush.bf16.msra.mxu2 %v7670_v38  ;;  %1396 = vst [vmem:[#allocation1 + $0x7] ss:$9 sm:$0xff] %v10825_v55  ;;  %v525_v23 = vpack.c.bf16 %v489_v9, %v489_v9  ;;  %v1064_v24 = vsel %vm1019_vm9, %v1063_v11, %v7723_v63  ;;  %v1075_v25 = vsel %vm10836_vm14, %v7581_v46, %v7706_v57  ;;  %v7779_v56 = vrot.slane %v1060_v21, 2 }
  0x9b   : > { %v696_v26 = vor.u32 %v695_v8, %v691_v3  ;;  %v1068_v42 = vsel %vm10827_vm11, %v1067_v14, %v7723_v63  ;;  %v1072_v58 = vsel %vm1031_vm13, %v1071_v5, %v7723_v63  ;;  %v7783_v62 = vrot.slane %v1064_v24, 3 }
  0x9c   : > { %2390 = vmatpush.bf16.msrb.mxu0 %v6815_v48  ;;  %v597_v61 = vunpack.c.l.b16 %v525_v23  ;;  %v1076_v0 = vsel %vm10824_vm15, %v7723_v63, %v1075_v25  ;;  %v836_v3 = vrot.slane %v7715_v60, 1  ;;  %v7790_v4 = vrot.slane %v1068_v42, 4 }
  0x9d   : > { %7021 = vmatpush.bf16.msrb.mxu3 %v7520_v10  ;;  %v1052_v10 = vsel %vm999_vm2, %v7581_v46, %v7706_v57  ;;  %vm10953_vm0 = vsmask.f32 7424  ;;  %v7795_v8 = vrot.slane %v1072_v58, 5  ;;  %v7799_v54 = vrot.slane %v1076_v0, 6 }
  0x9e   : > { %v7773_v33 = vsel %vm1002_vm5, %v1052_v10, %v7723_v63  ;;  %v701_v6 = vsel %vm10953_vm0, %v696_v26, %v7769_v27  ;;  %v965_v9 = vrot.slane %v689_v12, 7  ;;  %vm10954_vm0 = vcmask 1046528  }
  0x9f   : > { %v837_v10 = vsel %vm10954_vm0, %v835_v1, %v836_v3  ;;  %v7808_v41 = vrot.slane %v701_v6, 7  ;;  %vm10955_vm15 = vmmov %vm10954_vm0  ;;  %v966_v21 = vrot.slane %v833_v17, 6 }
  0xa0   : > { %2391 = vmatpush.bf16.msrb.mxu0 %v6814_v59  ;;  %v596_v59 = vunpack.c.l.b16 %v524_v19  ;;  %v1079_v14 = vsel %vm10955_vm15, %v7706_v57, %v7581_v46  ;;  %v492_v19 = vld [vmem:[%s7421_s23 + $0x80] sm:$0xff]  ;;  %v7824_v5 = vrot.slane %v837_v10, 6  ;;  %v1084_v57 = vsel %vm999_vm2, %v7583_v47, %v965_v9 }
  0xa1   : > { %7022 = vmatpush.bf16.msrb.mxu3 %v7532_v13  ;;  %v526_v13 = vpack.c.bf16 %v490_v15, %v490_v15  ;;  %v1397_v43 = vld [vmem:[#allocation1] sm:$0xff]  ;;  %v1398_v44 = vld [vmem:[#allocation1 + $0x9] sm:$0xff]  ;;  %v1399_v48 = vld [vmem:[#allocation1 + $0x12] sm:$0xff]  ;;  %v1080_v46 = vsel %vm1043_vm1, %v7723_v63, %v1079_v14  ;;  %v1091_v23 = vsel %vm1005_vm3, %v7632_v22, %v7808_v41  ;;  %v528_v25 = vpack.c.bf16 %v492_v19, %v492_v19 }
  0xa2   : > { %1766 = vmatmul.bf16.vlgmr.msra.gmra.mxu0 %v1397_v43  ;;  %1834 = vmatmul.bf16.vlgmr.msra.gmra.mxu1 %v1398_v44  ;;  %1400 = vst [vmem:[#allocation1] ss:$9 sm:$0xff] %v7756_v20  ;;  %v7802_v11 = vpack.c.b16 %v597_v61, %v596_v59  ;;  %v491_v15 = vld [vmem:[%s7421_s23 + $0x78] sm:$0xff]  ;;  %v1099_v26 = vsel %vm1017_vm8, %v7632_v22, %v7808_v41  ;;  %v7841_v47 = vrot.slane %v1080_v46, 7  ;;  %v493_v43 = vld [vmem:[%s7421_s23 + $0x88] sm:$0xf] }
  0xa3   : > { %1902 = vmatmul.bf16.vlgmr.msra.gmra.mxu2 %v1399_v48  ;;  %1401 = vst [vmem:[#allocation1 + $0x1] ss:$9 sm:$0xff] %v7773_v33  ;;  %v598_v7 = vunpack.c.l.b16 %v526_v13  ;;  %v527_v17 = vpack.c.bf16 %v491_v15, %v491_v15  ;;  %v7844_v13 = vsel %vm1002_vm5, %v1084_v57, %v966_v21  ;;  %v1088_v44 = vsel %vm999_vm2, %v7632_v22, %v7808_v41 }
  0xa4   : > { %1403 = vst [vmem:[#allocation1 + $0x2] ss:$9 sm:$0xff] %v7775_v37  ;;  %v708_v12 = vshll.u32 %v7802_v11, 16  ;;  %v706_v63 = vshrl.u32 %v7802_v11, 16  ;;  %v1092_v48 = vsel %vm1007_vm6, %v1091_v23, %v7824_v5  ;;  %v1103_v58 = vsel %vm1023_vm10, %v7632_v22, %v7808_v41 }
  0xa5   : > { %7023 = vmatpush.bf16.msrb.mxu3 %v7544_v16  ;;  %1405 = vst [vmem:[#allocation1 + $0x3] ss:$9 sm:$0xff] %v7779_v56  ;;  %v7813_v16 = vpack.c.b16 %v598_v7, %v598_v7  ;;  %v702_v59 = vshrl.u32 %v7715_v60, 16  ;;  %v1100_v0 = vsel %vm1019_vm9, %v1099_v26, %v7824_v5  ;;  %v529_v7 = vpack.c.bf16 %v493_v43, %v493_v43 }
  0xa6   : > { %1407 = vst [vmem:[#allocation1 + $0x4] ss:$9 sm:$0xff] %v7783_v62  ;;  %v710_v42 = vrot.slane %v708_v12, 1  ;;  %v599_v9 = vunpack.c.l.b16 %v527_v17  ;;  %v600_v10 = vunpack.c.l.b16 %v528_v25  ;;  %v7868_v19 = vsel %vm1002_vm5, %v1088_v44, %v7824_v5 }
  0xa7   : > { %1409 = vst [vmem:[#allocation1 + $0x5] ss:$9 sm:$0xff] %v7790_v4  ;;  %v713_v24 = vshll.u32 %v7813_v16, 16  ;;  %v7870_v21 = vrot.slane %v1092_v48, 1  ;;  %v1104_v46 = vsel %vm10827_vm11, %v1103_v58, %v7824_v5  ;;  %v704_v17 = vor.u32 %v702_v59, %v7769_v27 }
  0xa8   : > { %1411 = vst [vmem:[#allocation1 + $0x6] ss:$9 sm:$0xff] %v7795_v8  ;;  %v711_v6 = vor.u32 %v710_v42, %v706_v63  ;;  %v838_v25 = vrot.slane %v7802_v11, 1  ;;  %vm10956_vm15 = vsmask.f32 7424  ;;  %v6813_v63 = vld [vmem:[%s10811_s1 + $0x68] sm:$0xff]  ;;  %v601_v42 = vunpack.c.l.b16 %v529_v7 }
  0xa9   : > { %7024 = vmatpush.bf16.msrb.mxu3 %v7561_v28  ;;  %1413 = vst [vmem:[#allocation1 + $0x7] ss:$9 sm:$0xff] %v7799_v54  ;;  %v1095_v28 = vsel %vm1011_vm4, %v7632_v22, %v7808_v41  ;;  %v7864_v1 = vrot.slane %v713_v24, 1  ;;  %v7880_v24 = vrot.slane %v1100_v0, 3  ;;  %v7894_v43 = vpack.c.b16 %v600_v10, %v599_v9  ;;  %2392 = vmatpush.bf16.msrb.mxu0 %v6813_v63  ;;  %v495_v10 = vld [vmem:[%s7421_s23 + $0x98] sm:$0xff] }
  0xaa   : > { %v1096_v61 = vsel %vm1013_vm7, %v1095_v28, %v7824_v5  ;;  %v839_v28 = vrot.slane %v7813_v16, 1  ;;  %v969_v48 = vrot.slane %v704_v17, 7  ;;  %v1111_v59 = vsel %vm10836_vm14, %v7632_v22, %v7808_v41 }
  0xab   : > { %v7875_v57 = vrot.slane %v1096_v61, 2  ;;  %v716_v26 = vsel %vm10956_vm15, %v711_v6, %v7864_v1  ;;  %vm10957_vm15 = vmmov %vm10954_vm0  ;;  %v7914_v61 = vpack.c.b16 %v601_v42, %v601_v42  ;;  %v723_v0 = vshll.u32 %v7894_v43, 16 }
  0xac   : > { %v840_v44 = vsel %vm10954_vm0, %v838_v25, %v839_v28  ;;  %v7905_v58 = vrot.slane %v716_v26, 7  ;;  %v970_v6 = vrot.slane %v836_v3, 6  ;;  %vm10958_vm0 = vcmask 1045504  }
  0xad   : > { %7025 = vmatpush.bf16.msrb.mxu3 %v7579_v45  ;;  %v1107_v45 = vsel %vm1029_vm12, %v7632_v22, %v7808_v41  ;;  %v7922_v7 = vrot.slane %v840_v44, 6  ;;  %v1112_v9 = vsel %vm10958_vm0, %v7824_v5, %v1111_v59  ;;  %v717_v59 = vshrl.u32 %v7813_v16, 16 }
  0xae   : > { %v1108_v23 = vsel %vm1031_vm13, %v1107_v45, %v7824_v5  ;;  %v494_v45 = vld [vmem:[%s7421_s23 + $0x90] sm:$0xff]  ;;  %v1131_v3 = vsel %vm1011_vm4, %v7802_v11, %v7905_v58  ;;  %v7940_v17 = vrot.slane %v1112_v9, 6  ;;  %v1124_v26 = vsel %vm999_vm2, %v7802_v11, %v7905_v58 }
  0xaf   : > { %v7896_v27 = vrot.slane %v1108_v23, 5  ;;  %v496_v23 = vld [vmem:[%s7421_s23 + $0xa0] sm:$0xf]  ;;  %v1139_v42 = vsel %vm1023_vm10, %v7802_v11, %v7905_v58  ;;  %vm10961_vm0 = vcmask 1046528  }
  0xb0   : > { %v1414_v14 = vld [vmem:[#allocation1] sm:$0xff]  ;;  %v1415_v12 = vld [vmem:[#allocation1 + $0x9] sm:$0xff]  ;;  %v1416_v15 = vld [vmem:[#allocation1 + $0x12] sm:$0xff] }
  0xb1   : > { %7026 = vmatpush.bf16.msrb.mxu3 %v7608_v2  ;;  %1418 = vst [vmem:[#allocation1] ss:$9 sm:$0xff] %v7841_v47  ;;  %v7886_v2 = vrot.slane %v1104_v46, 4  ;;  %v728_v46 = vshll.u32 %v7914_v61, 16 }
  0xb2   : > { %1771 = vmatmul.bf16.gmra.mxu0 %v1414_v14  ;;  %1839 = vmatmul.bf16.gmra.mxu1 %v1415_v12  ;;  %1419 = vst [vmem:[#allocation1 + $0x1] ss:$9 sm:$0xff] %v7844_v13  ;;  %v1127_v14 = vsel %vm1005_vm3, %v7802_v11, %v7905_v58  ;;  %v721_v12 = vshrl.u32 %v7894_v43, 16 }
  0xb3   : > { %1907 = vmatmul.bf16.gmra.mxu2 %v1416_v15  ;;  %1420 = vst [vmem:[#allocation1 + $0x2] ss:$9 sm:$0xff] %v7868_v19  ;;  %v725_v15 = vrot.slane %v723_v0, 1  ;;  %v1128_v63 = vsel %vm1007_vm6, %v1127_v14, %v7922_v7  ;;  %v7963_v14 = vrot.slane %v728_v46, 1  ;;  %v10833_v46 = vrot.slane %v7914_v61, 1 }
  0xb4   : > { %1422 = vst [vmem:[#allocation1 + $0x3] ss:$9 sm:$0xff] %v7870_v21 }
  0xb5   : > { %7027 = vmatpush.bf16.msrb.mxu3 %v7626_v18  ;;  %1424 = vst [vmem:[#allocation1 + $0x4] ss:$9 sm:$0xff] %v7875_v57  ;;  %v1115_v18 = vsel %vm10957_vm15, %v7808_v41, %v7632_v22  ;;  %v1120_v41 = vsel %vm999_vm2, %v7715_v60, %v969_v48  ;;  %v1135_v60 = vsel %vm1017_vm8, %v7802_v11, %v7905_v58  ;;  %vm10960_vm15 = vsmask.f32 7424 }
  0xb6   : > { %1426 = vst [vmem:[#allocation1 + $0x5] ss:$9 sm:$0xff] %v7880_v24  ;;  %v1116_v22 = vsel %vm1043_vm1, %v7824_v5, %v1115_v18  ;;  %v531_v5 = vpack.c.bf16 %v495_v10, %v495_v10  ;;  %v7956_v44 = vsel %vm1002_vm5, %v1120_v41, %v970_v6  ;;  %v1132_v48 = vsel %vm1013_vm7, %v1131_v3, %v7922_v7 }
  0xb7   : > { %1428 = vst [vmem:[#allocation1 + $0x6] ss:$9 sm:$0xff] %v7886_v2  ;;  %v7945_v25 = vrot.slane %v1116_v22, 7  ;;  %v532_v18 = vpack.c.bf16 %v496_v23, %v496_v23  ;;  %v1136_v10 = vsel %vm1019_vm9, %v1135_v60, %v7922_v7  ;;  %v726_v22 = vor.u32 %v725_v15, %v721_v12 }
  0xb8   : > { %1430 = vst [vmem:[#allocation1 + $0x7] ss:$9 sm:$0xff] %v7896_v27  ;;  %v7967_v6 = vsel %vm1002_vm5, %v1124_v26, %v7922_v7  ;;  %v7969_v41 = vrot.slane %v1128_v63, 1  ;;  %v1140_v3 = vsel %vm10827_vm11, %v1139_v42, %v7922_v7  ;;  %v603_v23 = vunpack.c.l.b16 %v531_v5 }
  0xb9   : > { %7028 = vmatpush.bf16.msrb.mxu3 %v7670_v38  ;;  %v530_v38 = vpack.c.bf16 %v494_v45, %v494_v45  ;;  %v7974_v53 = vrot.slane %v1132_v48, 2  ;;  %v7977_v12 = vrot.slane %v1136_v10, 3  ;;  %v841_v15 = vrot.slane %v7894_v43, 1  ;;  %v498_v10 = vld [vmem:[%s7421_s23 + $0xb0] sm:$0xff] }
  0xba   : > { %v7983_v60 = vrot.slane %v1140_v3, 4  ;;  %v731_v5 = vsel %vm10960_vm15, %v726_v22, %v7963_v14  ;;  %v604_v26 = vunpack.c.l.b16 %v532_v18  ;;  %v1147_v42 = vsel %vm10836_vm14, %v7802_v11, %v7905_v58  ;;  %vm10962_vm15 = vmmov %vm10961_vm0 }
  0xbb   : > { %v602_v55 = vunpack.c.l.b16 %v530_v38  ;;  %v719_v38 = vor.u32 %v717_v59, %v7864_v1  ;;  %v1143_v1 = vsel %vm1029_vm12, %v7802_v11, %v7905_v58  ;;  %v843_v48 = vsel %vm10961_vm0, %v841_v15, %v10833_v46 }
  0xbc   : > { %10959 = vst [vmem:[#allocation14_spill] sm:$0xff] %v7983_v60  ;;  %v1151_v18 = vsel %vm10962_vm15, %v7905_v58, %v7802_v11  ;;  %vm10963_vm11 = vcmask 1045504   ;;  %v8014_v22 = vpack.c.b16 %v604_v26, %v604_v26  ;;  %vm10973_vm15 = vcmask 1045508  }
  0xbd   : > { %v7992_v63 = vpack.c.b16 %v603_v23, %v602_v55  ;;  %v973_v59 = vrot.slane %v719_v38, 7  ;;  %v1144_v55 = vsel %vm1031_vm13, %v1143_v1, %v7922_v7  ;;  %v974_v23 = vrot.slane %v839_v28, 6 }
  0xbe   : > { %v8019_v38 = vrot.slane %v843_v48, 6  ;;  %v8021_v15 = vrot.slane %v1144_v55, 5  ;;  %v1152_v11 = vsel %vm1043_vm1, %v7922_v7, %v1151_v18 }
  0xbf   : > { %v1431_v0 = vld [vmem:[#allocation1] sm:$0xff]  ;;  %v1432_v45 = vld [vmem:[#allocation1 + $0x9] sm:$0xff]  ;;  %v1433_v9 = vld [vmem:[#allocation1 + $0x12] sm:$0xff]  ;;  %v738_v3 = vshll.u32 %v7992_v63, 16  ;;  %v1156_v58 = vsel %vm999_vm2, %v7813_v16, %v973_v59  ;;  %v736_v55 = vshrl.u32 %v7992_v63, 16  ;;  %v743_v59 = vshll.u32 %v8014_v22, 16 }
  0xc0   : > { %1435 = vst [vmem:[#allocation1] ss:$9 sm:$0xff] %v7940_v17  ;;  %v8041_v18 = vrot.slane %v1152_v11, 7  ;;  %v8049_v36 = vsel %vm1002_vm5, %v1156_v58, %v974_v23 }
  0xc1   : > { %1437 = vst [vmem:[#allocation1 + $0x1] ss:$9 sm:$0xff] %v7945_v25  ;;  %v740_v16 = vrot.slane %v738_v3, 1  ;;  %v8063_v58 = vrot.slane %v743_v59, 1 }
  0xc2   : > { %1776 = vmatmul.bf16.gmra.mxu0 %v1431_v0  ;;  %1844 = vmatmul.bf16.gmra.mxu1 %v1432_v45  ;;  %1438 = vst [vmem:[#allocation1 + $0x2] ss:$9 sm:$0xff] %v7956_v44  ;;  %v8002_v0 = vrot.slane %v731_v5, 7  ;;  %v1148_v45 = vsel %vm10963_vm11, %v7922_v7, %v1147_v42  ;;  %v534_v42 = vpack.c.bf16 %v498_v10, %v498_v10  ;;  %v499_v7 = vld [vmem:[%s7421_s23 + $0xb8] sm:$0xf] }
  0xc3   : > { %1912 = vmatmul.bf16.gmra.mxu2 %v1433_v9  ;;  %1439 = vst [vmem:[#allocation1 + $0x3] ss:$9 sm:$0xff] %v7967_v6  ;;  %v497_v9 = vld [vmem:[%s7421_s23 + $0xa8] sm:$0xff]  ;;  %v8030_v1 = vrot.slane %v1148_v45, 6  ;;  %v535_v35 = vpack.c.bf16 %v499_v7, %v499_v7  ;;  %v741_v23 = vor.u32 %v740_v16, %v736_v55  ;;  %v10837_v7 = vrot.slane %v8014_v22, 1 }
  0xc4   : > { %1441 = vst [vmem:[#allocation1 + $0x4] ss:$9 sm:$0xff] %v7969_v41  ;;  %v1163_v5 = vsel %vm1005_vm3, %v7894_v43, %v8002_v0  ;;  %v1167_v28 = vsel %vm1011_vm4, %v7894_v43, %v8002_v0  ;;  %v533_v26 = vpack.c.bf16 %v497_v9, %v497_v9  ;;  %v1171_v48 = vsel %vm1017_vm8, %v7894_v43, %v8002_v0 }
  0xc5   : > { %1443 = vst [vmem:[#allocation1 + $0x5] ss:$9 sm:$0xff] %v7974_v53  ;;  %v1160_v45 = vsel %vm999_vm2, %v7894_v43, %v8002_v0  ;;  %v1164_v9 = vsel %vm1007_vm6, %v1163_v5, %v8019_v38  ;;  %v1168_v3 = vsel %vm1013_vm7, %v1167_v28, %v8019_v38  ;;  %v1172_v11 = vsel %vm1019_vm9, %v1171_v48, %v8019_v38 }
  0xc6   : > { %1445 = vst [vmem:[#allocation1 + $0x6] ss:$9 sm:$0xff] %v7977_v12  ;;  %v605_v34 = vunpack.c.l.b16 %v533_v26  ;;  %v606_v46 = vunpack.c.l.b16 %v534_v42  ;;  %v8058_v5 = vsel %vm1002_vm5, %v1160_v45, %v8019_v38  ;;  %v8065_v28 = vrot.slane %v1168_v3, 2 }
  0xc7   : > { %1447 = vst [vmem:[#allocation1 + $0x7] ss:$9 sm:$0xff] %v7983_v60  ;;  %v8060_v60 = vrot.slane %v1164_v9, 1  ;;  %v732_v48 = vshrl.u32 %v7914_v61, 16  ;;  %v8069_v26 = vrot.slane %v1172_v11, 3  ;;  %v844_v42 = vrot.slane %v7992_v63, 1 }
  0xc8   : > { %10964 = vst [vmem:[#allocation15_spill] sm:$0xff] %v8021_v15  ;;  %v607_v55 = vunpack.c.l.b16 %v535_v35  ;;  %v8076_v16 = vpack.c.b16 %v606_v46, %v605_v34  ;;  %vm10972_vm11 = vsmask.f32 7424  ;;  %v1179_v45 = vsel %vm1029_vm12, %v7894_v43, %v8002_v0 }
  0xc9   : > { %10965 = vst [vmem:[#allocation16_spill] sm:$0xff] %v8030_v1  ;;  %v746_v59 = vsel %vm10972_vm11, %v741_v23, %v8063_v58  ;;  %v1183_v34 = vsel %vm10836_vm14, %v7894_v43, %v8002_v0  ;;  %v846_v35 = vsel %vm10961_vm0, %v844_v42, %v10837_v7  ;;  %vm10974_vm11 = vmmov %vm10961_vm0  ;;  %v1180_v11 = vsel %vm1031_vm13, %v1179_v45, %v8019_v38  ;;  %v500_v7 = vld [vmem:[%s7421_s23 + $0xc0] sm:$0xff] }
  0xca   : > { %10966 = vst [vmem:[#allocation17_spill] sm:$0xff] %v8041_v18  ;;  %v8095_v46 = vrot.slane %v746_v59, 7  ;;  %v1187_v9 = vsel %vm10974_vm11, %v8002_v0, %v7894_v43  ;;  %v753_v3 = vshll.u32 %v8076_v16, 16  ;;  %vm10975_vm14 = vcmask 1045504  }
  0xcb   : > { %10967 = vst [vmem:[#allocation18_spill] sm:$0xff] %v8049_v36  ;;  %v8109_v42 = vrot.slane %v846_v35, 6  ;;  %vm10987_vm11 = vcmask 1045508  }
  0xcc   : > { %10968 = vst [vmem:[#allocation19_spill] sm:$0xff] %v8058_v5  ;;  %v755_v45 = vrot.slane %v753_v3, 1  ;;  %v1196_v3 = vsel %vm999_vm2, %v7992_v63, %v8095_v46 }
  0xcd   : > { %10969 = vst [vmem:[#allocation20_spill] sm:$0xff] %v8060_v60 }
  0xce   : > { %v1448_v10 = vld [vmem:[#allocation1] sm:$0xff]  ;;  %v1449_v40 = vld [vmem:[#allocation1 + $0x9] sm:$0xff]  ;;  %v1450_v49 = vld [vmem:[#allocation1 + $0x12] sm:$0xff]  ;;  %10970 = vst [vmem:[#allocation21_spill] sm:$0xff] %v8065_v28 }
  0xcf   : > { %1452 = vst [vmem:[#allocation1] ss:$9 sm:$0xff] %v8021_v15 }
  0xd0   : > { %1454 = vst [vmem:[#allocation1 + $0x1] ss:$9 sm:$0xff] %v8030_v1 }
  0xd1   : > { %1456 = vst [vmem:[#allocation1 + $0x2] ss:$9 sm:$0xff] %v8041_v18  ;;  %v502_v18 = vld [vmem:[%s7421_s23 + $0xd0] sm:$0xf] }
  0xd2   : > { %1781 = vmatmul.bf16.gmra.mxu0 %v1448_v10  ;;  %1849 = vmatmul.bf16.gmra.mxu1 %v1449_v40  ;;  %10971 = vst [vmem:[#allocation22_spill] sm:$0xff] %v8069_v26  ;;  %v1175_v40 = vsel %vm1023_vm10, %v7894_v43, %v8002_v0  ;;  %v8102_v10 = vpack.c.b16 %v607_v55, %v607_v55  ;;  %v501_v43 = vld [vmem:[%s7421_s23 + $0xc8] sm:$0xff]  ;;  %v751_v0 = vshrl.u32 %v8076_v16, 16  ;;  %v10977_v55 = vrot.slane %v7914_v61, 1 }
  0xd3   : > { %1457 = vst [vmem:[#allocation1 + $0x3] ss:$9 sm:$0xff] %v8049_v36  ;;  %1917 = vmatmul.bf16.gmra.mxu2 %v1450_v49  ;;  %v734_v49 = vor.u32 %v732_v48, %v7963_v14  ;;  %v1176_v14 = vsel %vm10973_vm15, %v1175_v40, %v8019_v38  ;;  %v1184_v48 = vsel %vm10975_vm14, %v8019_v38, %v1183_v34  ;;  %vm10985_vm14 = vsmask.f32 7424 }
  0xd4   : > { %1458 = vst [vmem:[#allocation1 + $0x4] ss:$9 sm:$0xff] %v8058_v5  ;;  %v8111_v59 = vrot.slane %v1176_v14, 4  ;;  %v1188_v40 = vsel %vm1043_vm1, %v8019_v38, %v1187_v9  ;;  %v758_v34 = vshll.u32 %v8102_v10, 16  ;;  %v8126_v35 = vrot.slane %v1184_v48, 6 }
  0xd5   : > { %1460 = vst [vmem:[#allocation1 + $0x5] ss:$9 sm:$0xff] %v8060_v60  ;;  %v977_v23 = vrot.slane %v734_v49, 7  ;;  %v1199_v49 = vsel %vm1005_vm3, %v7992_v63, %v8095_v46  ;;  %v1203_v38 = vsel %vm1011_vm4, %v7992_v63, %v8095_v46  ;;  %v536_v5 = vpack.c.bf16 %v500_v7, %v500_v7 }
  0xd6   : > { %1462 = vst [vmem:[#allocation1 + $0x6] ss:$9 sm:$0xff] %v8065_v28  ;;  %v8120_v28 = vrot.slane %v1180_v11, 5  ;;  %v537_v36 = vpack.c.bf16 %v501_v43, %v501_v43  ;;  %v1200_v48 = vsel %vm1007_vm6, %v1199_v49, %v8109_v42  ;;  %v1204_v1 = vsel %vm1013_vm7, %v1203_v38, %v8109_v42 }
  0xd7   : > { %1464 = vst [vmem:[#allocation1 + $0x7] ss:$9 sm:$0xff] %v8069_v26  ;;  %v978_v26 = vrot.slane %v10977_v55, 6  ;;  %v8131_v55 = vrot.slane %v1188_v40, 7  ;;  %v1192_v11 = vsel %vm999_vm2, %v7914_v61, %v977_v23  ;;  %v756_v40 = vor.u32 %v755_v45, %v751_v0 }
  0xd8   : > { %10976 = vst [vmem:[#allocation23_spill] sm:$0xff] %v8111_v59  ;;  %v8145_v15 = vrot.slane %v758_v34, 1  ;;  %v747_v7 = vshrl.u32 %v8014_v22, 16  ;;  %v8154_v23 = vsel %vm1002_vm5, %v1196_v3, %v8109_v42  ;;  %v8156_v43 = vrot.slane %v1200_v48, 1 }
  0xd9   : > { %10978 = vst [vmem:[#allocation24_spill] sm:$0xff] %v8120_v28  ;;  %v8148_v61 = vsel %vm1002_vm5, %v1192_v11, %v978_v26  ;;  %v538_v0 = vpack.c.bf16 %v502_v18, %v502_v18  ;;  %v608_v49 = vunpack.c.l.b16 %v536_v5  ;;  %v609_v45 = vunpack.c.l.b16 %v537_v36 }
  0xda   : > { %10979 = vst [vmem:[#allocation25_spill] sm:$0xff] %v8126_v35  ;;  %v8159_v34 = vrot.slane %v1204_v1, 2  ;;  %v847_v26 = vrot.slane %v8076_v16, 1  ;;  %v10854_v38 = vrot.slane %v8102_v10, 1  ;;  %v761_v11 = vsel %vm10985_vm14, %v756_v40, %v8145_v15  ;;  %vm10988_vm14 = vmmov %vm10961_vm0 }
  0xdb   : > { %10980 = vst [vmem:[#allocation26_spill] sm:$0xff] %v8131_v55  ;;  %v749_v36 = vor.u32 %v747_v7, %v8063_v58  ;;  %v610_v1 = vunpack.c.l.b16 %v538_v0  ;;  %v8175_v18 = vpack.c.b16 %v609_v45, %v608_v49  ;;  %v1215_v5 = vsel %vm1029_vm12, %v7992_v63, %v8095_v46 }
  0xdc   : > { %10981 = vst [vmem:[#allocation27_spill] sm:$0xff] %v8148_v61  ;;  %v8184_v58 = vrot.slane %v761_v11, 7  ;;  %vm10986_vm15 = vcmask 1046534   ;;  %v1223_v7 = vsel %vm10988_vm14, %v8095_v46, %v7992_v63  ;;  %v1216_v49 = vsel %vm1031_vm13, %v1215_v5, %v8109_v42 }
  0xdd   : > { %10982 = vst [vmem:[#allocation28_spill] sm:$0xff] %v8154_v23  ;;  %v1219_v48 = vsel %vm10986_vm15, %v7992_v63, %v8095_v46  ;;  %v981_v0 = vrot.slane %v749_v36, 7  ;;  %v8198_v45 = vpack.c.b16 %v610_v1, %v610_v1  ;;  %v503_v36 = vld [vmem:[%s7421_s23 + $0xd8] sm:$0xff]  ;;  %v10992_v1 = vrot.slane %v8014_v22, 1 }
  0xde   : > { %v1465_v14 = vld [vmem:[#allocation1] sm:$0xff]  ;;  %v1466_v9 = vld [vmem:[#allocation1 + $0x9] sm:$0xff]  ;;  %v1467_v60 = vld [vmem:[#allocation1 + $0x12] sm:$0xff]  ;;  %10983 = vst [vmem:[#allocation29_spill] sm:$0xff] %v8156_v43  ;;  %vm10999_vm15 = vsmask.f32 7424 }
  0xdf   : > { %1469 = vst [vmem:[#allocation1] ss:$9 sm:$0xff] %v8111_v59  ;;  %v982_v5 = vrot.slane %v10992_v1, 6  ;;  %vm11001_vm14 = vcmask 1045508  }
  0xe0   : > { %1471 = vst [vmem:[#allocation1 + $0x1] ss:$9 sm:$0xff] %v8120_v28 }
  0xe1   : > { %1473 = vst [vmem:[#allocation1 + $0x2] ss:$9 sm:$0xff] %v8126_v35  ;;  %v762_v35 = vshrl.u32 %v8102_v10, 16 }
  0xe2   : > { %1475 = vst [vmem:[#allocation1 + $0x3] ss:$9 sm:$0xff] %v8131_v55  ;;  %1786 = vmatmul.bf16.gmra.mxu0 %v1465_v14  ;;  %1854 = vmatmul.bf16.gmra.mxu1 %v1466_v9  ;;  %v1207_v14 = vsel %vm1017_vm8, %v7992_v63, %v8095_v46  ;;  %v849_v9 = vsel %vm10961_vm0, %v847_v26, %v10854_v38  ;;  %vm10990_vm0 = vcmask 1045504  }
  0xe3   : > { %10984 = vst [vmem:[#allocation30_spill] sm:$0xff] %v8159_v34  ;;  %1922 = vmatmul.bf16.gmra.mxu2 %v1467_v60  ;;  %v1211_v60 = vsel %vm1023_vm10, %v7992_v63, %v8095_v46  ;;  %v1208_v3 = vsel %vm1019_vm9, %v1207_v14, %v8109_v42  ;;  %v8200_v26 = vrot.slane %v849_v9, 6  ;;  %v1220_v14 = vsel %vm10990_vm0, %v8109_v42, %v1219_v48 }
  0xe4   : > { %1476 = vst [vmem:[#allocation1 + $0x4] ss:$9 sm:$0xff] %v8148_v61  ;;  %v1212_v40 = vsel %vm10987_vm11, %v1211_v60, %v8109_v42  ;;  %v8202_v11 = vrot.slane %v1208_v3, 3  ;;  %v768_v60 = vshll.u32 %v8175_v18, 16  ;;  %v1224_v63 = vsel %vm1043_vm1, %v8109_v42, %v1223_v7  ;;  %v504_v42 = vld [vmem:[%s7421_s23 + $0xe0] sm:$0xff] }
  0xe5   : > { %1477 = vst [vmem:[#allocation1 + $0x5] ss:$9 sm:$0xff] %v8154_v23  ;;  %v8207_v38 = vrot.slane %v1212_v40, 4  ;;  %v1235_v46 = vsel %vm1005_vm3, %v8076_v16, %v8184_v58  ;;  %v8217_v9 = vrot.slane %v1216_v49, 5  ;;  %v8219_v3 = vrot.slane %v1220_v14, 6 }
  0xe6   : > { %1479 = vst [vmem:[#allocation1 + $0x6] ss:$9 sm:$0xff] %v8156_v43  ;;  %v1228_v48 = vsel %vm999_vm2, %v8014_v22, %v981_v0  ;;  %v8224_v7 = vrot.slane %v1224_v63, 7  ;;  %v1232_v23 = vsel %vm999_vm2, %v8076_v16, %v8184_v58  ;;  %v1236_v49 = vsel %vm1007_vm6, %v1235_v46, %v8200_v26  ;;  %v505_v61 = vld [vmem:[%s7421_s23 + $0xe8] sm:$0xf] }
  0xe7   : > { %1481 = vst [vmem:[#allocation1 + $0x7] ss:$9 sm:$0xff] %v8159_v34  ;;  %v766_v14 = vshrl.u32 %v8175_v18, 16  ;;  %v770_v1 = vrot.slane %v768_v60, 1  ;;  %v773_v22 = vshll.u32 %v8198_v45, 16  ;;  %v539_v0 = vpack.c.bf16 %v503_v36, %v503_v36 }
  0xe8   : > { %10989 = vst [vmem:[#allocation31_spill] sm:$0xff] %v8202_v11  ;;  %v8236_v63 = vsel %vm1002_vm5, %v1228_v48, %v982_v5  ;;  %v540_v55 = vpack.c.bf16 %v504_v42, %v504_v42  ;;  %v8243_v46 = vsel %vm1002_vm5, %v1232_v23, %v8200_v26  ;;  %v1239_v5 = vsel %vm1011_vm4, %v8076_v16, %v8184_v58 }
  0xe9   : > { %10991 = vst [vmem:[#allocation32_spill] sm:$0xff] %v8207_v38  ;;  %v771_v60 = vor.u32 %v770_v1, %v766_v14  ;;  %v8249_v36 = vrot.slane %v773_v22, 1  ;;  %v541_v23 = vpack.c.bf16 %v505_v61, %v505_v61  ;;  %v1243_v48 = vsel %vm1017_vm8, %v8076_v16, %v8184_v58 }
  0xea   : > { %10993 = vst [vmem:[#allocation33_spill] sm:$0xff] %v8217_v9  ;;  %v611_v42 = vunpack.c.l.b16 %v539_v0  ;;  %v850_v14 = vrot.slane %v8175_v18, 1  ;;  %v1251_v1 = vsel %vm1029_vm12, %v8076_v16, %v8184_v58  ;;  %vm11000_vm11 = vcmask 1046534  }
  0xeb   : > { %10994 = vst [vmem:[#allocation34_spill] sm:$0xff] %v8219_v3  ;;  %v613_v22 = vunpack.c.l.b16 %v541_v23  ;;  %vm11002_vm0 = vcmask 1046528  }
  0xec   : > { %10995 = vst [vmem:[#allocation35_spill] sm:$0xff] %v8224_v7 }
  0xed   : > { %10996 = vst [vmem:[#allocation36_spill] sm:$0xff] %v8236_v63 }
  0xee   : > { %v1482_v40 = vld [vmem:[#allocation1] sm:$0xff]  ;;  %v1483_v34 = vld [vmem:[#allocation1 + $0x9] sm:$0xff]  ;;  %v1484_v43 = vld [vmem:[#allocation1 + $0x12] sm:$0xff]  ;;  %10997 = vst [vmem:[#allocation37_spill] sm:$0xff] %v8243_v46 }
  0xef   : > { %1486 = vst [vmem:[#allocation1] ss:$9 sm:$0xff] %v8202_v11  ;;  %v8245_v11 = vrot.slane %v1236_v49, 1  ;;  %v1247_v49 = vsel %vm1023_vm10, %v8076_v16, %v8184_v58 }
  0xf0   : > { %1488 = vst [vmem:[#allocation1 + $0x1] ss:$9 sm:$0xff] %v8207_v38  ;;  %v1248_v0 = vsel %vm11001_vm14, %v1247_v49, %v8200_v26  ;;  %vm11015_vm14 = vcmask 1046534  }
  0xf1   : > { %1490 = vst [vmem:[#allocation1 + $0x2] ss:$9 sm:$0xff] %v8217_v9 }
  0xf2   : > { %10998 = vst [vmem:[#allocation38_spill] sm:$0xff] %v8245_v11  ;;  %1791 = vmatmul.bf16.gmra.mxu0 %v1482_v40  ;;  %1859 = vmatmul.bf16.gmra.mxu1 %v1483_v34  ;;  %v612_v40 = vunpack.c.l.b16 %v540_v55  ;;  %v764_v34 = vor.u32 %v762_v35, %v8145_v15  ;;  %v776_v15 = vsel %vm10999_vm15, %v771_v60, %v8249_v36  ;;  %vm11005_vm15 = vmmov %vm11002_vm0 }
  0xf3   : > { %1492 = vst [vmem:[#allocation1 + $0x3] ss:$9 sm:$0xff] %v8219_v3  ;;  %1927 = vmatmul.bf16.gmra.mxu2 %v1484_v43  ;;  %v1240_v43 = vsel %vm1013_vm7, %v1239_v5, %v8200_v26  ;;  %v1244_v35 = vsel %vm1019_vm9, %v1243_v48, %v8200_v26  ;;  %v1255_v55 = vsel %vm11000_vm11, %v8076_v16, %v8184_v58  ;;  %v11004_v48 = vrot.slane %v8198_v45, 1 }
  0xf4   : > { %1494 = vst [vmem:[#allocation1 + $0x4] ss:$9 sm:$0xff] %v8224_v7  ;;  %v1259_v5 = vsel %vm11002_vm0, %v8184_v58, %v8076_v16  ;;  %v8283_v61 = vpack.c.b16 %v612_v40, %v611_v42  ;;  %v1252_v60 = vsel %vm1031_vm13, %v1251_v1, %v8200_v26  ;;  %v987_v23 = vrot.slane %v776_v15, 7 }
  0xf5   : > { %1495 = vst [vmem:[#allocation1 + $0x5] ss:$9 sm:$0xff] %v8236_v63  ;;  %v852_v63 = vsel %vm11005_vm15, %v850_v14, %v11004_v48  ;;  %v8292_v7 = vrot.slane %v1244_v35, 3  ;;  %vm11007_vm11 = vcmask 1045504   ;;  %v8296_v3 = vrot.slane %v1248_v0, 4 }
  0xf6   : > { %1496 = vst [vmem:[#allocation1 + $0x6] ss:$9 sm:$0xff] %v8243_v46  ;;  %v8285_v46 = vrot.slane %v1240_v43, 2  ;;  %v1256_v49 = vsel %vm11007_vm11, %v8200_v26, %v1255_v55  ;;  %v1260_v16 = vsel %vm1043_vm1, %v8200_v26, %v1259_v5  ;;  %v11009_v58 = vrot.slane %v8102_v10, 1 }
  0xf7   : > { %1498 = vst [vmem:[#allocation1 + $0x7] ss:$9 sm:$0xff] %v8245_v11  ;;  %v985_v11 = vrot.slane %v764_v34, 7  ;;  %v8302_v40 = vrot.slane %v1252_v60, 5  ;;  %v8304_v1 = vpack.c.b16 %v613_v22, %v613_v22  ;;  %v988_v15 = vrot.slane %v852_v63, 6  ;;  %v506_v22 = vld [vmem:[%s7421_s23 + $0xf0] sm:$0xff] }
  0xf8   : > { %11003 = vst [vmem:[#allocation39_spill] sm:$0xff] %v8285_v46  ;;  %v986_v42 = vrot.slane %v11009_v58, 6  ;;  %v8306_v35 = vrot.slane %v1256_v49, 6  ;;  %v783_v26 = vshll.u32 %v8283_v61, 16  ;;  %v8312_v0 = vrot.slane %v1260_v16, 7 }
  0xf9   : > { %11006 = vst [vmem:[#allocation40_spill] sm:$0xff] %v8292_v7  ;;  %v1264_v55 = vsel %vm999_vm2, %v8102_v10, %v985_v11  ;;  %v1268_v5 = vsel %vm999_vm2, %v8175_v18, %v987_v23  ;;  %v507_v10 = vld [vmem:[%s7421_s23 + $0xf8] sm:$0xff]  ;;  %v777_v11 = vshrl.u32 %v8198_v45, 16  ;;  %v788_v60 = vshll.u32 %v8304_v1, 16 }
  0xfa   : > { %11008 = vst [vmem:[#allocation41_spill] sm:$0xff] %v8296_v3  ;;  %v8319_v63 = vsel %vm1002_vm5, %v1264_v55, %v986_v42  ;;  %v8327_v48 = vsel %vm1002_vm5, %v1268_v5, %v988_v15  ;;  %v781_v49 = vshrl.u32 %v8283_v61, 16  ;;  %v785_v16 = vrot.slane %v783_v26, 1  ;;  %v508_v26 = vld [vmem:[%s7421_s23 + $0x100] sm:$0xf] }
  0xfb   : > { %11010 = vst [vmem:[#allocation42_spill] sm:$0xff] %v8302_v40  ;;  %v1271_v58 = vsel %vm1005_vm3, %v8175_v18, %v987_v23  ;;  %v1275_v42 = vsel %vm1011_vm4, %v8175_v18, %v987_v23  ;;  %v1279_v55 = vsel %vm1017_vm8, %v8175_v18, %v987_v23  ;;  %v542_v5 = vpack.c.bf16 %v506_v22, %v506_v22 }
  0xfc   : > { %11011 = vst [vmem:[#allocation43_spill] sm:$0xff] %v8306_v35  ;;  %v1291_v22 = vsel %vm11015_vm14, %v8175_v18, %v987_v23  ;;  %vm11016_vm0 = vcmask 1045508   ;;  %vm11018_vm11 = vsmask.f32 7424  ;;  %vm11020_vm14 = vcmask 1045504  }
  0xfd   : > { %11012 = vst [vmem:[#allocation44_spill] sm:$0xff] %v8312_v0 }
  0xfe   : > { %v1499_v34 = vld [vmem:[#allocation1] sm:$0xff]  ;;  %v1500_v14 = vld [vmem:[#allocation1 + $0x9] sm:$0xff]  ;;  %v1501_v43 = vld [vmem:[#allocation1 + $0x12] sm:$0xff]  ;;  %11013 = vst [vmem:[#allocation45_spill] sm:$0xff] %v8319_v63 }
  0xff   : > { %1503 = vst [vmem:[#allocation1] ss:$9 sm:$0xff] %v8285_v46 }
 0x100   : > { %1505 = vst [vmem:[#allocation1 + $0x1] ss:$9 sm:$0xff] %v8292_v7  ;;  %v1272_v7 = vsel %vm1007_vm6, %v1271_v58, %v988_v15 }
 0x101   : > { %1507 = vst [vmem:[#allocation1 + $0x2] ss:$9 sm:$0xff] %v8296_v3  ;;  %v8342_v3 = vrot.slane %v788_v60, 1  ;;  %v8353_v60 = vrot.slane %v1272_v7, 1  ;;  %v1292_v7 = vsel %vm11020_vm14, %v988_v15, %v1291_v22 }
 0x102   : > { %1509 = vst [vmem:[#allocation1 + $0x3] ss:$9 sm:$0xff] %v8302_v40  ;;  %1796 = vmatmul.bf16.gmra.mxu0 %v1499_v34  ;;  %1864 = vmatmul.bf16.gmra.mxu1 %v1500_v14  ;;  %v779_v40 = vor.u32 %v777_v11, %v8249_v36  ;;  %v1283_v34 = vsel %vm1023_vm10, %v8175_v18, %v987_v23  ;;  %v614_v36 = vunpack.c.l.b16 %v542_v5  ;;  %v8381_v22 = vrot.slane %v1292_v7, 6 }
 0x103   : > { %11014 = vst [vmem:[#allocation46_spill] sm:$0xff] %v8327_v48  ;;  %1932 = vmatmul.bf16.gmra.mxu2 %v1501_v43  ;;  %v786_v14 = vor.u32 %v785_v16, %v781_v49  ;;  %v1287_v43 = vsel %vm1029_vm12, %v8175_v18, %v987_v23  ;;  %v1284_v58 = vsel %vm11016_vm0, %v1283_v34, %v988_v15  ;;  %v853_v16 = vrot.slane %v8283_v61, 1  ;;  %vm11026_vm0 = vmmov %vm11005_vm15 }
 0x104   : > { %1511 = vst [vmem:[#allocation1 + $0x4] ss:$9 sm:$0xff] %v8306_v35  ;;  %v543_v35 = vpack.c.bf16 %v507_v10, %v507_v10  ;;  %v544_v10 = vpack.c.bf16 %v508_v26, %v508_v26  ;;  %v1295_v49 = vsel %vm11005_vm15, %v987_v23, %v8175_v18  ;;  %v6812_v18 = vld [vmem:[%s10811_s1 + $0x60] sm:$0xff]  ;;  %v8371_v23 = vrot.slane %v1284_v58, 4  ;;  %vm11033_vm14 = vmmov %vm11026_vm0 }
 0x105   : > { %1513 = vst [vmem:[#allocation1 + $0x5] ss:$9 sm:$0xff] %v8312_v0  ;;  %v1276_v0 = vsel %vm1013_vm7, %v1275_v42, %v988_v15  ;;  %v989_v42 = vrot.slane %v779_v40, 7  ;;  %v791_v46 = vsel %vm11018_vm11, %v786_v14, %v8342_v3  ;;  %v1296_v40 = vsel %vm1043_vm1, %v988_v15, %v1295_v49  ;;  %2393 = vmatpush.bf16.msrb.mxu0 %v6812_v18 }
 0x106   : > { %1514 = vst [vmem:[#allocation1 + $0x6] ss:$9 sm:$0xff] %v8319_v63  ;;  %v1280_v63 = vsel %vm1019_vm9, %v1279_v55, %v988_v15  ;;  %v615_v11 = vunpack.c.l.b16 %v543_v35  ;;  %v8359_v55 = vrot.slane %v1276_v0, 2  ;;  %v11022_v14 = vrot.slane %v8198_v45, 1 }
 0x107   : > { %1515 = vst [vmem:[#allocation1 + $0x7] ss:$9 sm:$0xff] %v8327_v48  ;;  %v1288_v48 = vsel %vm1031_vm13, %v1287_v43, %v988_v15  ;;  %v8365_v35 = vrot.slane %v1280_v63, 3  ;;  %v616_v43 = vunpack.c.l.b16 %v544_v10  ;;  %v1300_v58 = vsel %vm999_vm2, %v8198_v45, %v989_v42 }
 0x108   : > { %11017 = vst [vmem:[#allocation47_spill] sm:$0xff] %v8359_v55  ;;  %v8374_v9 = vpack.c.b16 %v615_v11, %v614_v36  ;;  %v990_v63 = vrot.slane %v11022_v14, 6  ;;  %v8378_v5 = vrot.slane %v1288_v48, 5  ;;  %v11025_v15 = vrot.slane %v8304_v1, 1 }
 0x109   : > { %11019 = vst [vmem:[#allocation48_spill] sm:$0xff] %v8365_v35  ;;  %v991_v36 = vrot.slane %v791_v46, 7  ;;  %v8389_v11 = vrot.slane %v1296_v40, 7  ;;  %v8393_v48 = vpack.c.b16 %v616_v43, %v616_v43  ;;  %vm11030_vm15 = vcmask 1046534  }
 0x10a   : > { %11021 = vst [vmem:[#allocation49_spill] sm:$0xff] %v8371_v23  ;;  %v855_v10 = vsel %vm11026_vm0, %v853_v16, %v11025_v15  ;;  %v798_v49 = vshll.u32 %v8374_v9, 16  ;;  %v8397_v7 = vsel %vm1002_vm5, %v1300_v58, %v990_v63  ;;  %v796_v18 = vshrl.u32 %v8374_v9, 16 }
 0x10b   : > { %11023 = vst [vmem:[#allocation50_spill] sm:$0xff] %v8378_v5  ;;  %v992_v45 = vrot.slane %v855_v10, 6  ;;  %v1304_v46 = vsel %vm999_vm2, %v8283_v61, %v991_v36  ;;  %v1307_v16 = vsel %vm1005_vm3, %v8283_v61, %v991_v36  ;;  %v1311_v42 = vsel %vm1011_vm4, %v8283_v61, %v991_v36 }
 0x10c   : > { %11024 = vst [vmem:[#allocation51_spill] sm:$0xff] %v8381_v22  ;;  %v800_v40 = vrot.slane %v798_v49, 1  ;;  %v803_v43 = vshll.u32 %v8393_v48, 16  ;;  %v1315_v14 = vsel %vm1017_vm8, %v8283_v61, %v991_v36  ;;  %v1319_v58 = vsel %vm1023_vm10, %v8283_v61, %v991_v36 }
 0x10d   : > { %11027 = vst [vmem:[#allocation52_spill] sm:$0xff] %v8389_v11  ;;  %v1308_v63 = vsel %vm1007_vm6, %v1307_v16, %v992_v45  ;;  %v8417_v15 = vsel %vm1002_vm5, %v1304_v46, %v992_v45  ;;  %v1312_v10 = vsel %vm1013_vm7, %v1311_v42, %v992_v45  ;;  %v1323_v49 = vsel %vm1029_vm12, %v8283_v61, %v991_v36 }
 0x10e   : > { %v1516_v0 = vld [vmem:[#allocation1] sm:$0xff]  ;;  %v1517_v26 = vld [vmem:[#allocation1 + $0x9] sm:$0xff]  ;;  %v1518_v34 = vld [vmem:[#allocation1 + $0x12] sm:$0xff]  ;;  %11028 = vst [vmem:[#allocation53_spill] sm:$0xff] %v8397_v7  ;;  %v8427_v16 = vrot.slane %v1308_v63, 1  ;;  %vm11032_vm11 = vcmask 1045508   ;;  %v1331_v46 = vsel %vm11033_vm14, %v991_v36, %v8283_v61 }
 0x10f   : > { %1520 = vst [vmem:[#allocation1] ss:$9 sm:$0xff] %v8353_v60  ;;  %v792_v42 = vshrl.u32 %v8304_v1, 16  ;;  %vm11036_vm0 = vcmask 1045504   ;;  %v856_v63 = vrot.slane %v8374_v9, 1 }
 0x110   : > { %1522 = vst [vmem:[#allocation1 + $0x1] ss:$9 sm:$0xff] %v8359_v55 }
 0x111   : > { %1524 = vst [vmem:[#allocation1 + $0x2] ss:$9 sm:$0xff] %v8365_v35 }
 0x112   : > { %1526 = vst [vmem:[#allocation1 + $0x3] ss:$9 sm:$0xff] %v8371_v23  ;;  %1801 = vmatmul.bf16.gmra.mxu0 %v1516_v0  ;;  %1869 = vmatmul.bf16.gmra.mxu1 %v1517_v26  ;;  %v1316_v0 = vsel %vm1019_vm9, %v1315_v14, %v992_v45  ;;  %v1327_v26 = vsel %vm11030_vm15, %v8283_v61, %v991_v36  ;;  %vm11038_vm15 = vsmask.f32 7424 }
 0x113   : > { %1528 = vst [vmem:[#allocation1 + $0x4] ss:$9 sm:$0xff] %v8378_v5  ;;  %1937 = vmatmul.bf16.gmra.mxu2 %v1518_v34  ;;  %v8425_v34 = vrot.slane %v803_v43, 1  ;;  %v1324_v5 = vsel %vm1031_vm13, %v1323_v49, %v992_v45  ;;  %v8436_v14 = vrot.slane %v1316_v0, 3  ;;  %v1328_v23 = vsel %vm11036_vm0, %v992_v45, %v1327_v26 }
 0x114   : > { %1530 = vst [vmem:[#allocation1 + $0x5] ss:$9 sm:$0xff] %v8381_v22  ;;  %v8433_v22 = vrot.slane %v1312_v10, 2  ;;  %v1332_v61 = vsel %vm1043_vm1, %v992_v45, %v1331_v46  ;;  %v6811_v10 = vld [vmem:[%s10811_s1 + $0x58] sm:$0xff]  ;;  %v8450_v49 = vrot.slane %v1324_v5, 5  ;;  %v794_v0 = vor.u32 %v792_v42, %v8342_v3 }
 0x115   : > { %1532 = vst [vmem:[#allocation1 + $0x6] ss:$9 sm:$0xff] %v8389_v11  ;;  %v1320_v11 = vsel %vm11032_vm11, %v1319_v58, %v992_v45  ;;  %v10909_v58 = vrot.slane %v8393_v48, 1  ;;  %v8454_v26 = vrot.slane %v1328_v23, 6  ;;  %2394 = vmatpush.bf16.msrb.mxu0 %v6811_v10  ;;  %vm11042_vm11 = vmmov %vm11033_vm14  ;;  %v11043_v46 = vrot.slane %v8304_v1, 1 }
 0x116   : > { %1533 = vst [vmem:[#allocation1 + $0x7] ss:$9 sm:$0xff] %v8397_v7  ;;  %v801_v7 = vor.u32 %v800_v40, %v796_v18  ;;  %v8441_v35 = vrot.slane %v1320_v11, 4  ;;  %v8457_v11 = vrot.slane %v1332_v61, 7  ;;  %v993_v5 = vrot.slane %v794_v0, 7 }
 0x117   : > { %11029 = vst [vmem:[#allocation54_spill] sm:$0xff] %v8417_v15  ;;  %v994_v42 = vrot.slane %v11043_v46, 6  ;;  %vm11048_vm14 = vcmask 1046534   ;;  %vm11050_vm0 = vcmask 1045508  }
 0x118   : > { %11031 = vst [vmem:[#allocation55_spill] sm:$0xff] %v8427_v16  ;;  %v806_v36 = vsel %vm11038_vm15, %v801_v7, %v8425_v34  ;;  %v858_v7 = vsel %vm11042_vm11, %v856_v63, %v10909_v58  ;;  %v1336_v61 = vsel %vm999_vm2, %v8304_v1, %v993_v5  ;;  %v807_v58 = vshrl.u32 %v8393_v48, 16 }
 0x119   : > { %11034 = vst [vmem:[#allocation56_spill] sm:$0xff] %v8433_v22  ;;  %v995_v45 = vrot.slane %v806_v36, 7  ;;  %v996_v3 = vrot.slane %v858_v7, 6  ;;  %v8490_v1 = vsel %vm1002_vm5, %v1336_v61, %v994_v42  ;;  %vm11053_vm15 = vcmask 1045504  }
 0x11a   : > { %11035 = vst [vmem:[#allocation57_spill] sm:$0xff] %v8436_v14 }
 0x11b   : > { %11037 = vst [vmem:[#allocation58_spill] sm:$0xff] %v8441_v35  ;;  %v1343_v23 = vsel %vm1005_vm3, %v8374_v9, %v995_v45  ;;  %v1347_v63 = vsel %vm1011_vm4, %v8374_v9, %v995_v45  ;;  %v1351_v36 = vsel %vm1017_vm8, %v8374_v9, %v995_v45  ;;  %v1340_v10 = vsel %vm999_vm2, %v8374_v9, %v995_v45 }
 0x11c   : > { %11039 = vst [vmem:[#allocation59_spill] sm:$0xff] %v8450_v49  ;;  %v8480_v0 = vsel %vm1007_vm6, %v1343_v23, %v996_v3  ;;  %v1355_v7 = vsel %vm1023_vm10, %v8374_v9, %v995_v45  ;;  %v8485_v46 = vsel %vm1013_vm7, %v1347_v63, %v996_v3  ;;  %v8498_v5 = vsel %vm1002_vm5, %v1340_v10, %v996_v3 }
 0x11d   : > { %v1534_v18 = vld [vmem:[#allocation1] sm:$0xff]  ;;  %v1535_v40 = vld [vmem:[#allocation1 + $0x9] sm:$0xff]  ;;  %v1536_v43 = vld [vmem:[#allocation1 + $0x12] sm:$0xff]  ;;  %11040 = vst [vmem:[#allocation60_spill] sm:$0xff] %v8454_v26  ;;  %v8502_v63 = vsel %vm11050_vm0, %v1355_v7, %v996_v3  ;;  %v10918_v61 = vrot.slane %v8485_v46, 2 }
 0x11e   : > { %1537 = vst [vmem:[#allocation1] ss:$9 sm:$0xff] %v8417_v15  ;;  %v10919_v7 = vrot.slane %v8502_v63, 4  ;;  %vm11067_vm0 = vmmov %vm11042_vm11 }
 0x11f   : > { %1539 = vst [vmem:[#allocation1 + $0x1] ss:$9 sm:$0xff] %v8427_v16 }
 0x120   : > { %1541 = vst [vmem:[#allocation1 + $0x2] ss:$9 sm:$0xff] %v8433_v22 }
 0x121   : > { %11041 = vst [vmem:[#allocation61_spill] sm:$0xff] %v8457_v11 }
 0x122   : > { %1543 = vst [vmem:[#allocation1 + $0x3] ss:$9 sm:$0xff] %v8436_v14  ;;  %1806 = vmatmul.bf16.gmra.mxu0 %v1534_v18  ;;  %1874 = vmatmul.bf16.gmra.mxu1 %v1535_v40  ;;  %v1359_v18 = vsel %vm1029_vm12, %v8374_v9, %v995_v45  ;;  %v8493_v40 = vsel %vm1019_vm9, %v1351_v36, %v996_v3 }
 0x123   : > { %1545 = vst [vmem:[#allocation1 + $0x4] ss:$9 sm:$0xff] %v8441_v35  ;;  %1942 = vmatmul.bf16.gmra.mxu2 %v1536_v43  ;;  %v1363_v43 = vsel %vm11048_vm14, %v8374_v9, %v995_v45  ;;  %v8509_v36 = vsel %vm1031_vm13, %v1359_v18, %v996_v3  ;;  %v10921_v10 = vrot.slane %v8493_v40, 3  ;;  %v11055_v35 = vrot.slane %v8480_v0, 1 }
 0x124   : > { %1547 = vst [vmem:[#allocation1 + $0x5] ss:$9 sm:$0xff] %v8450_v49  ;;  %v8513_v49 = vsel %vm11053_vm15, %v996_v3, %v1363_v43  ;;  %v10920_v23 = vrot.slane %v8509_v36, 5  ;;  %v809_v18 = vor.u32 %v807_v58, %v8425_v34  ;;  %v1367_v43 = vsel %vm11042_vm11, %v995_v45, %v8374_v9 }
 0x125   : > { %1549 = vst [vmem:[#allocation1 + $0x6] ss:$9 sm:$0xff] %v8454_v26  ;;  %v8536_v34 = vsel %vm1043_vm1, %v996_v3, %v1367_v43  ;;  %v11057_v58 = vrot.slane %v8393_v48, 1  ;;  %v1835_v3 = vpop.f32.mrf.mxu1  ;;  %vm11066_vm14 = vsmask.f32 7424  ;;  %vm11068_vm15 = vcmask 1045508  }
 0x126   : > { %1551 = vst [vmem:[#allocation1 + $0x7] ss:$9 sm:$0xff] %v8457_v11  ;;  %v10922_v45 = vrot.slane %v8536_v34, 7  ;;  %vm11069_vm11 = vcmask 1046534  }
 0x127   : > { %11044 = vst [vmem:[#allocation62_spill] sm:$0xff] %v8480_v0 }
 0x128   : > { %11045 = vst [vmem:[#allocation63_spill] sm:$0xff] %v8485_v46 }
 0x129   : > { %11046 = vst [vmem:[#allocation64_spill] sm:$0xff] %v8490_v1 }
 0x12a   : > { %11047 = vst [vmem:[#allocation65_spill] sm:$0xff] %v8493_v40 }
 0x12b   : > { %11049 = vst [vmem:[#allocation66_spill] sm:$0xff] %v8498_v5 }
 0x12c   : > { %11051 = vst [vmem:[#allocation67_spill] sm:$0xff] %v8502_v63 }
 0x12d   : > { %v1552_v11 = vld [vmem:[#allocation1] sm:$0xff]  ;;  %v1553_v26 = vld [vmem:[#allocation1 + $0x9] sm:$0xff]  ;;  %v8505_v42 = vld [vmem:[#allocation1 + $0x12] sm:$0xff]  ;;  %11052 = vst [vmem:[#allocation68_spill] sm:$0xff] %v8509_v36 }
 0x12e   : > { %1879 = vmatmul.bf16.vlgmr.msra.gmra.mxu3 %v1553_v26  ;;  %11054 = vst [vmem:[#allocation69_spill] sm:$0xff] %v8513_v49  ;;  %v10923_v26 = vrot.slane %v8513_v49, 6 }
 0x12f   : > { %1555 = vst [vmem:[#allocation1] ss:$9 sm:$0xff] %v8490_v1 }
 0x130   : > { %1556 = vst [vmem:[#allocation1 + $0x1] ss:$9 sm:$0xff] %v8498_v5 }
 0x131   : > { %1558 = vst [vmem:[#allocation1 + $0x2] ss:$9 sm:$0xff] %v11055_v35  ;;  %v997_v35 = vrot.slane %v809_v18, 7 }
 0x132   : > { %1560 = vst [vmem:[#allocation1 + $0x3] ss:$9 sm:$0xff] %v10918_v61  ;;  %v998_v61 = vrot.slane %v11057_v58, 6  ;;  %1811 = vmatmul.bf16.gmra.mxu0 %v1552_v11  ;;  %v6810_v11 = vld [vmem:[%s10811_s1 + $0x50] sm:$0xff]  ;;  %v1903_v58 = vpop.f32.mrf.mxu2 }
 0x133   : > { %1562 = vst [vmem:[#allocation1 + $0x4] ss:$9 sm:$0xff] %v10921_v10  ;;  %v1372_v9 = vsel %vm999_vm2, %v8393_v48, %v997_v35  ;;  %v1767_v48 = vpop.f32.mrf.mxu0  ;;  %2395 = vmatpush.bf16.msrb.mxu0 %v6810_v11  ;;  %v6807_v35 = vld [vmem:[%s10811_s1 + $0x38] sm:$0xff]  ;;  %v6806_v11 = vld [vmem:[%s10811_s1 + $0x30] sm:$0xff] }
 0x134   : > { %1564 = vst [vmem:[#allocation1 + $0x5] ss:$9 sm:$0xff] %v10919_v7  ;;  %v8544_v7 = vsel %vm1002_vm5, %v1372_v9, %v998_v61  ;;  %v1836_v61 = vadd.f32 %v1835_v3, %v1767_v48  ;;  %2322 = vmatpush.bf16.msra.mxu3 %v6807_v35  ;;  %v476_v48 = vld [vmem:[%s7421_s23] sm:$0xff]  ;;  %v477_v3 = vld [vmem:[%s7421_s23 + $0x8] sm:$0xff] }
 0x135   : > { %1566 = vst [vmem:[#allocation1 + $0x6] ss:$9 sm:$0xff] %v10920_v23  ;;  %v513_v35 = vpack.c.bf16 %v477_v3, %v477_v3 }
 0x136   : > { %1568 = vst [vmem:[#allocation1 + $0x7] ss:$9 sm:$0xff] %v10923_v26 }
 0x137   : > { %11056 = vst [vmem:[#allocation70_spill] sm:$0xff] %v8536_v34  ;;  %v585_v34 = vunpack.c.l.b16 %v513_v35 }
 0x138   : > { %11058 = vst [vmem:[#allocation71_spill] sm:$0xff] %v8544_v7  ;;  %2323 = vmatpush.bf16.msra.mxu3 %v6806_v11  ;;  %v6804_v11 = vld [vmem:[%s10811_s1 + $0x20] sm:$0xff] }
 0x13a   : > { %v8575_v36 = vpop.f32.mrf.mxu2 }
 0x13b   : > { %v8557_v9 = vpop.f32.mrf.mxu0  ;;  %11062 = vst [vmem:[#allocation75_spill] sm:$0xff] %v8575_v36 }
 0x13c   : > { %11059 = vst [vmem:[#allocation72_spill] sm:$0xff] %v8557_v9 }
 0x13d   : > { %v1569_v23 = vld [vmem:[#allocation1] sm:$0xff]  ;;  %v1570_v18 = vld [vmem:[#allocation1 + $0x9] sm:$0xff]  ;;  %v8546_v10 = vld [vmem:[#allocation1 + $0x12] sm:$0xff] }
 0x13e   : > { %1573 = vst [vmem:[#allocation1] ss:$9 sm:$0xff] %v10922_v45  ;;  %1884 = vmatmul.bf16.gmra.mxu3 %v1570_v18  ;;  %v8559_v18 = vadd.f32 %v1903_v58, %v1836_v61  ;;  %v8561_v45 = vpop.f32.mrf.mxu1  ;;  %v6805_v61 = vld [vmem:[%s10811_s1 + $0x28] sm:$0xff]  ;;  %v478_v58 = vld [vmem:[%s7421_s23 + $0x10] sm:$0xf] }
 0x13f   : > { %1574 = vst [vmem:[#allocation1 + $0x1] ss:$9 sm:$0xff] %v8544_v7  ;;  %v514_v26 = vpack.c.bf16 %v478_v58, %v478_v58  ;;  %2324 = vmatpush.bf16.msra.mxu3 %v6805_v61  ;;  %v6803_v61 = vld [vmem:[%s10811_s1 + $0x18] sm:$0xff] }
 0x140   : > { %11060 = vst [vmem:[#allocation73_spill] sm:$0xff] %v8559_v18 }
 0x141   : > { %11061 = vst [vmem:[#allocation74_spill] sm:$0xff] %v8561_v45 }
 0x142   : > { %1816 = vmatmul.bf16.gmra.mxu0 %v1569_v23  ;;  %v6809_v23 = vld [vmem:[%s10811_s1 + $0x48] sm:$0xff] }
 0x143   : > { %2396 = vmatpush.bf16.msrb.mxu0 %v6809_v23  ;;  %v1772_v63 = vpop.f32.mrf.mxu0  ;;  %v586_v23 = vunpack.c.l.b16 %v514_v26  ;;  %2325 = vmatpush.bf16.msra.mxu3 %v6804_v11  ;;  %v6802_v11 = vld [vmem:[%s10811_s1 + $0x10] sm:$0xff] }
 0x146   : > { %v1576_v43 = vld [vmem:[#allocation1 + $0x9] sm:$0xff]  ;;  %v1575_v49 = vld [vmem:[#allocation1] sm:$0xff]  ;;  %v1840_v40 = vpop.f32.mrf.mxu1 }
 0x147   : > { %v1841_v0 = vadd.f32 %v1840_v40, %v1772_v63  ;;  %2326 = vmatpush.bf16.msra.mxu3 %v6803_v61 }
 0x14b   : > { %2327 = vmatpush.bf16.msra.mxu3 %v6802_v11 }
 0x14e   : > { %1889 = vmatmul.bf16.gmra.mxu3 %v1576_v43  ;;  %v512_v43 = vpack.c.bf16 %v476_v48, %v476_v48  ;;  %v8580_v48 = vpack.c.b16 %v586_v23, %v586_v23 }
 0x150   : > { %v584_v7 = vunpack.c.l.b16 %v512_v43  ;;  %v653_v58 = vshll.u32 %v8580_v48, 16  ;;  %v10933_v63 = vrot.slane %v8580_v48, 1 }
 0x152   : > { %v620_v46 = vpack.c.b16 %v585_v34, %v584_v7  ;;  %1821 = vmatmul.bf16.gmra.mxu0 %v1575_v49  ;;  %v8586_v36 = vrot.slane %v653_v58, 1  ;;  %v1908_v7 = vpop.f32.mrf.mxu2  ;;  %v8589_v49 = vpop.f32.mrf.mxu0 }
 0x153   : > { %11063 = vst [vmem:[#allocation76_spill] sm:$0xff] %v8589_v49  ;;  %v8592_v26 = vadd.f32 %v1908_v7, %v1841_v0  ;;  %v8594_v34 = vpop.f32.mrf.mxu1  ;;  %v8608_v7 = vld [vmem:[#allocation1 + $0x12] sm:$0xff] }
 0x154   : > { %v648_v3 = vshll.u32 %v620_v46, 16  ;;  %v646_v43 = vshrl.u32 %v620_v46, 16  ;;  %v826_v40 = vrot.slane %v620_v46, 1  ;;  %11065 = vst [vmem:[#allocation78_spill] sm:$0xff] %v8594_v34 }
 0x155   : > { %11064 = vst [vmem:[#allocation77_spill] sm:$0xff] %v8592_v26 }
 0x156   : > { %v650_v35 = vrot.slane %v648_v3, 1 }
 0x158   : > { %v651_v5 = vor.u32 %v650_v35, %v646_v43 }
 0x15a   : > { %v656_v23 = vsel %vm11066_vm14, %v651_v5, %v8586_v36  ;;  %v6801_v5 = vld [vmem:[%s10811_s1 + $0x8] sm:$0xff]  ;;  %vm11070_vm14 = vmmov %vm11067_vm0  ;;  %v8622_v1 = vpop.f32.mrf.mxu2 }
 0x15b   : > { %v1962_v3 = vrot.slane %v656_v23, 7  ;;  %2328 = vmatpush.bf16.msra.mxu3 %v6801_v5 }
 0x15d   : > { %v1967_v35 = vsel %vm999_vm2, %v620_v46, %v1962_v3  ;;  %v1970_v0 = vsel %vm1005_vm3, %v620_v46, %v1962_v3  ;;  %v1974_v58 = vsel %vm1011_vm4, %v620_v46, %v1962_v3  ;;  %v1978_v61 = vsel %vm1017_vm8, %v620_v46, %v1962_v3 }
 0x15e   : > { %1947 = vmatmul.bf16.vlgmr.msrb.gmra.mxu3 %v8505_v42  ;;  %v828_v42 = vsel %vm11067_vm0, %v826_v40, %v10933_v63  ;;  %v1982_v45 = vsel %vm1023_vm10, %v620_v46, %v1962_v3  ;;  %v1986_v9 = vsel %vm1029_vm12, %v620_v46, %v1962_v3  ;;  %v1990_v18 = vsel %vm11069_vm11, %v620_v46, %v1962_v3  ;;  %vm11226_vm11 = vmmov %vm11070_vm14 }
 0x15f   : > { %v1963_v43 = vrot.slane %v828_v42, 6  ;;  %vm11071_vm0 = vcmask 1045504  }
 0x161   : > { %v1969_v34 = vsel %vm1002_vm5, %v1967_v35, %v1963_v43  ;;  %v1971_v40 = vsel %vm1007_vm6, %v1970_v0, %v1963_v43  ;;  %v1975_v23 = vsel %vm1013_vm7, %v1974_v58, %v1963_v43  ;;  %v1979_v42 = vsel %vm1019_vm9, %v1978_v61, %v1963_v43  ;;  %v1777_v0 = vpop.f32.mrf.mxu0 }
 0x162   : > { %v1973_v63 = vrot.slane %v1971_v40, 1  ;;  %v1977_v49 = vrot.slane %v1975_v23, 2  ;;  %v1981_v26 = vrot.slane %v1979_v42, 3  ;;  %2002 = vst [vmem:[#allocation1] ss:$9 sm:$0xff] %v1969_v34  ;;  %v1983_v11 = vsel %vm11068_vm15, %v1982_v45, %v1963_v43  ;;  %v1845_v34 = vpop.f32.mrf.mxu1  ;;  %v6800_v45 = vld [vmem:[%s10811_s1] sm:$0xff] }
 0x163   : > { %v1994_v35 = vsel %vm11070_vm14, %v1962_v3, %v620_v46  ;;  %v1985_v58 = vrot.slane %v1983_v11, 4  ;;  %v1987_v61 = vsel %vm1031_vm13, %v1986_v9, %v1963_v43  ;;  %v1991_v40 = vsel %vm11071_vm0, %v1963_v43, %v1990_v18  ;;  %2329 = vmatpush.bf16.msra.mxu3 %v6800_v45  ;;  %v6823_v9 = vld [vmem:[%s10811_s1 + $0xb8] sm:$0xff]  ;;  %v1913_v18 = vpop.f32.mrf.mxu2  ;;  %v6821_v11 = vld [vmem:[%s10811_s1 + $0xa8] sm:$0xff] }
 0x164   : > { %v1995_v23 = vsel %vm1043_vm1, %v1963_v43, %v1994_v35  ;;  %2005 = vst [vmem:[#allocation1 + $0x1] ss:$9 sm:$0xff] %v1973_v63  ;;  %v1989_v42 = vrot.slane %v1987_v61, 5  ;;  %v1993_v14 = vrot.slane %v1991_v40, 6  ;;  %v1846_v46 = vadd.f32 %v1845_v34, %v1777_v0  ;;  %2458 = vmatpush.bf16.msrb.mxu1 %v6823_v9 }
 0x165   : > { %2008 = vst [vmem:[#allocation1 + $0x2] ss:$9 sm:$0xff] %v1977_v49  ;;  %v1997_v3 = vrot.slane %v1995_v23, 7  ;;  %v6822_v49 = vld [vmem:[%s10811_s1 + $0xb0] sm:$0xff]  ;;  %v11072_v40 = vrot.slane %v8580_v48, 1  ;;  %v11073_v34 = vrot.slane %v7649_v30, 1 }
 0x166   : > { %2011 = vst [vmem:[#allocation1 + $0x3] ss:$9 sm:$0xff] %v1981_v26  ;;  %v6808_v26 = vld [vmem:[%s10811_s1 + $0x40] sm:$0xff]  ;;  %v8643_v43 = vadd.f32 %v1913_v18, %v1846_v46  ;;  %v11074_v45 = vrot.slane %v7652_v31, 2  ;;  %v11076_v30 = vrot.slane %v7673_v39, 4  ;;  %v11077_v31 = vrot.slane %v7686_v50, 5 }
 0x167   : > { %2014 = vst [vmem:[#allocation1 + $0x4] ss:$9 sm:$0xff] %v1985_v58  ;;  %2397 = vmatpush.bf16.msrb.mxu0 %v6808_v26  ;;  %v1965_v23 = vrot.slane %v11072_v40, 6  ;;  %v6818_v50 = vld [vmem:[%s10811_s1 + $0x90] sm:$0xff]  ;;  %vm11223_vm15 = vsmask.f32 7424 }
 0x168   : > { %2017 = vst [vmem:[#allocation1 + $0x5] ss:$9 sm:$0xff] %v1989_v42  ;;  %2459 = vmatpush.bf16.msrb.mxu1 %v6822_v49  ;;  %v11078_v49 = vrot.slane %v7689_v51, 6  ;;  %v6863_v51 = vld [vmem:[%s10811_s1 + $0x1f8] sm:$0xff] }
 0x169   : > { %2020 = vst [vmem:[#allocation1 + $0x6] ss:$9 sm:$0xff] %v1993_v14  ;;  %v8634_v63 = vpop.f32.mrf.mxu0  ;;  %v657_v14 = vshrl.u32 %v8580_v48, 16  ;;  %3160 = vmatpush.bf16.msrb.mxu3 %v6863_v51 }
 0x16a   : > { %2023 = vst [vmem:[#allocation1 + $0x7] ss:$9 sm:$0xff] %v1997_v3  ;;  %v8645_v5 = vpop.f32.mrf.mxu1  ;;  %v11075_v3 = vrot.slane %v7655_v32, 3  ;;  %v6819_v32 = vld [vmem:[%s10811_s1 + $0x98] sm:$0xff] }
 0x16b   : > { %v8660_v42 = vpop.f32.mrf.mxu2 }
 0x16c   : > { %2460 = vmatpush.bf16.msrb.mxu1 %v6821_v11  ;;  %v6817_v11 = vld [vmem:[%s10811_s1 + $0x88] sm:$0xff] }
 0x16e   : > { %1952 = vmatmul.bf16.gmra.mxu3 %v8546_v10  ;;  %v659_v10 = vor.u32 %v657_v14, %v8586_v36 }
 0x170   : > { %v1964_v35 = vrot.slane %v659_v10, 7 }
 0x171   : > { %v2024_v0 = vld [vmem:[#allocation1] sm:$0xff]  ;;  %v2025_v58 = vld [vmem:[#allocation1 + $0x9] sm:$0xff]  ;;  %v2026_v61 = vld [vmem:[#allocation1 + $0x12] sm:$0xff]  ;;  %v1782_v46 = vpop.f32.mrf.mxu0 }
 0x172   : > { %2028 = vst [vmem:[#allocation1 + $0x1] ss:$9 sm:$0xff] %v7646_v29  ;;  %2398 = vmatmul.bf16.vlgmr.msrb.gmra.mxu0 %v2025_v58  ;;  %v1999_v36 = vsel %vm999_vm2, %v8580_v48, %v1964_v35  ;;  %v6820_v29 = vld [vmem:[%s10811_s1 + $0xa0] sm:$0xff]  ;;  %v1850_v9 = vpop.f32.mrf.mxu1 }
 0x173   : > { %2029 = vst [vmem:[#allocation1 + $0x2] ss:$9 sm:$0xff] %v11073_v34  ;;  %v1851_v18 = vadd.f32 %v1850_v9, %v1782_v46  ;;  %v2001_v48 = vsel %vm1002_vm5, %v1999_v36, %v1965_v23  ;;  %2461 = vmatpush.bf16.msrb.mxu1 %v6820_v29  ;;  %v1918_v26 = vpop.f32.mrf.mxu2  ;;  %v11079_v23 = vrot.slane %v7692_v52, 7 }
 0x174   : > { %2030 = vst [vmem:[#allocation1 + $0x3] ss:$9 sm:$0xff] %v11074_v45  ;;  %v6816_v45 = vld [vmem:[%s10811_s1 + $0x80] sm:$0xff] }
 0x175   : > { %2031 = vst [vmem:[#allocation1 + $0x4] ss:$9 sm:$0xff] %v11075_v3  ;;  %v8686_v14 = vadd.f32 %v1918_v26, %v1851_v18 }
 0x176   : > { %2032 = vst [vmem:[#allocation1 + $0x5] ss:$9 sm:$0xff] %v11076_v30 }
 0x177   : > { %2033 = vst [vmem:[#allocation1 + $0x6] ss:$9 sm:$0xff] %v11077_v31  ;;  %2462 = vmatpush.bf16.msrb.mxu1 %v6819_v32  ;;  %v6862_v32 = vld [vmem:[%s10811_s1 + $0x1f0] sm:$0xff] }
 0x178   : > { %2034 = vst [vmem:[#allocation1 + $0x7] ss:$9 sm:$0xff] %v11078_v49  ;;  %3161 = vmatpush.bf16.msrb.mxu3 %v6862_v32 }
 0x179   : > { %2027 = vst [vmem:[#allocation1] ss:$9 sm:$0xff] %v2001_v48  ;;  %v8678_v39 = vpop.f32.mrf.mxu0 }
 0x17a   : > { %v8688_v10 = vpop.f32.mrf.mxu1 }
 0x17b   : > { %2463 = vmatpush.bf16.msrb.mxu1 %v6818_v50  ;;  %v8701_v34 = vpop.f32.mrf.mxu2 }
 0x17e   : > { %1957 = vmatmul.bf16.gmra.mxu3 %v8608_v7  ;;  %v6871_v7 = vld [vmem:[%s10811_s1 + $0x238] sm:$0xff] }
 0x17f   : > { %3228 = vmatpush.bf16.msra.mxu0 %v6871_v7  ;;  %2464 = vmatpush.bf16.msrb.mxu1 %v6817_v11 }
 0x180   : > { %v2035_v35 = vld [vmem:[#allocation1] sm:$0xff]  ;;  %v2036_v58 = vld [vmem:[#allocation1 + $0x9] sm:$0xff]  ;;  %v2037_v40 = vld [vmem:[#allocation1 + $0x12] sm:$0xff] }
 0x181   : > { %2038 = vst [vmem:[#allocation1] ss:$9 sm:$0xff] %v11079_v23  ;;  %v1787_v36 = vpop.f32.mrf.mxu0 }
 0x182   : > { %2039 = vst [vmem:[#allocation1 + $0x1] ss:$9 sm:$0xff] %v7756_v20  ;;  %2403 = vmatmul.bf16.gmra.mxu0 %v2036_v58  ;;  %v1855_v46 = vpop.f32.mrf.mxu1 }
 0x183   : > { %2040 = vst [vmem:[#allocation1 + $0x2] ss:$9 sm:$0xff] %v7773_v33  ;;  %v1856_v52 = vadd.f32 %v1855_v46, %v1787_v36  ;;  %2465 = vmatpush.bf16.msrb.mxu1 %v6816_v45  ;;  %v1923_v20 = vpop.f32.mrf.mxu2  ;;  %v6870_v36 = vld [vmem:[%s10811_s1 + $0x230] sm:$0xff] }
 0x184   : > { %2041 = vst [vmem:[#allocation1 + $0x3] ss:$9 sm:$0xff] %v7775_v37  ;;  %3229 = vmatpush.bf16.msra.mxu0 %v6870_v36  ;;  %v11088_v36 = vld [vmem:[#allocation15_spill] sm:$0xff] }
 0x185   : > { %2042 = vst [vmem:[#allocation1 + $0x4] ss:$9 sm:$0xff] %v7779_v56  ;;  %v8712_v3 = vadd.f32 %v1923_v20, %v1856_v52 }
 0x186   : > { %2043 = vst [vmem:[#allocation1 + $0x5] ss:$9 sm:$0xff] %v7783_v62  ;;  %2466 = vmatmul.bf16.vlgmr.msrb.gmra.mxu1 %v2026_v61 }
 0x187   : > { %2044 = vst [vmem:[#allocation1 + $0x6] ss:$9 sm:$0xff] %v7790_v4 }
 0x188   : > { %2045 = vst [vmem:[#allocation1 + $0x7] ss:$9 sm:$0xff] %v7795_v8 }
 0x189   : > { %v8710_v29 = vpop.f32.mrf.mxu0 }
 0x18a   : > { %v8714_v9 = vpop.f32.mrf.mxu1 }
 0x18e   : > { %2330 = vmatmul.bf16.vlgmr.msra.gmra.mxu3 %v2024_v0  ;;  %v8721_v0 = vpop.f32.mrf.mxu2 }
 0x18f   : > { %v2046_v30 = vld [vmem:[#allocation1] sm:$0xff]  ;;  %v2047_v18 = vld [vmem:[#allocation1 + $0x9] sm:$0xff]  ;;  %v2048_v48 = vld [vmem:[#allocation1 + $0x12] sm:$0xff] }
 0x190   : > { %2049 = vst [vmem:[#allocation1] ss:$9 sm:$0xff] %v7799_v54 }
 0x191   : > { %2050 = vst [vmem:[#allocation1 + $0x1] ss:$9 sm:$0xff] %v7841_v47  ;;  %v1792_v61 = vpop.f32.mrf.mxu0 }
 0x192   : > { %2051 = vst [vmem:[#allocation1 + $0x2] ss:$9 sm:$0xff] %v7844_v13  ;;  %2408 = vmatmul.bf16.gmra.mxu0 %v2047_v18  ;;  %v1860_v31 = vpop.f32.mrf.mxu1 }
 0x193   : > { %2052 = vst [vmem:[#allocation1 + $0x3] ss:$9 sm:$0xff] %v7868_v19  ;;  %v1861_v49 = vadd.f32 %v1860_v31, %v1792_v61 }
 0x194   : > { %2053 = vst [vmem:[#allocation1 + $0x4] ss:$9 sm:$0xff] %v7870_v21 }
 0x195   : > { %2054 = vst [vmem:[#allocation1 + $0x5] ss:$9 sm:$0xff] %v7875_v57 }
 0x196   : > { %2055 = vst [vmem:[#allocation1 + $0x6] ss:$9 sm:$0xff] %v7880_v24  ;;  %2471 = vmatmul.bf16.gmra.mxu1 %v2037_v40  ;;  %v1928_v26 = vpop.f32.mrf.mxu2 }
 0x197   : > { %2056 = vst [vmem:[#allocation1 + $0x7] ss:$9 sm:$0xff] %v7886_v2  ;;  %v8731_v51 = vadd.f32 %v1928_v26, %v1861_v49  ;;  %v11087_v26 = vld [vmem:[#allocation14_spill] sm:$0xff] }
 0x199   : > { %v8729_v50 = vpop.f32.mrf.mxu0  ;;  %11081 = vst [vmem:[#allocation80_spill] sm:$0xff] %v8731_v51 }
 0x19a   : > { %11080 = vst [vmem:[#allocation79_spill] sm:$0xff] %v8729_v50  ;;  %v8733_v7 = vpop.f32.mrf.mxu1 }
 0x19b   : > { %11082 = vst [vmem:[#allocation81_spill] sm:$0xff] %v8733_v7 }
 0x19e   : > { %2335 = vmatmul.bf16.gmra.mxu3 %v2035_v35  ;;  %v2057_v11 = vld [vmem:[#allocation1] sm:$0xff]  ;;  %v2058_v58 = vld [vmem:[#allocation1 + $0x9] sm:$0xff]  ;;  %v2059_v23 = vld [vmem:[#allocation1 + $0x12] sm:$0xff]  ;;  %v8744_v35 = vpop.f32.mrf.mxu2 }
 0x19f   : > { %2060 = vst [vmem:[#allocation1] ss:$9 sm:$0xff] %v7896_v27 }
 0x1a0   : > { %2061 = vst [vmem:[#allocation1 + $0x1] ss:$9 sm:$0xff] %v7940_v17 }
 0x1a1   : > { %2062 = vst [vmem:[#allocation1 + $0x2] ss:$9 sm:$0xff] %v7945_v25  ;;  %v1797_v40 = vpop.f32.mrf.mxu0 }
 0x1a2   : > { %2063 = vst [vmem:[#allocation1 + $0x3] ss:$9 sm:$0xff] %v7956_v44  ;;  %2413 = vmatmul.bf16.gmra.mxu0 %v2058_v58  ;;  %v1865_v45 = vpop.f32.mrf.mxu1 }
 0x1a3   : > { %2064 = vst [vmem:[#allocation1 + $0x4] ss:$9 sm:$0xff] %v7967_v6  ;;  %v1866_v46 = vadd.f32 %v1865_v45, %v1797_v40  ;;  %v11089_v40 = vld [vmem:[#allocation16_spill] sm:$0xff]  ;;  %v11090_v45 = vld [vmem:[#allocation17_spill] sm:$0xff] }
 0x1a4   : > { %2065 = vst [vmem:[#allocation1 + $0x5] ss:$9 sm:$0xff] %v7969_v41 }
 0x1a5   : > { %11083 = vst [vmem:[#allocation82_spill] sm:$0xff] %v8744_v35  ;;  %v11095_v35 = vld [vmem:[#allocation21_spill] sm:$0xff] }
 0x1a6   : > { %2066 = vst [vmem:[#allocation1 + $0x6] ss:$9 sm:$0xff] %v7974_v53  ;;  %2476 = vmatmul.bf16.gmra.mxu1 %v2048_v48  ;;  %v1933_v52 = vpop.f32.mrf.mxu2  ;;  %v6861_v48 = vld [vmem:[%s10811_s1 + $0x1e8] sm:$0xff] }
 0x1a7   : > { %2067 = vst [vmem:[#allocation1 + $0x7] ss:$9 sm:$0xff] %v7977_v12  ;;  %v8750_v49 = vadd.f32 %v1933_v52, %v1866_v46  ;;  %3162 = vmatpush.bf16.msrb.mxu3 %v6861_v48  ;;  %v11091_v46 = vld [vmem:[#allocation18_spill] sm:$0xff]  ;;  %v11092_v52 = vld [vmem:[#allocation19_spill] sm:$0xff] }
 0x1a9   : > { %v8748_v20 = vpop.f32.mrf.mxu0  ;;  %11085 = vst [vmem:[#allocation84_spill] sm:$0xff] %v8750_v49 }
 0x1aa   : > { %11084 = vst [vmem:[#allocation83_spill] sm:$0xff] %v8748_v20  ;;  %v8752_v32 = vpop.f32.mrf.mxu1 }
 0x1ab   : > { %11086 = vst [vmem:[#allocation85_spill] sm:$0xff] %v8752_v32  ;;  %v11093_v32 = vld [vmem:[#allocation20_spill] sm:$0xff] }
 0x1ae   : > { %2340 = vmatmul.bf16.gmra.mxu3 %v2046_v30  ;;  %v2068_v18 = vld [vmem:[#allocation1] sm:$0xff]  ;;  %v2069_v61 = vld [vmem:[#allocation1 + $0x9] sm:$0xff]  ;;  %v2070_v31 = vld [vmem:[#allocation1 + $0x12] sm:$0xff]  ;;  %v8769_v20 = vpop.f32.mrf.mxu2 }
 0x1af   : > { %2071 = vst [vmem:[#allocation1] ss:$9 sm:$0xff] %v11087_v26  ;;  %v6855_v30 = vld [vmem:[%s10811_s1 + $0x1b8] sm:$0xff] }
 0x1b0   : > { %2072 = vst [vmem:[#allocation1 + $0x1] ss:$9 sm:$0xff] %v11088_v36  ;;  %3092 = vmatpush.bf16.msrb.mxu2 %v6855_v30  ;;  %v6869_v30 = vld [vmem:[%s10811_s1 + $0x228] sm:$0xff]  ;;  %v11115_v36 = vld [vmem:[#allocation38_spill] sm:$0xff] }
 0x1b1   : > { %v8755_v58 = vpop.f32.mrf.mxu3  ;;  %2073 = vst [vmem:[#allocation1 + $0x2] ss:$9 sm:$0xff] %v11089_v40  ;;  %v1802_v49 = vpop.f32.mrf.mxu0  ;;  %3230 = vmatpush.bf16.msra.mxu0 %v6869_v30  ;;  %v11101_v30 = vld [vmem:[#allocation26_spill] sm:$0xff] }
 0x1b2   : > { %2074 = vst [vmem:[#allocation1 + $0x3] ss:$9 sm:$0xff] %v11090_v45  ;;  %2418 = vmatmul.bf16.gmra.mxu0 %v2069_v61  ;;  %v1870_v7 = vpop.f32.mrf.mxu1  ;;  %v11110_v45 = vld [vmem:[#allocation33_spill] sm:$0xff] }
 0x1b3   : > { %2075 = vst [vmem:[#allocation1 + $0x4] ss:$9 sm:$0xff] %v11091_v46  ;;  %v1871_v50 = vadd.f32 %v1870_v7, %v1802_v49 }
 0x1b4   : > { %2076 = vst [vmem:[#allocation1 + $0x5] ss:$9 sm:$0xff] %v11092_v52 }
 0x1b5   : > { %2077 = vst [vmem:[#allocation1 + $0x6] ss:$9 sm:$0xff] %v11093_v32 }
 0x1b6   : > { %11094 = vst [vmem:[#allocation14_spill] sm:$0xff] %v8769_v20  ;;  %2481 = vmatmul.bf16.gmra.mxu1 %v2059_v23  ;;  %v1938_v32 = vpop.f32.mrf.mxu2  ;;  %v11097_v20 = vld [vmem:[#allocation22_spill] sm:$0xff]  ;;  %v11100_v23 = vld [vmem:[#allocation25_spill] sm:$0xff] }
 0x1b7   : > { %2078 = vst [vmem:[#allocation1 + $0x7] ss:$9 sm:$0xff] %v11095_v35  ;;  %v8780_v35 = vadd.f32 %v1938_v32, %v1871_v50  ;;  %v11103_v50 = vld [vmem:[#allocation28_spill] sm:$0xff]  ;;  %v11104_v32 = vld [vmem:[#allocation29_spill] sm:$0xff] }
 0x1b9   : > { %v8772_v51 = vpop.f32.mrf.mxu3  ;;  %v8777_v46 = vpop.f32.mrf.mxu0  ;;  %11098 = vst [vmem:[#allocation87_spill] sm:$0xff] %v8780_v35 }
 0x1ba   : > { %11096 = vst [vmem:[#allocation86_spill] sm:$0xff] %v8777_v46  ;;  %v8782_v7 = vpop.f32.mrf.mxu1  ;;  %v11102_v46 = vld [vmem:[#allocation27_spill] sm:$0xff] }
 0x1bb   : > { %11099 = vst [vmem:[#allocation88_spill] sm:$0xff] %v8782_v7 }
 0x1be   : > { %2345 = vmatmul.bf16.gmra.mxu3 %v2057_v11  ;;  %v2079_v61 = vld [vmem:[#allocation1] sm:$0xff]  ;;  %v2080_v48 = vld [vmem:[#allocation1 + $0x9] sm:$0xff]  ;;  %v2081_v52 = vld [vmem:[#allocation1 + $0x12] sm:$0xff]  ;;  %v8796_v7 = vpop.f32.mrf.mxu2 }
 0x1bf   : > { %2082 = vst [vmem:[#allocation1] ss:$9 sm:$0xff] %v11097_v20  ;;  %v6854_v11 = vld [vmem:[%s10811_s1 + $0x1b0] sm:$0xff] }
 0x1c0   : > { %2083 = vst [vmem:[#allocation1 + $0x1] ss:$9 sm:$0xff] %v8111_v59  ;;  %3093 = vmatpush.bf16.msrb.mxu2 %v6854_v11 }
 0x1c1   : > { %v8785_v49 = vpop.f32.mrf.mxu3  ;;  %2084 = vst [vmem:[#allocation1 + $0x2] ss:$9 sm:$0xff] %v8120_v28  ;;  %v1807_v35 = vpop.f32.mrf.mxu0 }
 0x1c2   : > { %2085 = vst [vmem:[#allocation1 + $0x3] ss:$9 sm:$0xff] %v11100_v23  ;;  %2423 = vmatmul.bf16.gmra.mxu0 %v2080_v48  ;;  %v1875_v28 = vpop.f32.mrf.mxu1  ;;  %v6860_v23 = vld [vmem:[%s10811_s1 + $0x1e0] sm:$0xff] }
 0x1c3   : > { %2086 = vst [vmem:[#allocation1 + $0x4] ss:$9 sm:$0xff] %v11101_v30  ;;  %v1876_v59 = vadd.f32 %v1875_v28, %v1807_v35  ;;  %3163 = vmatpush.bf16.msrb.mxu3 %v6860_v23  ;;  %v11106_v48 = vld [vmem:[#allocation30_spill] sm:$0xff] }
 0x1c4   : > { %2087 = vst [vmem:[#allocation1 + $0x5] ss:$9 sm:$0xff] %v11102_v46  ;;  %v6868_v23 = vld [vmem:[%s10811_s1 + $0x220] sm:$0xff] }
 0x1c5   : > { %2088 = vst [vmem:[#allocation1 + $0x6] ss:$9 sm:$0xff] %v11103_v50  ;;  %3231 = vmatpush.bf16.msra.mxu0 %v6868_v23 }
 0x1c6   : > { %2089 = vst [vmem:[#allocation1 + $0x7] ss:$9 sm:$0xff] %v11104_v32  ;;  %2486 = vmatmul.bf16.gmra.mxu1 %v2070_v31  ;;  %v1943_v32 = vpop.f32.mrf.mxu2  ;;  %v11111_v31 = vld [vmem:[#allocation34_spill] sm:$0xff] }
 0x1c7   : > { %11105 = vst [vmem:[#allocation89_spill] sm:$0xff] %v8796_v7  ;;  %v11108_v7 = vld [vmem:[#allocation31_spill] sm:$0xff]  ;;  %v8807_v28 = vadd.f32 %v1943_v32, %v1876_v59  ;;  %v11113_v59 = vld [vmem:[#allocation36_spill] sm:$0xff]  ;;  %v11114_v32 = vld [vmem:[#allocation37_spill] sm:$0xff] }
 0x1c9   : > { %v8798_v20 = vpop.f32.mrf.mxu3  ;;  %v8804_v50 = vpop.f32.mrf.mxu0  ;;  %11109 = vst [vmem:[#allocation91_spill] sm:$0xff] %v8807_v28 }
 0x1ca   : > { %11107 = vst [vmem:[#allocation90_spill] sm:$0xff] %v8804_v50  ;;  %v11112_v50 = vld [vmem:[#allocation35_spill] sm:$0xff] }
 0x1cd   : > { %v2090_v11 = vld [vmem:[#allocation1] sm:$0xff]  ;;  %v2091_v30 = vld [vmem:[#allocation1 + $0x9] sm:$0xff]  ;;  %v2092_v46 = vld [vmem:[#allocation1 + $0x12] sm:$0xff] }
 0x1ce   : > { %2350 = vmatmul.bf16.gmra.mxu3 %v2068_v18  ;;  %2093 = vst [vmem:[#allocation1] ss:$9 sm:$0xff] %v11106_v48  ;;  %v6853_v18 = vld [vmem:[%s10811_s1 + $0x1a8] sm:$0xff] }
 0x1cf   : > { %2094 = vst [vmem:[#allocation1 + $0x1] ss:$9 sm:$0xff] %v11108_v7  ;;  %3094 = vmatpush.bf16.msrb.mxu2 %v6853_v18  ;;  %v11117_v18 = vld [vmem:[#allocation40_spill] sm:$0xff] }
 0x1d0   : > { %2095 = vst [vmem:[#allocation1 + $0x2] ss:$9 sm:$0xff] %v8207_v38 }
 0x1d1   : > { %v1890_v35 = vpop.f32.mrf.mxu3  ;;  %2096 = vst [vmem:[#allocation1 + $0x3] ss:$9 sm:$0xff] %v11110_v45  ;;  %v1812_v28 = vpop.f32.mrf.mxu0 }
 0x1d2   : > { %2097 = vst [vmem:[#allocation1 + $0x4] ss:$9 sm:$0xff] %v11111_v31  ;;  %2428 = vmatmul.bf16.gmra.mxu0 %v2091_v30  ;;  %v1881_v45 = vadd.f32 %v8755_v58, %v1812_v28  ;;  %v11116_v31 = vld [vmem:[#allocation39_spill] sm:$0xff]  ;;  %v11123_v28 = vld [vmem:[#allocation45_spill] sm:$0xff] }
 0x1d3   : > { %2098 = vst [vmem:[#allocation1 + $0x5] ss:$9 sm:$0xff] %v11112_v50  ;;  %v11119_v50 = vld [vmem:[#allocation42_spill] sm:$0xff]  ;;  %v11120_v58 = vld [vmem:[#allocation43_spill] sm:$0xff] }
 0x1d4   : > { %2099 = vst [vmem:[#allocation1 + $0x6] ss:$9 sm:$0xff] %v11113_v59  ;;  %v11118_v59 = vld [vmem:[#allocation41_spill] sm:$0xff] }
 0x1d5   : > { %2100 = vst [vmem:[#allocation1 + $0x7] ss:$9 sm:$0xff] %v11114_v32 }
 0x1d6   : > { %2491 = vmatmul.bf16.gmra.mxu1 %v2081_v52 }
 0x1d9   : > { %v1892_v38 = vpop.f32.mrf.mxu3  ;;  %v1814_v23 = vpop.f32.mrf.mxu0 }
 0x1da   : > { %v1883_v30 = vadd.f32 %v8772_v51, %v1814_v23  ;;  %v6859_v38 = vld [vmem:[%s10811_s1 + $0x1d8] sm:$0xff] }
 0x1db   : > { %3164 = vmatpush.bf16.msrb.mxu3 %v6859_v38 }
 0x1dc   : > { %v2101_v7 = vld [vmem:[#allocation1] sm:$0xff]  ;;  %v2102_v48 = vld [vmem:[#allocation1 + $0x9] sm:$0xff]  ;;  %v2103_v40 = vld [vmem:[#allocation1 + $0x12] sm:$0xff] }
 0x1dd   : > { %2104 = vst [vmem:[#allocation1] ss:$9 sm:$0xff] %v11115_v36 }
 0x1de   : > { %2355 = vmatmul.bf16.gmra.mxu3 %v2079_v61  ;;  %2105 = vst [vmem:[#allocation1 + $0x1] ss:$9 sm:$0xff] %v11116_v31  ;;  %v11122_v61 = vld [vmem:[#allocation44_spill] sm:$0xff] }
 0x1df   : > { %2106 = vst [vmem:[#allocation1 + $0x2] ss:$9 sm:$0xff] %v11117_v18 }
 0x1e0   : > { %2107 = vst [vmem:[#allocation1 + $0x3] ss:$9 sm:$0xff] %v11118_v59 }
 0x1e1   : > { %v1948_v32 = vpop.f32.mrf.mxu3  ;;  %2108 = vst [vmem:[#allocation1 + $0x4] ss:$9 sm:$0xff] %v11119_v50  ;;  %v1817_v51 = vpop.f32.mrf.mxu0  ;;  %v6852_v50 = vld [vmem:[%s10811_s1 + $0x1a0] sm:$0xff] }
 0x1e2   : > { %2109 = vst [vmem:[#allocation1 + $0x5] ss:$9 sm:$0xff] %v11120_v58  ;;  %v8832_v52 = vadd.f32 %v1948_v32, %v1881_v45  ;;  %2433 = vmatmul.bf16.gmra.mxu0 %v2102_v48  ;;  %v1886_v23 = vadd.f32 %v8785_v49, %v1817_v51  ;;  %v6867_v58 = vld [vmem:[%s10811_s1 + $0x218] sm:$0xff]  ;;  %3095 = vmatpush.bf16.msrb.mxu2 %v6852_v50  ;;  %v11125_v48 = vld [vmem:[#allocation46_spill] sm:$0xff]  ;;  %v11126_v51 = vld [vmem:[#allocation48_spill] sm:$0xff] }
 0x1e3   : > { %2110 = vst [vmem:[#allocation1 + $0x6] ss:$9 sm:$0xff] %v11122_v61  ;;  %3232 = vmatpush.bf16.msra.mxu0 %v6867_v58  ;;  %v11129_v58 = vld [vmem:[#allocation51_spill] sm:$0xff] }
 0x1e4   : > { %11121 = vst [vmem:[#allocation38_spill] sm:$0xff] %v8832_v52 }
 0x1e5   : > { %2111 = vst [vmem:[#allocation1 + $0x7] ss:$9 sm:$0xff] %v11123_v28 }
 0x1e6   : > { %2496 = vmatmul.bf16.gmra.mxu1 %v2092_v46 }
 0x1e9   : > { %v1950_v59 = vpop.f32.mrf.mxu3  ;;  %v1819_v49 = vpop.f32.mrf.mxu0 }
 0x1ea   : > { %v8843_v45 = vadd.f32 %v1950_v59, %v1883_v30  ;;  %v1888_v28 = vadd.f32 %v8798_v20, %v1819_v49  ;;  %v11127_v59 = vld [vmem:[#allocation49_spill] sm:$0xff]  ;;  %v11128_v30 = vld [vmem:[#allocation50_spill] sm:$0xff]  ;;  %v6858_v20 = vld [vmem:[%s10811_s1 + $0x1d0] sm:$0xff] }
 0x1eb   : > { %3165 = vmatpush.bf16.msrb.mxu3 %v6858_v20  ;;  %v6866_v20 = vld [vmem:[%s10811_s1 + $0x210] sm:$0xff] }
 0x1ec   : > { %11124 = vst [vmem:[#allocation39_spill] sm:$0xff] %v8843_v45  ;;  %v2112_v32 = vld [vmem:[#allocation1] sm:$0xff]  ;;  %v2113_v38 = vld [vmem:[#allocation1 + $0x9] sm:$0xff]  ;;  %v2114_v52 = vld [vmem:[#allocation1 + $0x12] sm:$0xff]  ;;  %3233 = vmatpush.bf16.msra.mxu0 %v6866_v20 }
 0x1ed   : > { %2115 = vst [vmem:[#allocation1] ss:$9 sm:$0xff] %v11125_v48  ;;  %v11131_v48 = vld [vmem:[#allocation52_spill] sm:$0xff] }
 0x1ee   : > { %2116 = vst [vmem:[#allocation1 + $0x1] ss:$9 sm:$0xff] %v8353_v60  ;;  %2360 = vmatmul.bf16.gmra.mxu3 %v2090_v11 }
 0x1ef   : > { %2117 = vst [vmem:[#allocation1 + $0x2] ss:$9 sm:$0xff] %v8359_v55 }
 0x1f0   : > { %2118 = vst [vmem:[#allocation1 + $0x3] ss:$9 sm:$0xff] %v11126_v51  ;;  %v6851_v51 = vld [vmem:[%s10811_s1 + $0x198] sm:$0xff] }
 0x1f1   : > { %2119 = vst [vmem:[#allocation1 + $0x4] ss:$9 sm:$0xff] %v11127_v59  ;;  %v1953_v50 = vpop.f32.mrf.mxu3  ;;  %v1822_v46 = vpop.f32.mrf.mxu0  ;;  %3096 = vmatpush.bf16.msrb.mxu2 %v6851_v51  ;;  %v11137_v51 = vld [vmem:[#allocation59_spill] sm:$0xff] }
 0x1f2   : > { %2120 = vst [vmem:[#allocation1 + $0x5] ss:$9 sm:$0xff] %v11128_v30  ;;  %v8853_v45 = vadd.f32 %v1953_v50, %v1886_v23  ;;  %2438 = vmatmul.bf16.gmra.mxu0 %v2113_v38  ;;  %v1891_v11 = vadd.f32 %v1890_v35, %v1822_v46  ;;  %v11133_v50 = vld [vmem:[#allocation53_spill] sm:$0xff]  ;;  %v8870_v46 = vpop.f32.mrf.mxu1 }
 0x1f3   : > { %2121 = vst [vmem:[#allocation1 + $0x6] ss:$9 sm:$0xff] %v11129_v58  ;;  %v11134_v38 = vld [vmem:[#allocation57_spill] sm:$0xff] }
 0x1f4   : > { %11130 = vst [vmem:[#allocation40_spill] sm:$0xff] %v8853_v45 }
 0x1f5   : > { %2122 = vst [vmem:[#allocation1 + $0x7] ss:$9 sm:$0xff] %v11131_v48 }
 0x1f6   : > { %2501 = vmatmul.bf16.gmra.mxu1 %v2103_v40  ;;  %11136 = vst [vmem:[#allocation92_spill] sm:$0xff] %v8870_v46 }
 0x1f9   : > { %v1955_v55 = vpop.f32.mrf.mxu3  ;;  %v1824_v35 = vpop.f32.mrf.mxu0 }
 0x1fa   : > { %v8862_v49 = vadd.f32 %v1955_v55, %v1888_v28  ;;  %v11135_v28 = vld [vmem:[#allocation58_spill] sm:$0xff] }
 0x1fc   : > { %11132 = vst [vmem:[#allocation44_spill] sm:$0xff] %v8862_v49  ;;  %v2123_v30 = vld [vmem:[#allocation1] sm:$0xff]  ;;  %v2124_v58 = vld [vmem:[#allocation1 + $0x9] sm:$0xff]  ;;  %v2125_v23 = vld [vmem:[#allocation1 + $0x12] sm:$0xff] }
 0x1fd   : > { %2126 = vst [vmem:[#allocation1] ss:$9 sm:$0xff] %v11133_v50  ;;  %v11146_v50 = vld [vmem:[#allocation75_spill] sm:$0xff] }
 0x1fe   : > { %2127 = vst [vmem:[#allocation1 + $0x1] ss:$9 sm:$0xff] %v8417_v15  ;;  %2365 = vmatmul.bf16.gmra.mxu3 %v2101_v7  ;;  %v11139_v7 = vld [vmem:[#allocation60_spill] sm:$0xff] }
 0x1ff   : > { %2128 = vst [vmem:[#allocation1 + $0x2] ss:$9 sm:$0xff] %v8427_v16  ;;  %v11140_v16 = vld [vmem:[#allocation61_spill] sm:$0xff]  ;;  %v11141_v15 = vld [vmem:[#allocation64_spill] sm:$0xff] }
 0x200   : > { %2129 = vst [vmem:[#allocation1 + $0x3] ss:$9 sm:$0xff] %v8433_v22 }
 0x201   : > { %2130 = vst [vmem:[#allocation1 + $0x4] ss:$9 sm:$0xff] %v11134_v38  ;;  %v1958_v55 = vpop.f32.mrf.mxu3  ;;  %v2399_v35 = vpop.f32.mrf.mxu0 }
 0x202   : > { %2131 = vst [vmem:[#allocation1 + $0x5] ss:$9 sm:$0xff] %v11135_v28  ;;  %v8876_v40 = vadd.f32 %v1958_v55, %v1891_v11  ;;  %2443 = vmatmul.bf16.gmra.mxu0 %v2124_v58  ;;  %v6850_v11 = vld [vmem:[%s10811_s1 + $0x190] sm:$0xff]  ;;  %v11142_v58 = vld [vmem:[#allocation73_spill] sm:$0xff] }
 0x203   : > { %2132 = vst [vmem:[#allocation1 + $0x6] ss:$9 sm:$0xff] %v11137_v51  ;;  %v2467_v45 = vpop.f32.mrf.mxu1  ;;  %3097 = vmatpush.bf16.msrb.mxu2 %v6850_v11 }
 0x204   : > { %11138 = vst [vmem:[#allocation93_spill] sm:$0xff] %v8876_v40 }
 0x205   : > { %2133 = vst [vmem:[#allocation1 + $0x7] ss:$9 sm:$0xff] %v11139_v7  ;;  %v6857_v7 = vld [vmem:[%s10811_s1 + $0x1c8] sm:$0xff] }
 0x206   : > { %2506 = vmatmul.bf16.gmra.mxu1 %v2114_v52  ;;  %3166 = vmatpush.bf16.msrb.mxu3 %v6857_v7  ;;  %v11144_v52 = vld [vmem:[#allocation72_spill] sm:$0xff] }
 0x207   : > { %v11148_v7 = vld [vmem:[#allocation76_spill] sm:$0xff] }
 0x209   : > { %v1960_v49 = vpop.f32.mrf.mxu3  ;;  %v2401_v55 = vpop.f32.mrf.mxu0 }
 0x20b   : > { %v8885_v49 = vpop.f32.mrf.mxu1 }
 0x20c   : > { %v2134_v38 = vld [vmem:[#allocation1] sm:$0xff]  ;;  %v2135_v22 = vld [vmem:[#allocation1 + $0x9] sm:$0xff]  ;;  %v2136_v28 = vld [vmem:[#allocation1 + $0x12] sm:$0xff]  ;;  %11143 = vst [vmem:[#allocation73_spill] sm:$0xff] %v8885_v49 }
 0x20d   : > { %2137 = vst [vmem:[#allocation1] ss:$9 sm:$0xff] %v11140_v16 }
 0x20e   : > { %2138 = vst [vmem:[#allocation1 + $0x1] ss:$9 sm:$0xff] %v11141_v15  ;;  %2370 = vmatmul.bf16.gmra.mxu3 %v2112_v32  ;;  %v11145_v32 = vld [vmem:[#allocation74_spill] sm:$0xff] }
 0x20f   : > { %v1838_v15 = vadd.f32 %v11145_v32, %v11144_v52 }
 0x211   : > { %v2331_v20 = vpop.f32.mrf.mxu3  ;;  %v1906_v11 = vadd.f32 %v11146_v50, %v1838_v15  ;;  %v2404_v48 = vpop.f32.mrf.mxu0 }
 0x212   : > { %v2332_v40 = vadd.f32 %v2331_v20, %v11142_v58  ;;  %2448 = vmatmul.bf16.gmra.mxu0 %v2135_v22  ;;  %v6865_v58 = vld [vmem:[%s10811_s1 + $0x208] sm:$0xff] }
 0x213   : > { %v2472_v20 = vpop.f32.mrf.mxu1  ;;  %3234 = vmatpush.bf16.msra.mxu0 %v6865_v58  ;;  %v6849_v22 = vld [vmem:[%s10811_s1 + $0x188] sm:$0xff]  ;;  %v6856_v58 = vld [vmem:[%s10811_s1 + $0x1c0] sm:$0xff] }
 0x214   : > { %v2400_v16 = vadd.f32 %v2399_v35, %v2332_v40  ;;  %3098 = vmatpush.bf16.msrb.mxu2 %v6849_v22  ;;  %v11149_v35 = vld [vmem:[#allocation78_spill] sm:$0xff]  ;;  %3167 = vmatpush.bf16.msrb.mxu3 %v6856_v58 }
 0x215   : > { %v1843_v52 = vadd.f32 %v11149_v35, %v11148_v7  ;;  %v2140_v7 = vld [vmem:[#allocation1 + $0x9] sm:$0xff] }
 0x216   : > { %v8892_v51 = vadd.f32 %v2467_v45, %v2400_v16  ;;  %2511 = vmatmul.bf16.gmra.mxu1 %v2125_v23  ;;  %v11147_v45 = vld [vmem:[#allocation77_spill] sm:$0xff] }
 0x217   : > { %v1911_v23 = vadd.f32 %v8622_v1, %v1843_v52  ;;  %v6848_v1 = vld [vmem:[%s10811_s1 + $0x180] sm:$0xff] }
 0x218   : > { %3099 = vmatpush.bf16.msrb.mxu2 %v6848_v1  ;;  %v11153_v1 = vld [vmem:[#allocation80_spill] sm:$0xff] }
 0x219   : > { %v2333_v59 = vpop.f32.mrf.mxu3  ;;  %v2406_v16 = vpop.f32.mrf.mxu0 }
 0x21a   : > { %v2334_v46 = vadd.f32 %v2333_v59, %v1906_v11 }
 0x21b   : > { %v8904_v59 = vpop.f32.mrf.mxu1 }
 0x21c   : > { %v8898_v49 = vadd.f32 %v2401_v55, %v2334_v46 }
 0x21e   : > { %2375 = vmatmul.bf16.gmra.mxu3 %v2123_v30 }
 0x221   : > { %v2336_v15 = vpop.f32.mrf.mxu3  ;;  %v2409_v30 = vpop.f32.mrf.mxu0 }
 0x222   : > { %v2337_v50 = vadd.f32 %v2336_v15, %v11147_v45  ;;  %2453 = vmatmul.bf16.gmra.mxu0 %v2140_v7  ;;  %v11154_v7 = vld [vmem:[#allocation18_spill] sm:$0xff] }
 0x223   : > { %v2477_v11 = vpop.f32.mrf.mxu1 }
 0x224   : > { %v2405_v40 = vadd.f32 %v2404_v48, %v2337_v50  ;;  %v2141_v48 = vld [vmem:[#allocation1 + $0x12] sm:$0xff] }
 0x226   : > { %v8908_v46 = vadd.f32 %v2472_v20, %v2405_v40  ;;  %2516 = vmatmul.bf16.gmra.mxu1 %v2136_v28  ;;  %v2139_v20 = vld [vmem:[#allocation1] sm:$0xff] }
 0x227   : > { %2772 = vst [vmem:[#allocation1] ss:$9 sm:$0xff] %v7773_v33 }
 0x228   : > { %2774 = vst [vmem:[#allocation1 + $0x1] ss:$9 sm:$0xff] %v7775_v37 }
 0x229   : > { %v2338_v55 = vpop.f32.mrf.mxu3  ;;  %v2411_v15 = vpop.f32.mrf.mxu0  ;;  %2776 = vst [vmem:[#allocation1 + $0x2] ss:$9 sm:$0xff] %v7779_v56 }
 0x22a   : > { %v2339_v32 = vadd.f32 %v2338_v55, %v1911_v23  ;;  %2778 = vst [vmem:[#allocation1 + $0x3] ss:$9 sm:$0xff] %v7783_v62 }
 0x22b   : > { %v8920_v40 = vpop.f32.mrf.mxu1  ;;  %2780 = vst [vmem:[#allocation1 + $0x4] ss:$9 sm:$0xff] %v7790_v4 }
 0x22c   : > { %v8914_v22 = vadd.f32 %v2406_v16, %v2339_v32  ;;  %v6864_v16 = vld [vmem:[%s10811_s1 + $0x200] sm:$0xff]  ;;  %2782 = vst [vmem:[#allocation1 + $0x5] ss:$9 sm:$0xff] %v7795_v8 }
 0x22d   : > { %3235 = vmatpush.bf16.msra.mxu0 %v6864_v16  ;;  %2784 = vst [vmem:[#allocation1 + $0x6] ss:$9 sm:$0xff] %v7799_v54 }
 0x22e   : > { %2380 = vmatmul.bf16.gmra.mxu3 %v2134_v38  ;;  %2786 = vst [vmem:[#allocation1 + $0x7] ss:$9 sm:$0xff] %v7841_v47  ;;  %v1853_v47 = vadd.f32 %v8688_v10, %v8678_v39 }
 0x231   : > { %v2341_v45 = vpop.f32.mrf.mxu3  ;;  %v2414_v52 = vpop.f32.mrf.mxu0 }
 0x232   : > { %v2342_v50 = vadd.f32 %v2341_v45, %v8643_v43  ;;  %v1848_v43 = vadd.f32 %v8645_v5, %v8634_v63 }
 0x233   : > { %v2482_v23 = vpop.f32.mrf.mxu1 }
 0x234   : > { %v2410_v38 = vadd.f32 %v2409_v30, %v2342_v50  ;;  %v1916_v35 = vadd.f32 %v8660_v42, %v1848_v43  ;;  %v11152_v50 = vld [vmem:[#allocation17_spill] sm:$0xff] }
 0x235   : > { %v2787_v5 = vld [vmem:[#allocation1] sm:$0xff]  ;;  %v2789_v4 = vld [vmem:[#allocation1 + $0x12] sm:$0xff]  ;;  %v2788_v30 = vld [vmem:[#allocation1 + $0x9] sm:$0xff] }
 0x236   : > { %v8930_v28 = vadd.f32 %v2477_v11, %v2410_v38  ;;  %2521 = vmatmul.bf16.gmra.mxu1 %v2141_v48  ;;  %3100 = vmatmul.bf16.vlgmr.msrb.gmra.mxu2 %v2787_v5  ;;  %2790 = vst [vmem:[#allocation1] ss:$9 sm:$0xff] %v7844_v13  ;;  %v1921_v13 = vadd.f32 %v8701_v34, %v1853_v47  ;;  %v6903_v43 = vld [vmem:[%s10812_s2 + $0xf8] sm:$0xff] }
 0x237   : > { %2791 = vst [vmem:[#allocation1 + $0x1] ss:$9 sm:$0xff] %v7868_v19  ;;  %3236 = vmatmul.bf16.vlgmr.msra.gmra.mxu0 %v2789_v4  ;;  %v1858_v34 = vadd.f32 %v8714_v9, %v8710_v29  ;;  %4912 = vmatpush.bf16.msra.mxu1 %v6903_v43  ;;  %v11160_v4 = vld [vmem:[#allocation22_spill] sm:$0xff] }
 0x238   : > { %2792 = vst [vmem:[#allocation1 + $0x2] ss:$9 sm:$0xff] %v7870_v21 }
 0x239   : > { %v2343_v33 = vpop.f32.mrf.mxu3  ;;  %v2416_v63 = vpop.f32.mrf.mxu0  ;;  %2793 = vst [vmem:[#allocation1 + $0x3] ss:$9 sm:$0xff] %v7875_v57 }
 0x23a   : > { %v2344_v37 = vadd.f32 %v2343_v33, %v1916_v35  ;;  %2794 = vst [vmem:[#allocation1 + $0x4] ss:$9 sm:$0xff] %v7880_v24  ;;  %v11155_v35 = vld [vmem:[#allocation19_spill] sm:$0xff]  ;;  %v11156_v33 = vld [vmem:[#allocation20_spill] sm:$0xff] }
 0x23b   : > { %v8942_v8 = vpop.f32.mrf.mxu1  ;;  %2795 = vst [vmem:[#allocation1 + $0x5] ss:$9 sm:$0xff] %v7886_v2 }
 0x23c   : > { %v8938_v56 = vadd.f32 %v2411_v15, %v2344_v37  ;;  %2796 = vst [vmem:[#allocation1 + $0x6] ss:$9 sm:$0xff] %v7896_v27  ;;  %v11157_v37 = vld [vmem:[#allocation21_spill] sm:$0xff] }
 0x23d   : > { %2797 = vst [vmem:[#allocation1 + $0x7] ss:$9 sm:$0xff] %v7940_v17 }
 0x23e   : > { %2385 = vmatmul.bf16.gmra.mxu3 %v2139_v20 }
 0x241   : > { %v2346_v62 = vpop.f32.mrf.mxu3  ;;  %v2419_v19 = vpop.f32.mrf.mxu0 }
 0x242   : > { %v2347_v42 = vadd.f32 %v2346_v62, %v8686_v14 }
 0x243   : > { %v2487_v32 = vpop.f32.mrf.mxu1 }
 0x244   : > { %v2415_v54 = vadd.f32 %v2414_v52, %v2347_v42  ;;  %v2798_v39 = vld [vmem:[#allocation1] sm:$0xff]  ;;  %v2800_v10 = vld [vmem:[#allocation1 + $0x12] sm:$0xff]  ;;  %v2799_v11 = vld [vmem:[#allocation1 + $0x9] sm:$0xff] }
 0x245   : > { %2801 = vst [vmem:[#allocation1] ss:$9 sm:$0xff] %v7945_v25  ;;  %v1926_v25 = vadd.f32 %v8721_v0, %v1858_v34  ;;  %v11162_v42 = vld [vmem:[#allocation82_spill] sm:$0xff]  ;;  %v11166_v34 = vld [vmem:[#allocation84_spill] sm:$0xff] }
 0x246   : > { %v8949_v55 = vadd.f32 %v2482_v23, %v2415_v54  ;;  %3105 = vmatmul.bf16.gmra.mxu2 %v2798_v39  ;;  %2802 = vst [vmem:[#allocation1 + $0x1] ss:$9 sm:$0xff] %v7956_v44  ;;  %v11150_v44 = vld [vmem:[#allocation15_spill] sm:$0xff] }
 0x247   : > { %2803 = vst [vmem:[#allocation1 + $0x2] ss:$9 sm:$0xff] %v7967_v6  ;;  %3241 = vmatmul.bf16.gmra.mxu0 %v2800_v10  ;;  %v11158_v23 = vld [vmem:[#allocation79_spill] sm:$0xff] }
 0x248   : > { %2804 = vst [vmem:[#allocation1 + $0x3] ss:$9 sm:$0xff] %v7969_v41 }
 0x249   : > { %v2348_v14 = vpop.f32.mrf.mxu3  ;;  %v2421_v58 = vpop.f32.mrf.mxu0  ;;  %2805 = vst [vmem:[#allocation1 + $0x4] ss:$9 sm:$0xff] %v7974_v53  ;;  %v6911_v53 = vld [vmem:[%s10812_s2 + $0x138] sm:$0xff] }
 0x24a   : > { %v2349_v21 = vadd.f32 %v2348_v14, %v1921_v13  ;;  %2806 = vst [vmem:[#allocation1 + $0x5] ss:$9 sm:$0xff] %v7977_v12  ;;  %4961 = vmatpush.bf16.msra.mxu2 %v6911_v53  ;;  %v11169_v53 = vld [vmem:[#allocation29_spill] sm:$0xff] }
 0x24b   : > { %v8961_v27 = vpop.f32.mrf.mxu1  ;;  %2807 = vst [vmem:[#allocation1 + $0x6] ss:$9 sm:$0xff] %v11087_v26  ;;  %v11151_v26 = vld [vmem:[#allocation16_spill] sm:$0xff] }
 0x24c   : > { %v8956_v57 = vadd.f32 %v2416_v63, %v2349_v21  ;;  %2808 = vst [vmem:[#allocation1 + $0x7] ss:$9 sm:$0xff] %v11150_v44  ;;  %v11159_v63 = vld [vmem:[#allocation81_spill] sm:$0xff]  ;;  %v11167_v44 = vld [vmem:[#allocation27_spill] sm:$0xff] }
 0x24d   : > { %v1863_v62 = vadd.f32 %v11159_v63, %v11158_v23 }
 0x24e   : > { %3168 = vmatmul.bf16.vlgmr.msrb.gmra.mxu3 %v2788_v30  ;;  %v11161_v30 = vld [vmem:[#allocation23_spill] sm:$0xff] }
 0x24f   : > { %v1931_v54 = vadd.f32 %v11162_v42, %v1863_v62  ;;  %v11175_v62 = vld [vmem:[#allocation32_spill] sm:$0xff] }
 0x251   : > { %v2351_v24 = vpop.f32.mrf.mxu3  ;;  %v2424_v6 = vpop.f32.mrf.mxu0 }
 0x252   : > { %v2352_v2 = vadd.f32 %v2351_v24, %v8712_v3 }
 0x253   : > { %v2492_v45 = vpop.f32.mrf.mxu1  ;;  %v2809_v29 = vld [vmem:[#allocation1] sm:$0xff]  ;;  %v2811_v12 = vld [vmem:[#allocation1 + $0x12] sm:$0xff]  ;;  %v2810_v9 = vld [vmem:[#allocation1 + $0x9] sm:$0xff] }
 0x254   : > { %v2420_v17 = vadd.f32 %v2419_v19, %v2352_v2  ;;  %2812 = vst [vmem:[#allocation1] ss:$9 sm:$0xff] %v11151_v26 }
 0x255   : > { %2813 = vst [vmem:[#allocation1 + $0x1] ss:$9 sm:$0xff] %v11152_v50  ;;  %v11174_v50 = vld [vmem:[#allocation14_spill] sm:$0xff] }
 0x256   : > { %v8968_v48 = vadd.f32 %v2487_v32, %v2420_v17  ;;  %3110 = vmatmul.bf16.gmra.mxu2 %v2809_v29  ;;  %2814 = vst [vmem:[#allocation1 + $0x2] ss:$9 sm:$0xff] %v11154_v7  ;;  %v11165_v17 = vld [vmem:[#allocation26_spill] sm:$0xff] }
 0x257   : > { %2815 = vst [vmem:[#allocation1 + $0x3] ss:$9 sm:$0xff] %v11155_v35  ;;  %3246 = vmatmul.bf16.gmra.mxu0 %v2811_v12  ;;  %v11170_v29 = vld [vmem:[#allocation30_spill] sm:$0xff]  ;;  %v11171_v12 = vld [vmem:[#allocation83_spill] sm:$0xff] }
 0x258   : > { %2816 = vst [vmem:[#allocation1 + $0x4] ss:$9 sm:$0xff] %v11156_v33 }
 0x259   : > { %v2353_v3 = vpop.f32.mrf.mxu3  ;;  %v2426_v0 = vpop.f32.mrf.mxu0  ;;  %2817 = vst [vmem:[#allocation1 + $0x5] ss:$9 sm:$0xff] %v11157_v37 }
 0x25a   : > { %v2354_v15 = vadd.f32 %v2353_v3, %v1926_v25  ;;  %2818 = vst [vmem:[#allocation1 + $0x6] ss:$9 sm:$0xff] %v11160_v4  ;;  %v6910_v3 = vld [vmem:[%s10812_s2 + $0x130] sm:$0xff]  ;;  %v11176_v4 = vld [vmem:[#allocation33_spill] sm:$0xff] }
 0x25b   : > { %v8983_v38 = vpop.f32.mrf.mxu1  ;;  %2819 = vst [vmem:[#allocation1 + $0x7] ss:$9 sm:$0xff] %v11161_v30  ;;  %4962 = vmatpush.bf16.msra.mxu2 %v6910_v3  ;;  %v11177_v30 = vld [vmem:[#allocation34_spill] sm:$0xff] }
 0x25c   : > { %v8977_v41 = vadd.f32 %v2421_v58, %v2354_v15  ;;  %v11164_v58 = vld [vmem:[#allocation25_spill] sm:$0xff]  ;;  %v11168_v15 = vld [vmem:[#allocation28_spill] sm:$0xff] }
 0x25e   : > { %3173 = vmatmul.bf16.gmra.mxu3 %v2799_v11  ;;  %v11163_v11 = vld [vmem:[#allocation24_spill] sm:$0xff] }
 0x261   : > { %v2356_v20 = vpop.f32.mrf.mxu3  ;;  %v2429_v47 = vpop.f32.mrf.mxu0 }
 0x262   : > { %v2357_v16 = vadd.f32 %v2356_v20, %v11153_v1  ;;  %v2820_v32 = vld [vmem:[#allocation1] sm:$0xff]  ;;  %v2822_v39 = vld [vmem:[#allocation1 + $0x12] sm:$0xff]  ;;  %v2821_v10 = vld [vmem:[#allocation1 + $0x9] sm:$0xff] }
 0x263   : > { %v2497_v14 = vpop.f32.mrf.mxu1  ;;  %2823 = vst [vmem:[#allocation1] ss:$9 sm:$0xff] %v11163_v11  ;;  %v11173_v20 = vld [vmem:[#allocation31_spill] sm:$0xff]  ;;  %v11182_v11 = vld [vmem:[#allocation86_spill] sm:$0xff] }
 0x264   : > { %v2425_v52 = vadd.f32 %v2424_v6, %v2357_v16  ;;  %2824 = vst [vmem:[#allocation1 + $0x1] ss:$9 sm:$0xff] %v11164_v58  ;;  %v11183_v58 = vld [vmem:[#allocation88_spill] sm:$0xff] }
 0x265   : > { %2825 = vst [vmem:[#allocation1 + $0x2] ss:$9 sm:$0xff] %v11165_v17  ;;  %v11184_v17 = vld [vmem:[#allocation89_spill] sm:$0xff] }
 0x266   : > { %v8993_v5 = vadd.f32 %v2492_v45, %v2425_v52  ;;  %3115 = vmatmul.bf16.gmra.mxu2 %v2820_v32  ;;  %2826 = vst [vmem:[#allocation1 + $0x3] ss:$9 sm:$0xff] %v11167_v44  ;;  %v6902_v52 = vld [vmem:[%s10812_s2 + $0xf0] sm:$0xff] }
 0x267   : > { %2827 = vst [vmem:[#allocation1 + $0x4] ss:$9 sm:$0xff] %v11168_v15  ;;  %3251 = vmatmul.bf16.gmra.mxu0 %v2822_v39  ;;  %4913 = vmatpush.bf16.msra.mxu1 %v6902_v52  ;;  %v11181_v39 = vld [vmem:[#allocation37_spill] sm:$0xff] }
 0x268   : > { %2828 = vst [vmem:[#allocation1 + $0x5] ss:$9 sm:$0xff] %v11169_v53 }
 0x269   : > { %v2358_v13 = vpop.f32.mrf.mxu3  ;;  %v2431_v24 = vpop.f32.mrf.mxu0  ;;  %2829 = vst [vmem:[#allocation1 + $0x6] ss:$9 sm:$0xff] %v11170_v29 }
 0x26a   : > { %v2359_v19 = vadd.f32 %v2358_v13, %v1931_v54  ;;  %2830 = vst [vmem:[#allocation1 + $0x7] ss:$9 sm:$0xff] %v11173_v20  ;;  %v11179_v13 = vld [vmem:[#allocation87_spill] sm:$0xff] }
 0x26b   : > { %v9005_v6 = vpop.f32.mrf.mxu1 }
 0x26c   : > { %v8998_v21 = vadd.f32 %v2426_v0, %v2359_v19 }
 0x26e   : > { %3178 = vmatmul.bf16.gmra.mxu3 %v2810_v9  ;;  %v11172_v9 = vld [vmem:[#allocation85_spill] sm:$0xff] }
 0x26f   : > { %v1868_v26 = vadd.f32 %v11172_v9, %v11171_v12  ;;  %v11185_v12 = vld [vmem:[#allocation41_spill] sm:$0xff]  ;;  %v11186_v9 = vld [vmem:[#allocation42_spill] sm:$0xff] }
 0x271   : > { %v2361_v2 = vpop.f32.mrf.mxu3  ;;  %v1936_v1 = vadd.f32 %v11174_v50, %v1868_v26  ;;  %v2434_v16 = vpop.f32.mrf.mxu0  ;;  %v2831_v37 = vld [vmem:[#allocation1] sm:$0xff]  ;;  %v2833_v23 = vld [vmem:[#allocation1 + $0x12] sm:$0xff]  ;;  %v2832_v63 = vld [vmem:[#allocation1 + $0x9] sm:$0xff] }
 0x272   : > { %v2362_v25 = vadd.f32 %v2361_v2, %v11166_v34  ;;  %2834 = vst [vmem:[#allocation1] ss:$9 sm:$0xff] %v11175_v62  ;;  %v11187_v26 = vld [vmem:[#allocation43_spill] sm:$0xff] }
 0x273   : > { %v2502_v35 = vpop.f32.mrf.mxu1  ;;  %2835 = vst [vmem:[#allocation1 + $0x1] ss:$9 sm:$0xff] %v11176_v4 }
 0x274   : > { %v2430_v45 = vadd.f32 %v2429_v47, %v2362_v25  ;;  %2836 = vst [vmem:[#allocation1 + $0x2] ss:$9 sm:$0xff] %v11177_v30  ;;  %v11178_v47 = vld [vmem:[#allocation35_spill] sm:$0xff] }
 0x275   : > { %2837 = vst [vmem:[#allocation1 + $0x3] ss:$9 sm:$0xff] %v11178_v47 }
 0x276   : > { %v9015_v0 = vadd.f32 %v2497_v14, %v2430_v45  ;;  %3120 = vmatmul.bf16.gmra.mxu2 %v2831_v37  ;;  %v11180_v14 = vld [vmem:[#allocation36_spill] sm:$0xff]  ;;  %2839 = vst [vmem:[#allocation1 + $0x5] ss:$9 sm:$0xff] %v11181_v39  ;;  %v6909_v45 = vld [vmem:[%s10812_s2 + $0x128] sm:$0xff]  ;;  %v1945_v37 = vpop.f32.mrf.mxu2 }
 0x277   : > { %2838 = vst [vmem:[#allocation1 + $0x4] ss:$9 sm:$0xff] %v11180_v14  ;;  %3256 = vmatmul.bf16.gmra.mxu0 %v2833_v23  ;;  %4963 = vmatpush.bf16.msra.mxu2 %v6909_v45  ;;  %v11192_v23 = vld [vmem:[#allocation92_spill] sm:$0xff] }
 0x278   : > { %2840 = vst [vmem:[#allocation1 + $0x6] ss:$9 sm:$0xff] %v11115_v36 }
 0x279   : > { %v2363_v7 = vpop.f32.mrf.mxu3  ;;  %v2436_v42 = vpop.f32.mrf.mxu0  ;;  %2841 = vst [vmem:[#allocation1 + $0x7] ss:$9 sm:$0xff] %v11116_v31 }
 0x27a   : > { %v2364_v43 = vadd.f32 %v2363_v7, %v1936_v1  ;;  %v11188_v1 = vld [vmem:[#allocation91_spill] sm:$0xff]  ;;  %v11189_v7 = vld [vmem:[#allocation45_spill] sm:$0xff] }
 0x27b   : > { %v9030_v32 = vpop.f32.mrf.mxu1 }
 0x27c   : > { %v9022_v33 = vadd.f32 %v2431_v24, %v2364_v43  ;;  %v1873_v24 = vadd.f32 %v11183_v58, %v11182_v11  ;;  %v11195_v11 = vld [vmem:[#allocation49_spill] sm:$0xff]  ;;  %v11196_v58 = vld [vmem:[#allocation50_spill] sm:$0xff] }
 0x27e   : > { %3183 = vmatmul.bf16.gmra.mxu3 %v2821_v10  ;;  %v1941_v34 = vadd.f32 %v11184_v17, %v1873_v24  ;;  %v11197_v24 = vld [vmem:[#allocation51_spill] sm:$0xff] }
 0x280   : > { %v2842_v36 = vld [vmem:[#allocation1] sm:$0xff]  ;;  %v2844_v29 = vld [vmem:[#allocation1 + $0x12] sm:$0xff]  ;;  %v2843_v31 = vld [vmem:[#allocation1 + $0x9] sm:$0xff] }
 0x281   : > { %v2366_v54 = vpop.f32.mrf.mxu3  ;;  %v2439_v25 = vpop.f32.mrf.mxu0  ;;  %2845 = vst [vmem:[#allocation1] ss:$9 sm:$0xff] %v11117_v18  ;;  %v6901_v18 = vld [vmem:[%s10812_s2 + $0xe8] sm:$0xff] }
 0x282   : > { %v2367_v19 = vadd.f32 %v2366_v54, %v11179_v13  ;;  %2846 = vst [vmem:[#allocation1 + $0x1] ss:$9 sm:$0xff] %v11185_v12  ;;  %4914 = vmatpush.bf16.msra.mxu1 %v6901_v18 }
 0x283   : > { %v2507_v15 = vpop.f32.mrf.mxu1  ;;  %2847 = vst [vmem:[#allocation1 + $0x2] ss:$9 sm:$0xff] %v11186_v9 }
 0x284   : > { %v2435_v10 = vadd.f32 %v2434_v16, %v2367_v19  ;;  %2848 = vst [vmem:[#allocation1 + $0x3] ss:$9 sm:$0xff] %v11187_v26 }
 0x285   : > { %2849 = vst [vmem:[#allocation1 + $0x4] ss:$9 sm:$0xff] %v11122_v61  ;;  %v11191_v61 = vld [vmem:[#allocation90_spill] sm:$0xff] }
 0x286   : > { %v9037_v2 = vadd.f32 %v2502_v35, %v2435_v10  ;;  %3125 = vmatmul.bf16.gmra.mxu2 %v2842_v36  ;;  %2850 = vst [vmem:[#allocation1 + $0x5] ss:$9 sm:$0xff] %v11189_v7  ;;  %v11190_v35 = vld [vmem:[#allocation46_spill] sm:$0xff]  ;;  %v11193_v10 = vld [vmem:[#allocation47_spill] sm:$0xff] }
 0x287   : > { %2851 = vst [vmem:[#allocation1 + $0x6] ss:$9 sm:$0xff] %v11190_v35  ;;  %3261 = vmatmul.bf16.gmra.mxu0 %v2844_v29  ;;  %v6908_v36 = vld [vmem:[%s10812_s2 + $0x120] sm:$0xff] }
 0x288   : > { %2852 = vst [vmem:[#allocation1 + $0x7] ss:$9 sm:$0xff] %v8353_v60  ;;  %v11194_v60 = vld [vmem:[#allocation48_spill] sm:$0xff]  ;;  %v6900_v29 = vld [vmem:[%s10812_s2 + $0xe0] sm:$0xff]  ;;  %4964 = vmatpush.bf16.msra.mxu2 %v6908_v36 }
 0x289   : > { %v2368_v44 = vpop.f32.mrf.mxu3  ;;  %v2441_v20 = vpop.f32.mrf.mxu0  ;;  %4915 = vmatpush.bf16.msra.mxu1 %v6900_v29 }
 0x28a   : > { %v2369_v3 = vadd.f32 %v2368_v44, %v1941_v34  ;;  %v11199_v44 = vld [vmem:[#allocation38_spill] sm:$0xff] }
 0x28b   : > { %v9052_v43 = vpop.f32.mrf.mxu1 }
 0x28c   : > { %v9043_v53 = vadd.f32 %v2436_v42, %v2369_v3 }
 0x28e   : > { %3188 = vmatmul.bf16.gmra.mxu3 %v2832_v63  ;;  %v1878_v63 = vadd.f32 %v11192_v23, %v11191_v61  ;;  %v11204_v61 = vld [vmem:[#allocation56_spill] sm:$0xff]  ;;  %v11205_v23 = vld [vmem:[#allocation57_spill] sm:$0xff] }
 0x28f   : > { %v2853_v13 = vld [vmem:[#allocation1] sm:$0xff]  ;;  %v2855_v19 = vld [vmem:[#allocation1 + $0x12] sm:$0xff]  ;;  %v2854_v14 = vld [vmem:[#allocation1 + $0x9] sm:$0xff] }
 0x290   : > { %v1946_v4 = vadd.f32 %v1945_v37, %v1878_v63  ;;  %2856 = vst [vmem:[#allocation1] ss:$9 sm:$0xff] %v11193_v10  ;;  %v11206_v63 = vld [vmem:[#allocation58_spill] sm:$0xff]  ;;  %v11209_v10 = vld [vmem:[#allocation61_spill] sm:$0xff] }
 0x291   : > { %v2371_v50 = vpop.f32.mrf.mxu3  ;;  %v2444_v30 = vpop.f32.mrf.mxu0  ;;  %2857 = vst [vmem:[#allocation1 + $0x1] ss:$9 sm:$0xff] %v11194_v60  ;;  %v511_v60 = vld [vmem:[%s7421_s23 + $0x118] sm:$0xf] }
 0x292   : > { %v2372_v16 = vadd.f32 %v2371_v50, %v11188_v1  ;;  %2858 = vst [vmem:[#allocation1 + $0x2] ss:$9 sm:$0xff] %v11195_v11  ;;  %v11202_v50 = vld [vmem:[#allocation39_spill] sm:$0xff] }
 0x293   : > { %v2512_v47 = vpop.f32.mrf.mxu1  ;;  %2859 = vst [vmem:[#allocation1 + $0x3] ss:$9 sm:$0xff] %v11196_v58  ;;  %v11210_v58 = vld [vmem:[#allocation40_spill] sm:$0xff] }
 0x294   : > { %v2440_v52 = vadd.f32 %v2439_v25, %v2372_v16  ;;  %2860 = vst [vmem:[#allocation1 + $0x4] ss:$9 sm:$0xff] %v11197_v24  ;;  %v11198_v25 = vld [vmem:[#allocation52_spill] sm:$0xff] }
 0x295   : > { %2861 = vst [vmem:[#allocation1 + $0x5] ss:$9 sm:$0xff] %v11198_v25  ;;  %v6899_v25 = vld [vmem:[%s10812_s2 + $0xd8] sm:$0xff] }
 0x296   : > { %v9061_v62 = vadd.f32 %v2507_v15, %v2440_v52  ;;  %3130 = vmatmul.bf16.gmra.mxu2 %v2853_v13  ;;  %v11200_v15 = vld [vmem:[#allocation53_spill] sm:$0xff]  ;;  %v11203_v52 = vld [vmem:[#allocation55_spill] sm:$0xff]  ;;  %4916 = vmatpush.bf16.msra.mxu1 %v6899_v25 }
 0x297   : > { %2862 = vst [vmem:[#allocation1 + $0x6] ss:$9 sm:$0xff] %v11200_v15  ;;  %3266 = vmatmul.bf16.gmra.mxu0 %v2855_v19 }
 0x299   : > { %v2373_v42 = vpop.f32.mrf.mxu3  ;;  %v2446_v17 = vpop.f32.mrf.mxu0 }
 0x29a   : > { %v2374_v54 = vadd.f32 %v2373_v42, %v1946_v4  ;;  %v11207_v4 = vld [vmem:[#allocation59_spill] sm:$0xff]  ;;  %v510_v42 = vld [vmem:[%s7421_s23 + $0x110] sm:$0xff] }
 0x29b   : > { %v9073_v45 = vpop.f32.mrf.mxu1  ;;  %v546_v11 = vpack.c.bf16 %v510_v42, %v510_v42 }
 0x29c   : > { %v9063_v39 = vadd.f32 %v2441_v20, %v2374_v54  ;;  %v11208_v54 = vld [vmem:[#allocation60_spill] sm:$0xff] }
 0x29d   : > { %v618_v15 = vunpack.c.l.b16 %v546_v11 }
 0x29e   : > { %3193 = vmatmul.bf16.gmra.mxu3 %v2843_v31  ;;  %v11201_v31 = vld [vmem:[#allocation54_spill] sm:$0xff] }
 0x29f   : > { %2863 = vst [vmem:[#allocation1 + $0x7] ss:$9 sm:$0xff] %v11201_v31 }
 0x2a1   : > { %v2376_v34 = vpop.f32.mrf.mxu3  ;;  %v2449_v26 = vpop.f32.mrf.mxu0 }
 0x2a2   : > { %v2377_v3 = vadd.f32 %v2376_v34, %v11199_v44  ;;  %v6907_v34 = vld [vmem:[%s10812_s2 + $0x118] sm:$0xff]  ;;  %v547_v44 = vpack.c.bf16 %v511_v60, %v511_v60 }
 0x2a3   : > { %v2517_v16 = vpop.f32.mrf.mxu1  ;;  %4965 = vmatpush.bf16.msra.mxu2 %v6907_v34  ;;  %v11221_v34 = vld [vmem:[#allocation65_spill] sm:$0xff] }
 0x2a4   : > { %v2445_v12 = vadd.f32 %v2444_v30, %v2377_v3  ;;  %v509_v30 = vld [vmem:[%s7421_s23 + $0x108] sm:$0xff]  ;;  %v619_v29 = vunpack.c.l.b16 %v547_v44  ;;  %v11222_v25 = vrot.slane %v11221_v34, 3 }
 0x2a5   : > { %v545_v13 = vpack.c.bf16 %v509_v30, %v509_v30 }
 0x2a6   : > { %v9082_v9 = vadd.f32 %v2512_v47, %v2445_v12  ;;  %v2864_v7 = vld [vmem:[#allocation1] sm:$0xff]  ;;  %v2866_v18 = vld [vmem:[#allocation1 + $0x12] sm:$0xff]  ;;  %v2865_v35 = vld [vmem:[#allocation1 + $0x9] sm:$0xff] }
 0x2a7   : > { %2867 = vst [vmem:[#allocation1] ss:$9 sm:$0xff] %v11203_v52  ;;  %3135 = vmatmul.bf16.gmra.mxu2 %v2864_v7  ;;  %v617_v3 = vunpack.c.l.b16 %v545_v13  ;;  %3271 = vmatmul.bf16.gmra.mxu0 %v2866_v18 }
 0x2a8   : > { %2868 = vst [vmem:[#allocation1 + $0x1] ss:$9 sm:$0xff] %v11204_v61 }
 0x2a9   : > { %v2378_v20 = vpop.f32.mrf.mxu3  ;;  %2869 = vst [vmem:[#allocation1 + $0x2] ss:$9 sm:$0xff] %v11205_v23  ;;  %v2451_v47 = vpop.f32.mrf.mxu0  ;;  %v9107_v31 = vpack.c.b16 %v618_v15, %v617_v3  ;;  %v11224_v3 = vld [vmem:[#allocation67_spill] sm:$0xff] }
 0x2aa   : > { %v2379_v1 = vadd.f32 %v2378_v20, %v11202_v50  ;;  %2870 = vst [vmem:[#allocation1 + $0x3] ss:$9 sm:$0xff] %v11206_v63  ;;  %v9111_v20 = vpack.c.b16 %v619_v29, %v619_v29  ;;  %v11225_v15 = vrot.slane %v11224_v3, 4 }
 0x2ab   : > { %2871 = vst [vmem:[#allocation1 + $0x4] ss:$9 sm:$0xff] %v11207_v4  ;;  %v813_v50 = vshll.u32 %v9107_v31, 16  ;;  %v811_v7 = vshrl.u32 %v9107_v31, 16  ;;  %v11214_v4 = vld [vmem:[#allocation44_spill] sm:$0xff]  ;;  %v859_v60 = vrot.slane %v9107_v31, 1 }
 0x2ac   : > { %v9086_v37 = vadd.f32 %v2446_v17, %v2379_v1  ;;  %2872 = vst [vmem:[#allocation1 + $0x5] ss:$9 sm:$0xff] %v11208_v54  ;;  %v11211_v17 = vld [vmem:[#allocation64_spill] sm:$0xff]  ;;  %v818_v63 = vshll.u32 %v9111_v20, 16  ;;  %v11216_v54 = vld [vmem:[#allocation62_spill] sm:$0xff]  ;;  %v860_v11 = vrot.slane %v9111_v20, 1 }
 0x2ad   : > { %2873 = vst [vmem:[#allocation1 + $0x6] ss:$9 sm:$0xff] %v11209_v10  ;;  %v11217_v13 = vrot.slane %v11216_v54, 1  ;;  %v11233_v54 = vld [vmem:[#allocation93_spill] sm:$0xff] }
 0x2ae   : > { %3198 = vmatmul.bf16.gmra.mxu3 %v2854_v14  ;;  %2874 = vst [vmem:[#allocation1 + $0x7] ss:$9 sm:$0xff] %v11211_v17  ;;  %v9099_v14 = vpop.f32.mrf.mxu1  ;;  %v820_v10 = vrot.slane %v818_v63, 1 }
 0x2af   : > { %11212 = vst [vmem:[#allocation72_spill] sm:$0xff] %v9099_v14  ;;  %v9239_v14 = vadd.f32 %v8904_v59, %v8914_v22 }
 0x2b1   : > { %v2381_v19 = vpop.f32.mrf.mxu3  ;;  %v2454_v1 = vpop.f32.mrf.mxu0 }
 0x2b2   : > { %v2382_v24 = vadd.f32 %v2381_v19, %v11210_v58 }
 0x2b4   : > { %v2450_v36 = vadd.f32 %v2449_v26, %v2382_v24  ;;  %v815_v26 = vrot.slane %v813_v50, 1  ;;  %v11219_v24 = vld [vmem:[#allocation63_spill] sm:$0xff]  ;;  %v11227_v50 = vld [vmem:[#allocation68_spill] sm:$0xff] }
 0x2b5   : > { %v2875_v61 = vld [vmem:[#allocation1] sm:$0xff]  ;;  %v2877_v23 = vld [vmem:[#allocation1 + $0x12] sm:$0xff]  ;;  %v9115_v18 = vld [vmem:[#allocation1 + $0x9] sm:$0xff]  ;;  %v11220_v17 = vrot.slane %v11219_v24, 2 }
 0x2b6   : > { %v9109_v12 = vadd.f32 %v2517_v16, %v2450_v36  ;;  %v2522_v42 = vpop.f32.mrf.mxu1  ;;  %v11215_v16 = vld [vmem:[#allocation66_spill] sm:$0xff]  ;;  %2879 = vst [vmem:[#allocation1 + $0x1] ss:$9 sm:$0xff] %v11217_v13  ;;  %v816_v19 = vor.u32 %v815_v26, %v811_v7  ;;  %v861_v36 = vsel %vm11226_vm11, %v859_v60, %v860_v11  ;;  %v11229_v7 = vld [vmem:[#allocation69_spill] sm:$0xff] }
 0x2b7   : > { %2878 = vst [vmem:[#allocation1] ss:$9 sm:$0xff] %v11215_v16  ;;  %v2733_v63 = vrot.slane %v861_v36, 6  ;;  %3140 = vmatmul.bf16.gmra.mxu2 %v2875_v61  ;;  %3276 = vmatmul.bf16.gmra.mxu0 %v2877_v23  ;;  %v822_v23 = vshrl.u32 %v9111_v20, 16 }
 0x2b8   : > { %11213 = vst [vmem:[#allocation74_spill] sm:$0xff] %v9109_v12  ;;  %v821_v44 = vsel %vm11223_vm15, %v816_v19, %v820_v10  ;;  %v2555_v12 = vrot.slane %v8908_v46, 2 }
 0x2b9   : > { %v2383_v52 = vpop.f32.mrf.mxu3  ;;  %2880 = vst [vmem:[#allocation1 + $0x2] ss:$9 sm:$0xff] %v11220_v17  ;;  %v2732_v29 = vrot.slane %v821_v44, 7  ;;  %v2456_v26 = vpop.f32.mrf.mxu0 }
 0x2ba   : > { %v2384_v30 = vadd.f32 %v2383_v52, %v11214_v4  ;;  %2881 = vst [vmem:[#allocation1 + $0x3] ss:$9 sm:$0xff] %v11222_v25  ;;  %v11230_v52 = vrot.slane %v11229_v7, 6  ;;  %v3101_v3 = vpop.f32.mrf.mxu2 }
 0x2bb   : > { %2882 = vst [vmem:[#allocation1 + $0x4] ss:$9 sm:$0xff] %v11225_v15  ;;  %v2744_v19 = vsel %vm1011_vm4, %v9107_v31, %v2732_v29  ;;  %v2748_v24 = vsel %vm1017_vm8, %v9107_v31, %v2732_v29  ;;  %v2737_v34 = vsel %vm999_vm2, %v9107_v31, %v2732_v29  ;;  %v2752_v44 = vsel %vm1023_vm10, %v9107_v31, %v2732_v29 }
 0x2bc   : > { %v9124_v58 = vadd.f32 %v2451_v47, %v2384_v30  ;;  %v11228_v47 = vrot.slane %v11227_v50, 5  ;;  %2884 = vst [vmem:[#allocation1 + $0x6] ss:$9 sm:$0xff] %v11230_v52  ;;  %v11231_v30 = vld [vmem:[#allocation70_spill] sm:$0xff]  ;;  %v2745_v61 = vsel %vm1013_vm7, %v2744_v19, %v2733_v63  ;;  %v2756_v15 = vsel %vm1029_vm12, %v9107_v31, %v2732_v29  ;;  %vm11239_vm7 = vmmov %vm11226_vm11 }
 0x2bd   : > { %v11232_v16 = vrot.slane %v11231_v30, 7  ;;  %vm11236_vm4 = vcmask 1045508  }
 0x2be   : > { %11218 = vst [vmem:[#allocation75_spill] sm:$0xff] %v9124_v58  ;;  %3203 = vmatmul.bf16.gmra.mxu3 %v2865_v35  ;;  %v2740_v35 = vsel %vm1005_vm3, %v9107_v31, %v2732_v29  ;;  %v2524_v60 = vpop.f32.mrf.mxu1  ;;  %vm11235_vm3 = vcmask 1046534   ;;  %v2753_v52 = vsel %vm11236_vm4, %v2752_v44, %v2733_v63 }
 0x2bf   : > { %2883 = vst [vmem:[#allocation1 + $0x5] ss:$9 sm:$0xff] %v11228_v47  ;;  %v2741_v25 = vsel %vm1007_vm6, %v2740_v35, %v2733_v63  ;;  %v2760_v50 = vsel %vm11235_vm3, %v9107_v31, %v2732_v29  ;;  %v2739_v47 = vsel %vm1002_vm5, %v2737_v34, %v2733_v63  ;;  %v2747_v35 = vrot.slane %v2745_v61, 2  ;;  %vm11238_vm6 = vmmov %vm11071_vm0 }
 0x2c0   : > { %2885 = vst [vmem:[#allocation1 + $0x7] ss:$9 sm:$0xff] %v11232_v16  ;;  %v2743_v7 = vrot.slane %v2741_v25, 1  ;;  %v2761_v60 = vsel %vm11238_vm6, %v2733_v63, %v2760_v50  ;;  %v2755_v34 = vrot.slane %v2753_v52, 4  ;;  %v11240_v50 = vld [vmem:[#allocation73_spill] sm:$0xff] }
 0x2c1   : > { %v2386_v4 = vpop.f32.mrf.mxu3  ;;  %v3237_v26 = vpop.f32.mrf.mxu0  ;;  %v2763_v44 = vrot.slane %v2761_v60, 6 }
 0x2c2   : > { %v2387_v13 = vadd.f32 %v2386_v4, %v11233_v54  ;;  %v3103_v61 = vpop.f32.mrf.mxu2 }
 0x2c4   : > { %v2455_v17 = vadd.f32 %v2454_v1, %v2387_v13  ;;  %v2749_v1 = vsel %vm1019_vm9, %v2748_v24, %v2733_v63  ;;  %v11237_v13 = vld [vmem:[#allocation71_spill] sm:$0xff]  ;;  %v6906_v24 = vld [vmem:[%s10812_s2 + $0x110] sm:$0xff] }
 0x2c5   : > { %v2751_v19 = vrot.slane %v2749_v1, 3  ;;  %4966 = vmatpush.bf16.msra.mxu2 %v6906_v24  ;;  %v2764_v1 = vsel %vm11239_vm7, %v2732_v29, %v9107_v31 }
 0x2c6   : > { %v9157_v36 = vadd.f32 %v2522_v42, %v2455_v17  ;;  %v2757_v42 = vsel %vm1031_vm13, %v2756_v15, %v2733_v63  ;;  %v824_v17 = vor.u32 %v822_v23, %v820_v10  ;;  %v9178_v10 = vadd.f32 %v11240_v50, %v8898_v49 }
 0x2c7   : > { %v2886_v4 = vld [vmem:[#allocation1] sm:$0xff]  ;;  %v2888_v30 = vld [vmem:[#allocation1 + $0x12] sm:$0xff]  ;;  %v9165_v16 = vld [vmem:[#allocation1 + $0x9] sm:$0xff]  ;;  %v2759_v25 = vrot.slane %v2757_v42, 5  ;;  %v2765_v52 = vsel %vm1043_vm1, %v2733_v63, %v2764_v1  ;;  %v2549_v49 = vrot.slane %v8892_v51, 2 }
 0x2c8   : > { %11234 = vst [vmem:[#allocation77_spill] sm:$0xff] %v9157_v36  ;;  %v2734_v15 = vrot.slane %v824_v17, 7  ;;  %3145 = vmatmul.bf16.gmra.mxu2 %v2886_v4  ;;  %v9195_v42 = vld [vmem:[%s10814_s4] ss:$0 sm:$0xff]  ;;  %3281 = vmatmul.bf16.gmra.mxu0 %v2888_v30  ;;  %v2554_v36 = vrot.slane %v9178_v10, 6 }
 0x2c9   : > { %v2388_v54 = vpop.f32.mrf.mxu3  ;;  %2889 = vst [vmem:[#allocation1] ss:$9 sm:$0xff] %v11237_v13  ;;  %v3239_v23 = vpop.f32.mrf.mxu0  ;;  %v9225_v1 = vrot.slane %v9195_v42, 6 }
 0x2ca   : > { %2890 = vst [vmem:[#allocation1 + $0x1] ss:$9 sm:$0xff] %v2739_v47  ;;  %v2769_v29 = vsel %vm999_vm2, %v9111_v20, %v2734_v15  ;;  %v2551_v54 = vrot.slane %v8892_v51, 6  ;;  %v9222_v15 = vrot.slane %v9195_v42, 4 }
 0x2cb   : > { %2892 = vst [vmem:[#allocation1 + $0x2] ss:$9 sm:$0xff] %v2743_v7  ;;  %v9183_v7 = vld [vmem:[%s10813_s3] ss:$0 sm:$0xff] }
 0x2cc   : > { %2894 = vst [vmem:[#allocation1 + $0x3] ss:$9 sm:$0xff] %v2747_v35  ;;  %v2550_v35 = vrot.slane %v8892_v51, 4  ;;  %v9200_v4 = vrot.slane %v9183_v7, 2  ;;  %v9203_v20 = vrot.slane %v9183_v7, 4  ;;  %v9206_v13 = vrot.slane %v9183_v7, 6 }
 0x2cd   : > { %2896 = vst [vmem:[#allocation1 + $0x4] ss:$9 sm:$0xff] %v2751_v19  ;;  %v9208_v19 = vpop.f32.mrf.mxu2 }
 0x2ce   : > { %3208 = vmatmul.bf16.gmra.mxu3 %v9115_v18  ;;  %2898 = vst [vmem:[#allocation1 + $0x5] ss:$9 sm:$0xff] %v2755_v34  ;;  %v2735_v18 = vrot.slane %v860_v11, 6  ;;  %v2553_v11 = vrot.slane %v9178_v10, 4 }
 0x2cf   : > { %2900 = vst [vmem:[#allocation1 + $0x6] ss:$9 sm:$0xff] %v2759_v25  ;;  %v6919_v25 = vld [vmem:[%s10812_s2 + $0x178] sm:$0xff] }
 0x2d0   : > { %2902 = vst [vmem:[#allocation1 + $0x7] ss:$9 sm:$0xff] %v2763_v44  ;;  %v2771_v60 = vsel %vm1002_vm5, %v2769_v29, %v2735_v18  ;;  %v9219_v44 = vrot.slane %v9195_v42, 2  ;;  %5010 = vmatpush.bf16.msra.mxu3 %v6919_v25 }
 0x2d1   : > { %v3169_v47 = vpop.f32.mrf.mxu3 }
 0x2d2   : > { %v3170_v31 = vadd.f32 %v3169_v47, %v3101_v3  ;;  %v2767_v3 = vrot.slane %v2765_v52, 7 }
 0x2d4   : > { %v3238_v63 = vadd.f32 %v3237_v26, %v3170_v31  ;;  %v6898_v26 = vld [vmem:[%s10812_s2 + $0xd0] sm:$0xff] }
 0x2d5   : > { %4917 = vmatpush.bf16.msra.mxu1 %v6898_v26  ;;  %v11241_v26 = vrot.slane %v9178_v10, 2 }
 0x2d6   : > { %v3319_v30 = vrot.slane %v3238_v63, 2  ;;  %v3320_v24 = vrot.slane %v3238_v63, 4  ;;  %v3321_v17 = vrot.slane %v3238_v63, 6  ;;  %v3453_v34 = vadd.f32 %v3238_v63, %v8892_v51  ;;  %v9232_v63 = vpop.f32.mrf.mxu0 }
 0x2d7   : > { %v2903_v50 = vld [vmem:[#allocation1] sm:$0xff]  ;;  %v9227_v47 = vld [vmem:[#allocation1 + $0x9] sm:$0xff]  ;;  %v9229_v51 = vld [vmem:[#allocation1 + $0x12] sm:$0xff] }
 0x2d8   : > { %v3454_v18 = vadd.f32 %v3319_v30, %v2549_v49  ;;  %v3455_v52 = vadd.f32 %v3320_v24, %v2550_v35  ;;  %v3456_v31 = vadd.f32 %v3321_v17, %v2551_v54  ;;  %v3553_v29 = vmul.f32 %v9183_v7, %v3453_v34  ;;  %2907 = vst [vmem:[#allocation1] ss:$9 sm:$0xff] %v2767_v3 }
 0x2d9   : > { %v3171_v58 = vpop.f32.mrf.mxu3  ;;  %2908 = vst [vmem:[#allocation1 + $0x1] ss:$9 sm:$0xff] %v2771_v60  ;;  %v9248_v17 = vadd.f32 %v8920_v40, %v8938_v56  ;;  %3150 = vmatmul.bf16.gmra.mxu2 %v2903_v50  ;;  %3286 = vmatmul.bf16.gmra.mxu0 %v9229_v51 }
 0x2da   : > { %v3172_v49 = vadd.f32 %v3171_v58, %v3103_v61  ;;  %v3554_v35 = vmul.f32 %v9200_v4, %v3454_v18  ;;  %v3555_v54 = vmul.f32 %v9203_v20, %v3455_v52  ;;  %v3556_v3 = vmul.f32 %v9206_v13, %v3456_v31  ;;  %v9257_v52 = vpop.f32.mrf.mxu2 }
 0x2db   : > { %v3653_v59 = vadd.f32 %v9195_v42, %v3553_v29  ;;  %v2564_v25 = vrot.slane %v9248_v17, 2 }
 0x2dc   : > { %v3654_v22 = vadd.f32 %v9219_v44, %v3554_v35  ;;  %v3655_v58 = vadd.f32 %v9222_v15, %v3555_v54  ;;  %v3656_v61 = vadd.f32 %v9225_v1, %v3556_v3  ;;  %v3240_v60 = vadd.f32 %v3239_v23, %v3172_v49 }
 0x2dd   : > { %v3743_v18 = vmax.f32 %v3653_v59, 0.0 }
 0x2de   : > { %v3744_v31 = vmax.f32 %v3654_v22, 0.0  ;;  %3213 = vmatmul.bf16.gmra.mxu3 %v9165_v16  ;;  %v3322_v29 = vrot.slane %v3240_v60, 2  ;;  %v3745_v35 = vmax.f32 %v3655_v58, 0.0  ;;  %v3323_v54 = vrot.slane %v3240_v60, 4  ;;  %v9273_v16 = vpop.f32.mrf.mxu0 }
 0x2df   : > { %v3324_v23 = vrot.slane %v3240_v60, 6  ;;  %v3457_v49 = vadd.f32 %v3240_v60, %v9178_v10  ;;  %v3746_v59 = vmax.f32 %v3656_v61, 0.0  ;;  %v2566_v61 = vrot.slane %v9248_v17, 6 }
 0x2e0   : > { %v3458_v34 = vadd.f32 %v3322_v29, %v11241_v26  ;;  %v9267_v40 = vld [vmem:[#allocation1] sm:$0xff]  ;;  %v9269_v56 = vld [vmem:[#allocation1 + $0x9] sm:$0xff]  ;;  %v9271_v22 = vld [vmem:[#allocation1 + $0x12] sm:$0xff]  ;;  %v3459_v60 = vadd.f32 %v3323_v54, %v2553_v11  ;;  %v9280_v10 = vadd.f32 %v8942_v8, %v8956_v57 }
 0x2e1   : > { %v3174_v24 = vpop.f32.mrf.mxu3  ;;  %v3460_v30 = vadd.f32 %v3324_v23, %v2554_v36  ;;  %v3557_v3 = vmul.f32 %v9183_v7, %v3457_v49  ;;  %4094 = vst [vmem:[#allocation1] ss:$4 sm:$0xff] %v3743_v18 }
 0x2e2   : > { %v3175_v26 = vadd.f32 %v3174_v24, %v9208_v19  ;;  %v3558_v29 = vmul.f32 %v9200_v4, %v3458_v34  ;;  %4096 = vst [vmem:[#allocation1 + $0x1] ss:$4 sm:$0xff] %v3744_v31  ;;  %v3559_v36 = vmul.f32 %v9203_v20, %v3459_v60 }
 0x2e3   : > { %v3560_v11 = vmul.f32 %v9206_v13, %v3460_v30  ;;  %v3657_v18 = vadd.f32 %v9195_v42, %v3557_v3  ;;  %4098 = vst [vmem:[#allocation1 + $0x2] ss:$4 sm:$0xff] %v3745_v35  ;;  %v9295_v30 = vpop.f32.mrf.mxu2  ;;  %v3844_v35 = vlaneseq }
 0x2e4   : > { %v3658_v19 = vadd.f32 %v9219_v44, %v3558_v29  ;;  %v3243_v50 = vadd.f32 %v9232_v63, %v3175_v26  ;;  %4100 = vst [vmem:[#allocation1 + $0x3] ss:$4 sm:$0xff] %v3746_v59  ;;  %v3659_v24 = vadd.f32 %v9222_v15, %v3559_v36  ;;  %v6905_v59 = vld [vmem:[%s10812_s2 + $0x108] sm:$0xff]  ;;  %v11243_v36 = vrot.slane %v8908_v46, 4 }
 0x2e5   : > { %v3660_v34 = vadd.f32 %v9225_v1, %v3560_v11  ;;  %v3747_v31 = vmax.f32 %v3657_v18, 0.0  ;;  %v11244_v18 = vrot.slane %v8908_v46, 6  ;;  %4967 = vmatpush.bf16.msra.mxu2 %v6905_v59 }
 0x2e6   : > { %v3748_v51 = vmax.f32 %v3658_v19, 0.0  ;;  %v3325_v54 = vrot.slane %v3243_v50, 2  ;;  %v3326_v23 = vrot.slane %v3243_v50, 4  ;;  %v3327_v49 = vrot.slane %v3243_v50, 6  ;;  %v9310_v3 = vpop.f32.mrf.mxu0 }
 0x2e7   : > { %v3749_v60 = vmax.f32 %v3659_v24, 0.0  ;;  %v3750_v29 = vmax.f32 %v3660_v34, 0.0  ;;  %v3461_v63 = vadd.f32 %v3243_v50, %v8908_v46  ;;  %4102 = vst [vmem:[#allocation1 + $0x20] ss:$4 sm:$0xff] %v3747_v31  ;;  %v9312_v24 = vstv %s6390_s11  ;;  %s6794_s11 = sshll.u32 %s7239_s28, 5 }
 0x2e8   : > { %v3462_v26 = vadd.f32 %v3325_v54, %v2555_v12  ;;  %v3463_v11 = vadd.f32 %v3326_v23, %v11243_v36  ;;  %v3464_v19 = vadd.f32 %v3327_v49, %v11244_v18  ;;  %4104 = vst [vmem:[#allocation1 + $0x21] ss:$4 sm:$0xff] %v3748_v51  ;;  %v9317_v12 = vshrl.u32 %v3844_v35, 7  ;;  %v6897_v49 = vld [vmem:[%s10812_s2 + $0xc8] sm:$0xff]  ;;  %s5824_s20 = sadd.s32 %s6944_s9, %s6794_s11  ;;  %s7175_s11 = scalar_lea.hbm %s10817_s7, 512 }
 0x2e9   : > { %v3176_v31 = vpop.f32.mrf.mxu3  ;;  %v3561_v57 = vmul.f32 %v9183_v7, %v3461_v63  ;;  %4106 = vst [vmem:[#allocation1 + $0x22] ss:$4 sm:$0xff] %v3749_v60  ;;  %v6918_v60 = vld [vmem:[%s10812_s2 + $0x170] sm:$0xff]  ;;  %v9331_v35 = vadd.f32 %v8961_v27, %v8977_v41  ;;  %vm3848_vm1 = vcmp.ge.s32.totalorder %v9312_v24, 0  ;;  %vm3858_vm2 = vcmp.lt.s32.totalorder %v9312_v24, 16  ;;  %4918 = vmatpush.bf16.msra.mxu1 %v6897_v49  ;;  %3155 = vmatmul.bf16.gmra.mxu2 %v9267_v40  ;;  %s6795_s27 = sshll.u32 %s5824_s20, 3 }
 0x2ea   : > { %v3177_v54 = vadd.f32 %v3176_v31, %v9257_v52  ;;  %v3562_v46 = vmul.f32 %v9183_v7, %v3462_v26  ;;  %v3563_v51 = vmul.f32 %v9200_v4, %v3463_v11  ;;  %v3564_v23 = vmul.f32 %v9203_v20, %v3464_v19  ;;  %4108 = vst [vmem:[#allocation1 + $0x23] ss:$4 sm:$0xff] %v3750_v29  ;;  %vm9353_vm8 = vmand %vm3848_vm1, %vm3858_vm2  ;;  %s5826_s16 = scalar_lea.hbm %s10817_s7, %s6795_s27 }
 0x2eb   : > { %v3661_v52 = vadd.f32 %v9195_v42, %v3561_v57  ;;  %v9342_v11 = vpop.f32.mrf.mxu2  ;;  %5011 = vmatpush.bf16.msra.mxu3 %v6918_v60  ;;  %vm3878_vm5 = vcmp.ge.s32.totalorder %v9317_v12, 1  ;;  %v4109_v18 = vld.sshfl [vmem:[#allocation1] sm:$0xff pattern:$0x73625140]  ;;  %v9347_v31 = vadd.s32 16, %v9317_v12  ;;  %v2576_v60 = vrot.slane %v9331_v35, 2  ;;  %3291 = vmatmul.bf16.gmra.mxu0 %v9271_v22 }
 0x2ec   : > { %v3662_v29 = vadd.f32 %v9195_v42, %v3562_v46  ;;  %v3663_v63 = vadd.f32 %v9219_v44, %v3563_v51  ;;  %v3664_v59 = vadd.f32 %v9222_v15, %v3564_v23  ;;  %v3245_v26 = vadd.f32 %v9273_v16, %v3177_v54  ;;  %vm9377_vm9 = vmand %vm9353_vm8, %vm3878_vm5  ;;  %s5829_s18 = sshll.u32 %s5826_s16, 4  ;;  %s5830_s18 = int_to_ptr.hbm [resolvable:$true] %s5829_s18 }
 0x2ed   : > { %v3751_v41 = vmax.f32 %v3661_v52, 0.0  ;;  %v11248_v34 = vrot.slane %v9239_v14, 4  ;;  %v3835_v49 = vadd.s32 1, %v9312_v24  ;;  %vm3913_vm10 = vcmp.le.s32.totalorder %v9347_v31, 16  ;;  %s7169_s10 = sshra.s32 %s5830_s18, 4  ;;  %s7170_s10 = int_to_ptr.hbm [resolvable:$true] %s7169_s10 }
 0x2ee   : > { %v3752_v57 = vmax.f32 %v3662_v29, 0.0  ;;  %3218 = vmatmul.bf16.gmra.mxu3 %v9227_v47  ;;  %v3328_v19 = vrot.slane %v3245_v26, 2  ;;  %v3753_v54 = vmax.f32 %v3663_v63, 0.0  ;;  %v3329_v46 = vrot.slane %v3245_v26, 4  ;;  %v6927_v47 = vld [vmem:[%s10812_s2 + $0x1b8] sm:$0xff]  ;;  %v9365_v36 = vpop.f32.mrf.mxu0  ;;  %vm9411_vm13 = vmand %vm9353_vm8, %vm3913_vm10  ;;  %s7171_s12 = scalar_lea.hbm %s7170_s10, 128  ;;  %p7176_p5 = scmp.lt.s32.totalorder %s7170_s10, %s10817_s7 }
 0x2ef   : > { %4111 = vst [vmem:[#allocation1] ss:$4 sm:$0xff] %v3751_v41  ;;  %v3330_v51 = vrot.slane %v3245_v26, 6  ;;  %v3465_v23 = vadd.f32 %v3245_v26, %v9239_v14  ;;  %v3754_v52 = vmax.f32 %v3664_v59, 0.0  ;;  %v11247_v29 = vrot.slane %v9239_v14, 2  ;;  %5543 = vmatpush.bf16.msrb.mxu0 %v6927_v47  ;;  %p7172_p1 = scmp.ne.s32.totalorder %s7170_s10, %s7171_s12  ;;  %p7177_p6 = scmp.lt.s32.totalorder %s7175_s11, %s7171_s12 }
 0x2f0   : > { %v3467_v50 = vadd.f32 %v3329_v46, %v11248_v34  ;;  %v11249_v26 = vrot.slane %v9239_v14, 6  ;;  %v2577_v46 = vrot.slane %v9331_v35, 4  ;;  %vm3849_vm12 = vcmp.ge.s32.totalorder %v3835_v49, 0 }
 0x2f1   : > { %v3466_v27 = vadd.f32 %v3328_v19, %v11247_v29  ;;  %v4110_v63 = vld.sshfl [vmem:[#allocation1 + $0x20] sm:$0xff pattern:$0x73625140]  ;;  %v3179_v41 = vpop.f32.mrf.mxu3  ;;  %v3565_v58 = vmul.f32 %v9206_v13, %v3465_v23  ;;  %v9383_v19 = vadd.f32 %v8983_v38, %v8998_v21  ;;  %v6926_v38 = vld [vmem:[%s10812_s2 + $0x1b0] sm:$0xff]  ;;  %vm3859_vm14 = vcmp.lt.s32.totalorder %v3835_v49, 16  ;;  %p7173_p2 = pnand %p7172_p1, %p7346_p3  ;;  %p7178_p7 = por %p7177_p6, %p7176_p5 }
 0x2f2   : > { %v3468_v8 = vadd.f32 %v3330_v51, %v11249_v26  ;;  %4113 = vst [vmem:[#allocation1 + $0x20] ss:$4 sm:$0xff] %v3752_v57  ;;  %v3180_v14 = vadd.f32 %v3179_v41, %v9295_v30  ;;  %v3567_v51 = vmul.f32 %v9200_v4, %v3467_v50  ;;  %v4251_v30 = vsel %vm9377_vm9, %v4109_v18, 0.0  ;;  %v6917_v26 = vld [vmem:[%s10812_s2 + $0x168] sm:$0xff]  ;;  %vm9444_vm0 = vmand %vm3849_vm12, %vm3859_vm14 }
 0x2f3   : > { %v3566_v34 = vmul.f32 %v9183_v7, %v3466_v27  ;;  %4114 = vst [vmem:[#allocation1 + $0x21] ss:$4 sm:$0xff] %v3753_v54  ;;  %v3665_v47 = vadd.f32 %v9225_v1, %v3565_v58  ;;  %v4252_v50 = vsel %vm9353_vm8, %v4110_v63, 0.0  ;;  %v9405_v27 = vpop.f32.mrf.mxu2  ;;  %5544 = vmatpush.bf16.msrb.mxu0 %v6926_v38  ;;  %5012 = vmatpush.bf16.msra.mxu3 %v6917_v26  ;;  %v11258_v49 = vrot.slane %v8930_v28, 6  ;;  %vm9470_vm15 = vmand %vm9444_vm0, %vm3878_vm5  ;;  %p7174_p4 = pneg %p7173_p2 }
 0x2f4   : > { %v3568_v23 = vmul.f32 %v9203_v20, %v3468_v8  ;;  %4115 = vst [vmem:[#allocation1 + $0x22] ss:$4 sm:$0xff] %v3754_v52  ;;  %v3248_v40 = vadd.f32 %v9310_v3, %v3180_v14  ;;  %v3667_v8 = vadd.f32 %v9219_v44, %v3567_v51  ;;  %v6948_v59 = vpack.c.bf16 %v4252_v50, %v4251_v30  ;;  %vm9549_vm11 = vmand %vm9444_vm0, %vm3913_vm10 }
 0x2f5   : > { %v3666_v21 = vadd.f32 %v9195_v42, %v3566_v34  ;;  %v3755_v22 = vmax.f32 %v3665_v47, 0.0  ;;  %v11254_v14 = vrot.slane %v8930_v28, 2  ;;  %v6925_v47 = vld [vmem:[%s10812_s2 + $0x1a8] sm:$0xff]  ;;  %v2579_v30 = vrot.slane %v8993_v5, 2  ;;  %p7179_p9 = pnand %p7178_p7, %p7174_p4 }
 0x2f6   : > { %v3668_v58 = vadd.f32 %v9222_v15, %v3568_v23  ;;  %v4112_v57 = vld.sshfl [vmem:[#allocation1] sm:$0xff pattern:$0x73625140]  ;;  %v3331_v54 = vrot.slane %v3248_v40, 2  ;;  %v3469_v52 = vadd.f32 %v3248_v40, %v8930_v28  ;;  %v3757_v29 = vmax.f32 %v3667_v8, 0.0  ;;  %v9422_v23 = vpop.f32.mrf.mxu0  ;;  %6949 = vst [vmem:[#allocation4] sm:$0xff] %v6948_v59  }
 0x2f7   : > { %v3756_v18 = vmax.f32 %v3666_v21, 0.0  ;;  %4116 = vst [vmem:[#allocation1 + $0x23] ss:$4 sm:$0xff] %v3755_v22  ;;  %v3332_v41 = vrot.slane %v3248_v40, 4  ;;  %v3333_v16 = vrot.slane %v3248_v40, 6  ;;  %v4253_v38 = vsel %vm9411_vm13, %v4112_v57, 0.0  ;;  %5545 = vmatpush.bf16.msrb.mxu0 %v6925_v47 }
 0x2f8   : > { %v3758_v63 = vmax.f32 %v3668_v58, 0.0  ;;  %v3470_v34 = vadd.f32 %v3331_v54, %v11254_v14  ;;  %v3569_v51 = vmul.f32 %v9206_v13, %v3469_v52  ;;  %v2578_v21 = vrot.slane %v9331_v35, 6  ;;  %4119 = vst [vmem:[#allocation1 + $0x1] ss:$4 sm:$0xff] %v3757_v29  ;;  %v6916_v8 = vld [vmem:[%s10812_s2 + $0x160] sm:$0xff] }
 0x2f9   : > { %4118 = vst [vmem:[#allocation1] ss:$4 sm:$0xff] %v3756_v18  ;;  %v2580_v40 = vrot.slane %v8993_v5, 4  ;;  %v3181_v50 = vpop.f32.mrf.mxu3  ;;  %v4283_v58 = vpack.c.bf16 %v4253_v38, %v4253_v38  ;;  %v9437_v22 = vadd.f32 %v9005_v6, %v9022_v33  ;;  %v2581_v52 = vrot.slane %v8993_v5, 6  ;;  %5013 = vmatpush.bf16.msra.mxu3 %v6916_v8 }
 0x2fa   : > { %4120 = vst [vmem:[#allocation1 + $0x2] ss:$4 sm:$0xff] %v3758_v63  ;;  %v3182_v3 = vadd.f32 %v3181_v50, %v9342_v11  ;;  %v3570_v57 = vmul.f32 %v9183_v7, %v3470_v34  ;;  %v3669_v18 = vadd.f32 %v9225_v1, %v3569_v51  ;;  %v2582_v29 = vrot.slane %v9383_v19, 2  ;;  %v6924_v11 = vld [vmem:[%s10812_s2 + $0x1a0] sm:$0xff] }
 0x2fb   : > { %v11257_v33 = vrot.slane %v8930_v28, 4  ;;  %v3472_v26 = vadd.f32 %v3333_v16, %v11258_v49  ;;  %4313 = vst [vmem:[#allocation4 + $0x8] sm:$0x1] %v4283_v58  ;;  %v6915_v49 = vld [vmem:[%s10812_s2 + $0x158] sm:$0xff]  ;;  %5546 = vmatpush.bf16.msrb.mxu0 %v6924_v11  ;;  %vm11277_vm9 = vcmask 1046528  }
 0x2fc   : > { %v3670_v14 = vadd.f32 %v9195_v42, %v3570_v57  ;;  %v3759_v34 = vmax.f32 %v3669_v18, 0.0  ;;  %v3250_v51 = vadd.f32 %v9365_v36, %v3182_v3  ;;  %v9483_v36 = vadd.f32 %v9030_v32, %v9043_v53 }
 0x2fd   : > { %v3471_v63 = vadd.f32 %v3332_v41, %v11257_v33  ;;  %v9464_v33 = vpop.f32.mrf.mxu2  ;;  %v3572_v47 = vmul.f32 %v9200_v4, %v3472_v26  ;;  %v11261_v32 = vrot.slane %v9248_v17, 4  ;;  %5014 = vmatpush.bf16.msra.mxu3 %v6915_v49  ;;  %vm11282_vm14 = vsmask.f32 7424 }
 0x2fe   : > { %v4117_v59 = vld.sshfl [vmem:[#allocation1 + $0x20] sm:$0xff pattern:$0x73625140]  ;;  %v3760_v16 = vmax.f32 %v3670_v14, 0.0  ;;  %v3334_v58 = vrot.slane %v3250_v51, 2  ;;  %v3473_v3 = vadd.f32 %v3250_v51, %v9248_v17  ;;  %3223 = vmatmul.bf16.gmra.mxu3 %v9269_v56  ;;  %v3335_v8 = vrot.slane %v3250_v51, 4  ;;  %v9487_v56 = vpop.f32.mrf.mxu0 }
 0x2ff   : > { %4121 = vst [vmem:[#allocation1 + $0x3] ss:$4 sm:$0xff] %v3759_v34  ;;  %v3336_v18 = vrot.slane %v3250_v51, 6  ;;  %v3571_v14 = vmul.f32 %v9183_v7, %v3471_v63  ;;  %v6923_v34 = vld [vmem:[%s10812_s2 + $0x198] sm:$0xff]  ;;  %v4254_v51 = vsel %vm9470_vm15, %v4117_v59, 0.0  ;;  %v6896_v59 = vld [vmem:[%s10812_s2 + $0xc0] sm:$0xff] }
 0x300   : > { %4122 = vst [vmem:[#allocation1 + $0x20] ss:$4 sm:$0xff] %v3760_v16  ;;  %v3474_v11 = vadd.f32 %v3334_v58, %v2564_v25  ;;  %v3475_v53 = vadd.f32 %v3335_v8, %v11261_v32  ;;  %v4284_v26 = vpack.c.bf16 %v4254_v51, %v4254_v51  ;;  %v3573_v28 = vmul.f32 %v9203_v20, %v3473_v3  ;;  %v6914_v25 = vld [vmem:[%s10812_s2 + $0x150] sm:$0xff]  ;;  %v6904_v17 = vld [vmem:[%s10812_s2 + $0x100] sm:$0xff] }
 0x301   : > { %v3184_v57 = vpop.f32.mrf.mxu3  ;;  %v3476_v63 = vadd.f32 %v3336_v18, %v2566_v61  ;;  %5547 = vmatpush.bf16.msrb.mxu0 %v6923_v34  ;;  %v3671_v49 = vadd.f32 %v9195_v42, %v3571_v14  ;;  %4919 = vmatpush.bf16.msra.mxu1 %v6896_v59  ;;  %v3672_v32 = vadd.f32 %v9219_v44, %v3572_v47  ;;  %v11263_v61 = vrot.slane %v8949_v55, 4 }
 0x302   : > { %v3185_v50 = vadd.f32 %v3184_v57, %v9405_v27  ;;  %v3575_v27 = vmul.f32 %v9183_v7, %v3475_v53  ;;  %4314 = vst [vmem:[#allocation4 + $0xc] sm:$0xf] %v4284_v26  ;;  %v6922_v57 = vld [vmem:[%s10812_s2 + $0x190] sm:$0xff]  ;;  %4968 = vmatpush.bf16.msra.mxu2 %v6904_v17  ;;  %v3574_v53 = vmul.f32 %v9206_v13, %v3474_v11  ;;  %v6921_v17 = vld [vmem:[%s10812_s2 + $0x188] sm:$0xff] }
 0x303   : > { %v3576_v3 = vmul.f32 %v9200_v4, %v3476_v63  ;;  %5015 = vmatpush.bf16.msra.mxu3 %v6914_v25  ;;  %v3673_v8 = vadd.f32 %v9222_v15, %v3573_v28  ;;  %v3761_v28 = vmax.f32 %v3671_v49, 0.0 }
 0x304   : > { %v3253_v51 = vadd.f32 %v9422_v23, %v3185_v50  ;;  %v3675_v34 = vadd.f32 %v9195_v42, %v3575_v27  ;;  %v6913_v23 = vld [vmem:[%s10812_s2 + $0x148] sm:$0xff]  ;;  %v11262_v27 = vrot.slane %v8949_v55, 2 }
 0x305   : > { %v3676_v63 = vadd.f32 %v9219_v44, %v3576_v3  ;;  %v9528_v26 = vpop.f32.mrf.mxu2  ;;  %5548 = vmatpush.bf16.msrb.mxu0 %v6922_v57  ;;  %v3763_v25 = vmax.f32 %v3673_v8, 0.0  ;;  %v9573_v8 = vadd.f32 %v9052_v43, %v9063_v39 }
 0x306   : > { %v3337_v18 = vrot.slane %v3253_v51, 2  ;;  %v3338_v58 = vrot.slane %v3253_v51, 4  ;;  %v3339_v14 = vrot.slane %v3253_v51, 6  ;;  %v3765_v47 = vmax.f32 %v3675_v34, 0.0  ;;  %v9543_v16 = vpop.f32.mrf.mxu0 }
 0x307   : > { %v4124_v50 = vld.sshfl [vmem:[#allocation1 + $0x20] sm:$0xff pattern:$0x73625140]  ;;  %v3766_v59 = vmax.f32 %v3676_v63, 0.0  ;;  %v3477_v11 = vadd.f32 %v3253_v51, %v8949_v55  ;;  %v3674_v51 = vadd.f32 %v9225_v1, %v3574_v53  ;;  %5016 = vmatpush.bf16.msra.mxu3 %v6913_v23 }
 0x308   : > { %v3478_v3 = vadd.f32 %v3337_v18, %v11262_v27  ;;  %v3479_v41 = vadd.f32 %v3338_v58, %v11263_v61  ;;  %v4123_v34 = vld.sshfl [vmem:[#allocation1] sm:$0xff pattern:$0x73625140]  ;;  %4129 = vst [vmem:[#allocation1 + $0x20] ss:$4 sm:$0xff] %v3765_v47  ;;  %v11266_v18 = vrot.slane %v8949_v55, 6 }
 0x309   : > { %v3186_v49 = vpop.f32.mrf.mxu3  ;;  %v3577_v61 = vmul.f32 %v9203_v20, %v3477_v11  ;;  %v4255_v58 = vsel %vm9444_vm0, %v4123_v34, 0.0  ;;  %v3762_v27 = vmax.f32 %v3672_v32, 0.0  ;;  %4130 = vst [vmem:[#allocation1 + $0x21] ss:$4 sm:$0xff] %v3766_v59  ;;  %v6912_v53 = vld [vmem:[%s10812_s2 + $0x140] sm:$0xff]  ;;  %v2597_v55 = vrot.slane %v9061_v62, 2  ;;  %5549 = vmatpush.bf16.msrb.mxu0 %v6921_v17 }
 0x30a   : > { %v3480_v63 = vadd.f32 %v3339_v14, %v11266_v18  ;;  %v3187_v38 = vadd.f32 %v3186_v49, %v9464_v33  ;;  %v3578_v6 = vmul.f32 %v9206_v13, %v3478_v3  ;;  %v4285_v47 = vpack.c.bf16 %v4255_v58, %v4255_v58  ;;  %4125 = vst [vmem:[#allocation1] ss:$4 sm:$0xff] %v3761_v28  ;;  %v6920_v33 = vld [vmem:[%s10812_s2 + $0x180] sm:$0xff] }
 0x30b   : > { %v3677_v14 = vadd.f32 %v9222_v15, %v3577_v61  ;;  %v4256_v54 = vsel %vm9549_vm11, %v4124_v50, 0.0  ;;  %v3579_v32 = vmul.f32 %v9183_v7, %v3479_v41  ;;  %4126 = vst [vmem:[#allocation1 + $0x1] ss:$4 sm:$0xff] %v3762_v27  ;;  %v3764_v28 = vmax.f32 %v3674_v51, 0.0  ;;  %5017 = vmatpush.bf16.msra.mxu3 %v6912_v53  ;;  %v9592_v61 = vld [vmem:[#allocation4 + $0xc] sm:$0xe]  ;;  %vm11289_vm11 = vmmov %vm11277_vm9 }
 0x30c   : > { %v3678_v23 = vadd.f32 %v9225_v1, %v3578_v6  ;;  %v3255_v59 = vadd.f32 %v9487_v56, %v3187_v38  ;;  %v3580_v50 = vmul.f32 %v9183_v7, %v3480_v63  ;;  %4315 = vst [vmem:[#allocation4 + $0x10] sm:$0xf] %v4285_v47  ;;  %v4286_v39 = vpack.c.bf16 %v4256_v54, %v4256_v54 }
 0x30d   : > { %v3767_v17 = vmax.f32 %v3677_v14, 0.0  ;;  %v9580_v3 = vpop.f32.mrf.mxu2  ;;  %4127 = vst [vmem:[#allocation1 + $0x2] ss:$4 sm:$0xff] %v3763_v25  ;;  %v3836_v41 = vadd.s32 2, %v9312_v24  ;;  %5550 = vmatpush.bf16.msrb.mxu0 %v6920_v33  ;;  %v9588_v18 = vadd.f32 %v9195_v42, %v3579_v32  ;;  %v11267_v25 = vrot.slane %v9280_v10, 2 }
 0x30e   : > { %v3768_v34 = vmax.f32 %v3678_v23, 0.0  ;;  %v3340_v43 = vrot.slane %v3255_v59, 2  ;;  %v3341_v38 = vrot.slane %v3255_v59, 4  ;;  %v3342_v56 = vrot.slane %v3255_v59, 6  ;;  %v9594_v58 = vpop.f32.mrf.mxu0  ;;  %4128 = vst [vmem:[#allocation1 + $0x3] ss:$4 sm:$0xff] %v3764_v28 }
 0x30f   : > { %4131 = vst [vmem:[#allocation1 + $0x22] ss:$4 sm:$0xff] %v3767_v17  ;;  %v3481_v57 = vadd.f32 %v3255_v59, %v9280_v10  ;;  %v3680_v27 = vadd.f32 %v9195_v42, %v3580_v50  ;;  %v11268_v14 = vrot.slane %v9280_v10, 4  ;;  %v11269_v54 = vrot.slane %v9280_v10, 6 }
 0x310   : > { %4132 = vst [vmem:[#allocation1 + $0x23] ss:$4 sm:$0xff] %v3768_v34  ;;  %v3482_v63 = vadd.f32 %v3340_v43, %v11267_v25  ;;  %vm3850_vm3 = vcmp.ge.s32.totalorder %v3836_v41, 0  ;;  %vm3860_vm4 = vcmp.lt.s32.totalorder %v3836_v41, 16  ;;  %v3769_v43 = vmax.f32 %v9588_v18, 0.0 }
 0x311   : > { %v3189_v53 = vpop.f32.mrf.mxu3  ;;  %v3483_v47 = vadd.f32 %v3341_v38, %v11268_v14  ;;  %v3484_v33 = vadd.f32 %v3342_v56, %v11269_v54  ;;  %v3581_v32 = vmul.f32 %v9200_v4, %v3481_v57  ;;  %4316 = vst [vmem:[#allocation4 + $0x14] sm:$0x1] %v4286_v39  ;;  %v9613_v56 = vadd.s32 3, %v9312_v24  ;;  %vm9622_vm6 = vmand %vm3850_vm3, %vm3860_vm4 }
 0x312   : > { %v3190_v23 = vadd.f32 %v3189_v53, %v9528_v26  ;;  %v3582_v59 = vmul.f32 %v9203_v20, %v3482_v63  ;;  %v3770_v39 = vmax.f32 %v3680_v27, 0.0  ;;  %vm9639_vm7 = vmand %vm9622_vm6, %vm3878_vm5 }
 0x313   : > { %v3583_v17 = vmul.f32 %v9206_v13, %v3483_v47  ;;  %v3584_v50 = vmul.f32 %v9183_v7, %v3484_v33  ;;  %v3681_v34 = vadd.f32 %v9219_v44, %v3581_v32  ;;  %v9610_v28 = vld [vmem:[#allocation4 + $0xc] sm:$0xff]   ;;  %vm3851_vm1 = vcmp.ge.s32.totalorder %v9613_v56, 0  ;;  %vm7116_vm8 = vmpackc.low %vm9622_vm6, %vm9639_vm7 }
 0x314   : > { %v3682_v10 = vadd.f32 %v9222_v15, %v3582_v59  ;;  %v3258_v38 = vadd.f32 %v9543_v16, %v3190_v23  ;;  %v7113_v26 = vld [vmem:[#allocation4 + $0xc] sm:$0xf0]  ;;  %v11272_v23 = vrot.slane %v8968_v48, 2  ;;  %4920 = vmatmul.bf16.vlgmr.msra.gmra.mxu1 %v9610_v28  ;;  %vm3861_vm2 = vcmp.lt.s32.totalorder %v9613_v56, 16  ;;  %vm9708_vm12 = vmand %vm9622_vm6, %vm3913_vm10 }
 0x315   : > { %v3683_v57 = vadd.f32 %v9225_v1, %v3583_v17  ;;  %v9617_v25 = vadd.f32 %v9195_v42, %v3584_v50  ;;  %v9619_v63 = vpop.f32.mrf.mxu2  ;;  %v3771_v33 = vmax.f32 %v3681_v34, 0.0  ;;  %v11273_v17 = vrot.slane %v8968_v48, 4  ;;  %vm9722_vm13 = vmand %vm3851_vm1, %vm3861_vm2 }
 0x316   : > { %v3772_v16 = vmax.f32 %v3682_v10, 0.0  ;;  %v3343_v53 = vrot.slane %v3258_v38, 2  ;;  %v3344_v14 = vrot.slane %v3258_v38, 4  ;;  %v3345_v47 = vrot.slane %v3258_v38, 6  ;;  %v9633_v51 = vpop.f32.mrf.mxu0  ;;  %vm9750_vm0 = vmand %vm9722_vm13, %vm3878_vm5 }
 0x317   : > { %v4134_v54 = vld.sshfl [vmem:[#allocation1 + $0x20] sm:$0xff pattern:$0x73625140]  ;;  %v3773_v32 = vmax.f32 %v3683_v57, 0.0  ;;  %v3485_v27 = vadd.f32 %v3258_v38, %v8968_v48  ;;  %v11274_v50 = vrot.slane %v8968_v48, 6  ;;  %v7115_v48 = vor.u32 %v9592_v61, %v7113_v26  ;;  %vm9790_vm15 = vmand %vm9722_vm13, %vm3913_vm10 }
 0x318   : > { %4137 = vst [vmem:[#allocation1 + $0x20] ss:$4 sm:$0xff] %v3770_v39  ;;  %v3486_v59 = vadd.f32 %v3343_v53, %v11272_v23  ;;  %v3487_v41 = vadd.f32 %v3344_v14, %v11273_v17  ;;  %v4133_v10 = vld.sshfl [vmem:[#allocation1] sm:$0xff pattern:$0x73625140]  ;;  %v4258_v53 = vsel %vm9622_vm6, %v4134_v54, 0.0  ;;  %vm11290_vm3 = vmmov %vm11282_vm14 }
 0x319   : > { %v3488_v49 = vadd.f32 %v3345_v47, %v11274_v50  ;;  %4138 = vst [vmem:[#allocation1 + $0x21] ss:$4 sm:$0xff] %v3771_v33  ;;  %v3191_v38 = vpop.f32.mrf.mxu3  ;;  %v3585_v39 = vmul.f32 %v9200_v4, %v3485_v27  ;;  %v4362_v57 = vld [vmem:[#allocation4 + $0x14] sm:$0x1]  ;;  %v3774_v27 = vmax.f32 %v9617_v25, 0.0  ;;  %v4257_v26 = vsel %vm9639_vm7, %v4133_v10, 0.0 }
 0x31a   : > { %v6887_v14 = vld [vmem:[%s10812_s2 + $0x78] sm:$0xff]  ;;  %4139 = vst [vmem:[#allocation1 + $0x22] ss:$4 sm:$0xff] %v3772_v16  ;;  %v3192_v47 = vadd.f32 %v3191_v38, %v9580_v3  ;;  %v3586_v23 = vmul.f32 %v9203_v20, %v3486_v59  ;;  %v3587_v33 = vmul.f32 %v9206_v13, %v3487_v41  ;;  %v4452_v61 = vunpack.c.l.b16 %v4362_v57 }
 0x31b   : > { %v3588_v17 = vmul.f32 %v9183_v7, %v3488_v49  ;;  %4140 = vst [vmem:[#allocation1 + $0x23] ss:$4 sm:$0xff] %v3773_v32  ;;  %5252 = vmatpush.bf16.msrb.mxu2 %v6887_v14  ;;  %v3685_v3 = vadd.f32 %v9219_v44, %v3585_v39  ;;  %v4634_v59 = vrot.slane %v7115_v48, 1  ;;  %v6879_v49 = vld [vmem:[%s10812_s2 + $0x38] sm:$0xff]  ;;  %v4484_v32 = vshrl.u32 %v9610_v28, 16 }
 0x31c   : > { %v3260_v41 = vadd.f32 %v9594_v58, %v3192_v47  ;;  %4135 = vst [vmem:[#allocation1] ss:$4 sm:$0xff] %v3769_v43  ;;  %v4462_v25 = vpack.c.b16 %v4452_v61, %v4452_v61  ;;  %v4486_v50 = vshll.u32 %v9610_v28, 16  ;;  %v9670_v57 = vpack.c.bf16 %v4258_v53, %v4257_v26  ;;  %5203 = vmatpush.bf16.msrb.mxu1 %v6879_v49 }
 0x31d   : > { %v3688_v16 = vadd.f32 %v9195_v42, %v3588_v17  ;;  %v9668_v38 = vpop.f32.mrf.mxu2  ;;  %v9673_v39 = vadd.f32 %v9222_v15, %v3586_v23  ;;  %v9676_v48 = vadd.f32 %v9225_v1, %v3587_v33  ;;  %v9684_v53 = vpack.c.bf16 %v4134_v54, %v4133_v10 }
 0x31e   : > { %v3346_v43 = vrot.slane %v3260_v41, 2  ;;  %v4635_v14 = vrot.slane %v4462_v25, 1  ;;  %v3347_v47 = vrot.slane %v3260_v41, 4  ;;  %v3348_v17 = vrot.slane %v3260_v41, 6  ;;  %6990 = vst [vmem:[#allocation4 + $0x18] sm:$0xff] %v9670_v57  }
 0x31f   : > { %v3778_v58 = vmax.f32 %v3688_v16, 0.0  ;;  %v3489_v61 = vadd.f32 %v3260_v41, %v9331_v35  ;;  %7118 = vmatmul.msk.bf16.vlgmr.msrb.gmra.mxu0 %vm7116_vm8, %v9684_v53  ;;  %v3775_v23 = vmax.f32 %v3685_v3, 0.0  ;;  %v4488_v26 = vrot.slane %v4486_v50, 1  ;;  %v9694_v41 = vpop.f32.mrf.mxu0 }
 0x320   : > { %v3490_v33 = vadd.f32 %v3346_v43, %v2576_v60  ;;  %v4491_v16 = vshll.u32 %v4462_v25, 16  ;;  %v9697_v6 = vsel %vm11277_vm9, %v4634_v59, %v4635_v14  ;;  %v3491_v54 = vadd.f32 %v3347_v47, %v2577_v46 }
 0x321   : > { %v3194_v49 = vpop.f32.mrf.mxu3  ;;  %v3492_v10 = vadd.f32 %v3348_v17, %v2578_v21  ;;  %v3589_v11 = vmul.f32 %v9183_v7, %v3489_v61  ;;  %5018 = vmatmul.bf16.vlgmr.msra.gmra.mxu3 %v9697_v6  ;;  %v4489_v25 = vor.u32 %v4488_v26, %v4484_v32  ;;  %v3776_v21 = vmax.f32 %v9673_v39, 0.0 }
 0x322   : > { %v4141_v3 = vld.sshfl [vmem:[#allocation1 + $0x20] sm:$0xff pattern:$0x73625140]  ;;  %v3195_v59 = vadd.f32 %v3194_v49, %v9619_v63  ;;  %v3590_v46 = vmul.f32 %v9200_v4, %v3490_v33  ;;  %v4493_v35 = vrot.slane %v4491_v16, 1  ;;  %v3591_v7 = vmul.f32 %v9203_v20, %v3491_v54 }
 0x323   : > { %4146 = vst [vmem:[#allocation1 + $0x20] ss:$4 sm:$0xff] %v3778_v58  ;;  %v3592_v50 = vmul.f32 %v9206_v13, %v3492_v10  ;;  %v4136_v43 = vld.sshfl [vmem:[#allocation1] sm:$0xff pattern:$0x73625140]  ;;  %v9727_v14 = vadd.f32 %v9195_v42, %v3589_v11  ;;  %v3777_v47 = vmax.f32 %v9676_v48, 0.0 }
 0x324   : > { %v9730_v32 = vsel %vm11282_vm14, %v4489_v25, %v4493_v35  ;;  %v3263_v39 = vadd.f32 %v9633_v51, %v3195_v59  ;;  %v4259_v58 = vsel %vm9708_vm12, %v4136_v43, 0.0  ;;  %4142 = vst [vmem:[#allocation1] ss:$4 sm:$0xff] %v3774_v27  ;;  %v9737_v56 = vadd.f32 %v9219_v44, %v3590_v46  ;;  %7121 = vmatmul.msk.bf16.gmra.mxu1 %vm7116_vm8, %v9684_v53  ;;  %vm11307_vm14 = vmmov %vm11290_vm3 }
 0x325   : > { %v9740_v17 = vadd.f32 %v9222_v15, %v3591_v7  ;;  %4969 = vmatmul.bf16.vlgmr.msra.gmra.mxu2 %v9730_v32  ;;  %v9743_v42 = vpop.f32.mrf.mxu2  ;;  %v4289_v11 = vpack.c.bf16 %v4259_v58, %v4259_v58  ;;  %4143 = vst [vmem:[#allocation1 + $0x1] ss:$4 sm:$0xff] %v3775_v23  ;;  %v9755_v48 = vadd.f32 %v9225_v1, %v3592_v50  ;;  %v7001_v23 = vld [vmem:[#allocation4 + $0x18] sm:$0xf0]  ;;  %v4496_v49 = vshrl.u32 %v9670_v57, 16  ;;  %v6886_v7 = vld [vmem:[%s10812_s2 + $0x70] sm:$0xff] }
 0x326   : > { %v3349_v61 = vrot.slane %v3263_v39, 2  ;;  %v3350_v33 = vrot.slane %v3263_v39, 4  ;;  %v3351_v26 = vrot.slane %v3263_v39, 6  ;;  %v3493_v16 = vadd.f32 %v3263_v39, %v8993_v5  ;;  %v7002_v25 = vld [vmem:[#allocation4 + $0x18] sm:$0xe]  ;;  %5253 = vmatpush.bf16.msrb.mxu2 %v6886_v7 }
 0x327   : > { %4319 = vst [vmem:[#allocation4 + $0x20] sm:$0x1] %v4289_v11  ;;  %v4498_v54 = vshll.u32 %v9670_v57, 16  ;;  %v3779_v10 = vmax.f32 %v9727_v14, 0.0  ;;  %v9767_v35 = vpop.f32.mrf.mxu0  ;;  %v3780_v50 = vmax.f32 %v9737_v56, 0.0  ;;  %v3781_v43 = vmax.f32 %v9740_v17, 0.0 }
 0x328   : > { %v3494_v60 = vadd.f32 %v3349_v61, %v2579_v30  ;;  %v3495_v59 = vadd.f32 %v3350_v33, %v2580_v40  ;;  %v3496_v46 = vadd.f32 %v3351_v26, %v2581_v52  ;;  %4144 = vst [vmem:[#allocation1 + $0x2] ss:$4 sm:$0xff] %v3776_v21  ;;  %v9777_v30 = vld [vmem:[%s10813_s3] ss:$0 sm:$0xff]  ;;  %v4260_v40 = vsel %vm9750_vm0, %v4141_v3, 0.0 }
 0x329   : > { %v3196_v39 = vpop.f32.mrf.mxu3  ;;  %v3593_v5 = vmul.f32 %v9777_v30, %v3493_v16  ;;  %4145 = vst [vmem:[#allocation1 + $0x3] ss:$4 sm:$0xff] %v3777_v47  ;;  %v3782_v3 = vmax.f32 %v9755_v48, 0.0  ;;  %v7003_v26 = vor.u32 %v7002_v25, %v7001_v23  ;;  %v4290_v27 = vpack.c.bf16 %v4260_v40, %v4260_v40 }
 0x32a   : > { %v4148_v52 = vld.sshfl [vmem:[#allocation1 + $0x20] sm:$0xff pattern:$0x73625140]  ;;  %v3197_v21 = vadd.f32 %v3196_v39, %v9668_v38  ;;  %v3594_v58 = vmul.f32 %v9200_v4, %v3494_v60  ;;  %v3595_v11 = vmul.f32 %v9203_v20, %v3495_v59  ;;  %v3596_v61 = vmul.f32 %v9206_v13, %v3496_v46 }
 0x32b   : > { %v9798_v38 = vld [vmem:[%s10814_s4] ss:$0 sm:$0xff]  ;;  %v4500_v39 = vrot.slane %v4498_v54, 1  ;;  %4320 = vst [vmem:[#allocation4 + $0x24] sm:$0xf] %v4290_v27  ;;  %v4262_v18 = vsel %vm9790_vm15, %v4148_v52, 0.0 }
 0x32c   : > { %v3693_v47 = vadd.f32 %v9798_v38, %v3593_v5  ;;  %v3694_v16 = vadd.f32 %v9219_v44, %v3594_v58  ;;  %v3695_v60 = vadd.f32 %v9222_v15, %v3595_v11  ;;  %v3696_v59 = vadd.f32 %v9225_v1, %v3596_v61 }
 0x32d   : > { %v3265_v46 = vadd.f32 %v9694_v41, %v3197_v21  ;;  %v9811_v5 = vpop.f32.mrf.mxu2  ;;  %v9816_v34 = vadd.s32 4, %v9312_v24  ;;  %v4292_v51 = vpack.c.bf16 %v4262_v18, %v4262_v18  ;;  %v4501_v14 = vor.u32 %v4500_v39, %v4496_v49 }
 0x32e   : > { %v3783_v7 = vmax.f32 %v3693_v47, 0.0  ;;  %v3784_v53 = vmax.f32 %v3694_v16, 0.0  ;;  %v3785_v23 = vmax.f32 %v3695_v60, 0.0  ;;  %v3786_v25 = vmax.f32 %v3696_v59, 0.0  ;;  %v4363_v40 = vld [vmem:[#allocation4 + $0x20] sm:$0x1] }
 0x32f   : > { %v3352_v58 = vrot.slane %v3265_v46, 2  ;;  %v4453_v11 = vunpack.c.l.b16 %v4363_v40  ;;  %v3353_v61 = vrot.slane %v3265_v46, 4  ;;  %v3354_v41 = vrot.slane %v3265_v46, 6  ;;  %v9821_v52 = vpop.f32.mrf.mxu0  ;;  %v6878_v47 = vld [vmem:[%s10812_s2 + $0x30] sm:$0xff]  ;;  %4322 = vst [vmem:[#allocation4 + $0x2c] sm:$0x1] %v4292_v51 }
 0x330   : > { %4153 = vst [vmem:[#allocation1 + $0x20] ss:$4 sm:$0xff] %v3783_v7  ;;  %v3497_v54 = vadd.f32 %v3265_v46, %v9383_v19  ;;  %v4147_v33 = vld.sshfl [vmem:[#allocation1] sm:$0xff pattern:$0x73625140]  ;;  %v4637_v60 = vrot.slane %v7003_v26, 1  ;;  %5204 = vmatpush.bf16.msrb.mxu1 %v6878_v47 }
 0x331   : > { %4154 = vst [vmem:[#allocation1 + $0x21] ss:$4 sm:$0xff] %v3784_v53  ;;  %v3498_v21 = vadd.f32 %v3352_v58, %v2582_v29  ;;  %v3199_v27 = vpop.f32.mrf.mxu3  ;;  %v4463_v16 = vpack.c.b16 %v4453_v11, %v4453_v11  ;;  %v11287_v59 = vrot.slane %v9383_v19, 4  ;;  %v11288_v46 = vrot.slane %v9383_v19, 6  ;;  %v6885_v26 = vld [vmem:[%s10812_s2 + $0x68] sm:$0xff] }
 0x332   : > { %4155 = vst [vmem:[#allocation1 + $0x22] ss:$4 sm:$0xff] %v3785_v23  ;;  %v3200_v29 = vadd.f32 %v3199_v27, %v9743_v42  ;;  %v4261_v58 = vsel %vm9722_vm13, %v4147_v33, 0.0  ;;  %v3597_v11 = vmul.f32 %v9777_v30, %v3497_v54  ;;  %5254 = vmatpush.bf16.msrb.mxu2 %v6885_v26  ;;  %v11291_v49 = vrot.slane %v9015_v0, 2  ;;  %v7123_v26 = vld [vmem:[#allocation4 + $0x24] sm:$0xe] }
 0x333   : > { %v3499_v7 = vadd.f32 %v3353_v61, %v11287_v59  ;;  %v3500_v53 = vadd.f32 %v3354_v41, %v11288_v46  ;;  %4156 = vst [vmem:[#allocation1 + $0x23] ss:$4 sm:$0xff] %v3786_v25  ;;  %v3598_v40 = vmul.f32 %v9777_v30, %v3498_v21  ;;  %v4638_v23 = vrot.slane %v4463_v16, 1 }
 0x334   : > { %4149 = vst [vmem:[#allocation1] ss:$4 sm:$0xff] %v3779_v10  ;;  %v4503_v63 = vshll.u32 %v4463_v16, 16  ;;  %v3268_v18 = vadd.f32 %v9767_v35, %v3200_v29  ;;  %v4291_v61 = vpack.c.bf16 %v4261_v58, %v4261_v58  ;;  %v3697_v47 = vadd.f32 %v9798_v38, %v3597_v11 }
 0x335   : > { %v3599_v19 = vmul.f32 %v9200_v4, %v3499_v7  ;;  %v3600_v25 = vmul.f32 %v9203_v20, %v3500_v53  ;;  %v3698_v42 = vadd.f32 %v9798_v38, %v3598_v40  ;;  %4150 = vst [vmem:[#allocation1 + $0x1] ss:$4 sm:$0xff] %v3780_v50  ;;  %v9847_v41 = vsel %vm11289_vm11, %v4637_v60, %v4638_v23  ;;  %v9855_v10 = vpop.f32.mrf.mxu2 }
 0x336   : > { %4151 = vst [vmem:[#allocation1 + $0x2] ss:$4 sm:$0xff] %v3781_v43  ;;  %5023 = vmatmul.bf16.gmra.mxu3 %v9847_v41  ;;  %v4505_v35 = vrot.slane %v4503_v63, 1  ;;  %v3355_v50 = vrot.slane %v3268_v18, 2  ;;  %v3356_v33 = vrot.slane %v3268_v18, 4  ;;  %v3357_v16 = vrot.slane %v3268_v18, 6 }
 0x337   : > { %v3699_v54 = vadd.f32 %v9219_v44, %v3599_v19  ;;  %v3700_v21 = vadd.f32 %v9222_v15, %v3600_v25  ;;  %v3788_v56 = vmax.f32 %v3698_v42, 0.0  ;;  %4321 = vst [vmem:[#allocation4 + $0x28] sm:$0xf] %v4291_v61  ;;  %v3501_v60 = vadd.f32 %v3268_v18, %v9015_v0  ;;  %v9869_v7 = vpop.f32.mrf.mxu0 }
 0x338   : > { %4152 = vst [vmem:[#allocation1 + $0x3] ss:$4 sm:$0xff] %v3782_v3  ;;  %v9863_v17 = vsel %vm11290_vm3, %v4501_v14, %v4505_v35  ;;  %v3502_v43 = vadd.f32 %v3355_v50, %v11291_v49  ;;  %v11292_v39 = vrot.slane %v9015_v0, 4  ;;  %v11293_v48 = vrot.slane %v9015_v0, 6  ;;  %v4364_v50 = vld [vmem:[#allocation4 + $0x2c] sm:$0x1]  ;;  %vm11318_vm3 = vmmov %vm11277_vm9 }
 0x339   : > { %v3789_v27 = vmax.f32 %v3699_v54, 0.0  ;;  %v3790_v57 = vmax.f32 %v3700_v21, 0.0  ;;  %4974 = vmatmul.bf16.gmra.mxu2 %v9863_v17  ;;  %v3201_v53 = vpop.f32.mrf.mxu3  ;;  %v3601_v29 = vmul.f32 %v9206_v13, %v3501_v60  ;;  %vm3852_vm4 = vcmp.ge.s32.totalorder %v9816_v34, 0  ;;  %v6877_v49 = vld [vmem:[%s10812_s2 + $0x28] sm:$0xff] }
 0x33a   : > { %v3503_v59 = vadd.f32 %v3356_v33, %v11292_v39  ;;  %v9871_v46 = vld.sshfl [vmem:[#allocation1 + $0x20] sm:$0xff pattern:$0x73625140]  ;;  %v3504_v3 = vadd.f32 %v3357_v16, %v11293_v48  ;;  %vm3862_vm6 = vcmp.lt.s32.totalorder %v9816_v34, 16  ;;  %v2603_v40 = vrot.slane %v9082_v9, 2  ;;  %5205 = vmatpush.bf16.msrb.mxu1 %v6877_v49 }
 0x33b   : > { %4161 = vst [vmem:[#allocation1 + $0x20] ss:$4 sm:$0xff] %v3788_v56  ;;  %v3202_v51 = vadd.f32 %v3201_v53, %v9811_v5  ;;  %v3602_v58 = vmul.f32 %v9777_v30, %v3502_v43  ;;  %v9883_v23 = vadd.s32 5, %v9312_v24  ;;  %v2604_v0 = vrot.slane %v9082_v9, 4  ;;  %vm9899_vm7 = vmand %vm3852_vm4, %vm3862_vm6 }
 0x33c   : > { %4162 = vst [vmem:[#allocation1 + $0x21] ss:$4 sm:$0xff] %v3789_v27  ;;  %v3603_v11 = vmul.f32 %v9200_v4, %v3503_v59  ;;  %v3604_v19 = vmul.f32 %v9203_v20, %v3504_v3  ;;  %v3701_v25 = vadd.f32 %v9225_v1, %v3601_v29  ;;  %v9892_v5 = vadd.f32 %v9073_v45, %v9086_v37  ;;  %vm9942_vm8 = vmand %vm9899_vm7, %vm3878_vm5 }
 0x33d   : > { %v3787_v63 = vmax.f32 %v3697_v47, 0.0  ;;  %4163 = vst [vmem:[#allocation1 + $0x22] ss:$4 sm:$0xff] %v3790_v57  ;;  %v3270_v18 = vadd.f32 %v9821_v52, %v3202_v51  ;;  %v9904_v54 = vadd.f32 %v9798_v38, %v3602_v58  ;;  %v9908_v37 = vpop.f32.mrf.mxu2  ;;  %v4264_v52 = vsel %vm9899_vm7, %v9871_v46, 0.0  ;;  %vm9974_vm12 = vmand %vm9899_vm7, %vm3913_vm10 }
 0x33e   : > { %v3791_v21 = vmax.f32 %v3701_v25, 0.0  ;;  %v9906_v14 = vld [vmem:[#allocation4 + $0x24] sm:$0xff]   ;;  %vm3853_vm1 = vcmp.ge.s32.totalorder %v9883_v23, 0  ;;  %vm3863_vm2 = vcmp.lt.s32.totalorder %v9883_v23, 16  ;;  %v9918_v34 = vadd.f32 %v9219_v44, %v3603_v11  ;;  %vm7125_vm11 = vmpackc.low %vm9899_vm7, %vm9942_vm8 }
 0x33f   : > { %v7122_v45 = vld [vmem:[#allocation4 + $0x24] sm:$0xf0]  ;;  %v9913_v56 = vld.sshfl [vmem:[#allocation1] sm:$0xff pattern:$0x73625140]  ;;  %v9921_v35 = vadd.f32 %v9222_v15, %v3604_v19  ;;  %v3358_v33 = vrot.slane %v3270_v18, 2  ;;  %v3505_v47 = vadd.f32 %v3270_v18, %v9437_v22  ;;  %v4454_v27 = vunpack.c.l.b16 %v4364_v50  ;;  %v9924_v57 = vpop.f32.mrf.mxu0  ;;  %4930 = vmatmul.bf16.gmra.mxu1 %v9906_v14  ;;  %5556 = vmatmul.bf16.gmra.mxu0 %v9906_v14  ;;  %vm9985_vm13 = vmand %vm3853_vm1, %vm3863_vm2 }
 0x340   : > { %4164 = vst [vmem:[#allocation1 + $0x23] ss:$4 sm:$0xff] %v3791_v21  ;;  %v7124_v16 = vor.u32 %v7123_v26, %v7122_v45  ;;  %v3359_v60 = vrot.slane %v3270_v18, 4  ;;  %v3792_v43 = vmax.f32 %v9904_v54, 0.0  ;;  %v3360_v59 = vrot.slane %v3270_v18, 6  ;;  %v6884_v21 = vld [vmem:[%s10812_s2 + $0x60] sm:$0xff]  ;;  %vm10023_vm0 = vmand %vm9985_vm13, %vm3878_vm5 }
 0x341   : > { %4159 = vst [vmem:[#allocation1] ss:$4 sm:$0xff] %v3787_v63  ;;  %v3204_v39 = vpop.f32.mrf.mxu3  ;;  %v11296_v53 = vrot.slane %v9437_v22, 2  ;;  %v3605_v3 = vmul.f32 %v9206_v13, %v3505_v47  ;;  %v4464_v51 = vpack.c.b16 %v4454_v27, %v4454_v27  ;;  %v11297_v26 = vrot.slane %v9437_v22, 4  ;;  %5255 = vmatpush.bf16.msrb.mxu2 %v6884_v21  ;;  %v6876_v21 = vld [vmem:[%s10812_s2 + $0x20] sm:$0xff]  ;;  %vm10061_vm15 = vmand %vm9985_vm13, %vm3913_vm10 }
 0x342   : > { %v3205_v29 = vadd.f32 %v3204_v39, %v9855_v10  ;;  %v4640_v58 = vrot.slane %v7124_v16, 1  ;;  %v3793_v25 = vmax.f32 %v9918_v34, 0.0  ;;  %v11300_v63 = vrot.slane %v9437_v22, 6  ;;  %5206 = vmatpush.bf16.msrb.mxu1 %v6876_v21  ;;  %vm11319_vm4 = vmmov %vm11307_vm14 }
 0x343   : > { %v3506_v48 = vadd.f32 %v3358_v33, %v11296_v53  ;;  %v3507_v11 = vadd.f32 %v3359_v60, %v11297_v26  ;;  %v3705_v54 = vadd.f32 %v9225_v1, %v3605_v3  ;;  %v3794_v45 = vmax.f32 %v9921_v35, 0.0 }
 0x344   : > { %v3508_v18 = vadd.f32 %v3360_v59, %v11300_v63  ;;  %v4641_v50 = vrot.slane %v4464_v51, 1  ;;  %v4510_v33 = vshll.u32 %v9906_v14, 16  ;;  %v4515_v47 = vshll.u32 %v4464_v51, 16 }
 0x345   : > { %v3606_v10 = vmul.f32 %v9777_v30, %v3506_v48  ;;  %v3607_v34 = vmul.f32 %v9777_v30, %v3507_v11  ;;  %v3273_v27 = vadd.f32 %v9869_v7, %v3205_v29  ;;  %v4263_v16 = vsel %vm9942_vm8, %v9913_v56, 0.0  ;;  %v9962_v60 = vpop.f32.mrf.mxu2 }
 0x346   : > { %v9965_v35 = vsel %vm11277_vm9, %v4640_v58, %v4641_v50  ;;  %v3795_v39 = vmax.f32 %v3705_v54, 0.0  ;;  %v4508_v59 = vshrl.u32 %v9906_v14, 16  ;;  %v4512_v53 = vrot.slane %v4510_v33, 1 }
 0x347   : > { %v3706_v22 = vadd.f32 %v9798_v38, %v3606_v10  ;;  %v4165_v49 = vld.sshfl [vmem:[#allocation1 + $0x20] sm:$0xff pattern:$0x73625140]  ;;  %5028 = vmatmul.bf16.gmra.mxu3 %v9965_v35  ;;  %v3608_v48 = vmul.f32 %v9200_v4, %v3508_v18  ;;  %v3361_v3 = vrot.slane %v3273_v27, 2  ;;  %v3362_v29 = vrot.slane %v3273_v27, 4  ;;  %v9979_v54 = vpop.f32.mrf.mxu0 }
 0x348   : > { %v4160_v58 = vld.sshfl [vmem:[#allocation1] sm:$0xff pattern:$0x73625140]  ;;  %v4513_v26 = vor.u32 %v4512_v53, %v4508_v59  ;;  %v4517_v11 = vrot.slane %v4515_v47, 1  ;;  %v3363_v63 = vrot.slane %v3273_v27, 6  ;;  %v3509_v10 = vadd.f32 %v3273_v27, %v9037_v2 }
 0x349   : > { %v3796_v7 = vmax.f32 %v3706_v22, 0.0  ;;  %4166 = vst [vmem:[#allocation1] ss:$4 sm:$0xff] %v3792_v43  ;;  %v9993_v50 = vadd.f32 %v9798_v38, %v3607_v34  ;;  %v3206_v33 = vpop.f32.mrf.mxu3  ;;  %v11305_v43 = vrot.slane %v9037_v2, 2  ;;  %v11306_v22 = vrot.slane %v9037_v2, 4 }
 0x34a   : > { %v10003_v23 = vpack.c.bf16 %v4264_v52, %v4263_v16  ;;  %v10006_v59 = vsel %vm11307_vm14, %v4513_v26, %v4517_v11  ;;  %v3207_v34 = vadd.f32 %v3206_v33, %v9908_v37  ;;  %v11308_v53 = vrot.slane %v9037_v2, 6  ;;  %4167 = vst [vmem:[#allocation1 + $0x1] ss:$4 sm:$0xff] %v3793_v25 }
 0x34b   : > { %4170 = vst [vmem:[#allocation1 + $0x20] ss:$4 sm:$0xff] %v3796_v7  ;;  %v3510_v47 = vadd.f32 %v3361_v3, %v11305_v43  ;;  %v3511_v27 = vadd.f32 %v3362_v29, %v11306_v22  ;;  %v3609_v42 = vmul.f32 %v9203_v20, %v3509_v10  ;;  %v2606_v3 = vrot.slane %v9892_v5, 2  ;;  %4979 = vmatmul.bf16.gmra.mxu2 %v10006_v59 }
 0x34c   : > { %v3512_v7 = vadd.f32 %v3363_v63, %v11308_v53  ;;  %6991 = vst [vmem:[#allocation4 + $0x30] sm:$0xff] %v10003_v23   ;;  %v4265_v16 = vsel %vm9974_vm12, %v4160_v58, 0.0  ;;  %v10028_v37 = vadd.f32 %v9219_v44, %v3608_v48  ;;  %v3275_v26 = vadd.f32 %v9924_v57, %v3207_v34  ;;  %vm11329_vm12 = vmmov %vm11318_vm3 }
 0x34d   : > { %v3610_v29 = vmul.f32 %v9206_v13, %v3510_v47  ;;  %v3611_v52 = vmul.f32 %v9777_v30, %v3511_v27  ;;  %v4295_v11 = vpack.c.bf16 %v4265_v16, %v4265_v16  ;;  %4168 = vst [vmem:[#allocation1 + $0x2] ss:$4 sm:$0xff] %v3794_v45  ;;  %v3797_v51 = vmax.f32 %v9993_v50, 0.0  ;;  %v10037_v10 = vpop.f32.mrf.mxu2 }
 0x34e   : > { %v3612_v25 = vmul.f32 %v9200_v4, %v3512_v7  ;;  %v10034_v58 = vadd.f32 %v9222_v15, %v3609_v42  ;;  %4169 = vst [vmem:[#allocation1 + $0x3] ss:$4 sm:$0xff] %v3795_v39  ;;  %v4522_v21 = vshll.u32 %v10003_v23, 16  ;;  %v3364_v33 = vrot.slane %v3275_v26, 2 }
 0x34f   : > { %v3711_v63 = vadd.f32 %v9798_v38, %v3611_v52  ;;  %v3365_v43 = vrot.slane %v3275_v26, 4  ;;  %4325 = vst [vmem:[#allocation4 + $0x38] sm:$0x1] %v4295_v11  ;;  %v4266_v57 = vsel %vm10023_vm0, %v4165_v49, 0.0  ;;  %v10044_v45 = vadd.f32 %v9225_v1, %v3610_v29  ;;  %v10052_v16 = vpop.f32.mrf.mxu0  ;;  %vm11336_vm0 = vmmov %vm11319_vm4 }
 0x350   : > { %v3712_v48 = vadd.f32 %v9219_v44, %v3612_v25  ;;  %v3366_v50 = vrot.slane %v3275_v26, 6  ;;  %v3513_v47 = vadd.f32 %v3275_v26, %v9483_v36  ;;  %v3798_v39 = vmax.f32 %v10028_v37, 0.0 }
 0x351   : > { %v3801_v42 = vmax.f32 %v3711_v63, 0.0  ;;  %v11311_v34 = vrot.slane %v9483_v36, 2  ;;  %v11312_v7 = vrot.slane %v9483_v36, 4  ;;  %v3209_v49 = vpop.f32.mrf.mxu3  ;;  %v11313_v29 = vrot.slane %v9483_v36, 6 }
 0x352   : > { %v4172_v22 = vld.sshfl [vmem:[#allocation1 + $0x20] sm:$0xff pattern:$0x73625140]  ;;  %v3802_v27 = vmax.f32 %v3712_v48, 0.0  ;;  %v3613_v25 = vmul.f32 %v9203_v20, %v3513_v47  ;;  %v4524_v26 = vrot.slane %v4522_v21, 1  ;;  %v4296_v11 = vpack.c.bf16 %v4266_v57, %v4266_v57 }
 0x353   : > { %v3514_v53 = vadd.f32 %v3364_v33, %v11311_v34  ;;  %v3515_v52 = vadd.f32 %v3365_v43, %v11312_v7  ;;  %4177 = vst [vmem:[#allocation1 + $0x20] ss:$4 sm:$0xff] %v3801_v42  ;;  %v3516_v2 = vadd.f32 %v3366_v50, %v11313_v29  ;;  %v7126_v36 = vpack.c.bf16 %v9871_v46, %v9913_v56  ;;  %v7004_v48 = vld [vmem:[#allocation4 + $0x30] sm:$0xf0]  ;;  %v7005_v33 = vld [vmem:[#allocation4 + $0x30] sm:$0xe] }
 0x354   : > { %4178 = vst [vmem:[#allocation1 + $0x21] ss:$4 sm:$0xff] %v3802_v27  ;;  %v3210_v63 = vadd.f32 %v3209_v49, %v9962_v60  ;;  %v3799_v43 = vmax.f32 %v10034_v58, 0.0  ;;  %v3800_v57 = vmax.f32 %v10044_v45, 0.0  ;;  %v3713_v19 = vadd.f32 %v9222_v15, %v3613_v25  ;;  %v6883_v46 = vld [vmem:[%s10812_s2 + $0x58] sm:$0xff] }
 0x355   : > { %7127 = vmatmul.msk.bf16.gmra.mxu1 %vm7125_vm11, %v7126_v36  ;;  %7130 = vmatmul.msk.bf16.gmra.mxu0 %vm7125_vm11, %v7126_v36  ;;  %v3614_v21 = vmul.f32 %v9206_v13, %v3514_v53  ;;  %v4520_v61 = vshrl.u32 %v10003_v23, 16  ;;  %4326 = vst [vmem:[#allocation4 + $0x3c] sm:$0xf] %v4296_v11  ;;  %v3616_v56 = vmul.f32 %v9777_v30, %v3516_v2  ;;  %v4171_v50 = vld.sshfl [vmem:[#allocation1] sm:$0xff pattern:$0x73625140]  ;;  %v10086_v34 = vpop.f32.mrf.mxu2 }
 0x356   : > { %v3278_v42 = vadd.f32 %v9979_v54, %v3210_v63  ;;  %v4268_v58 = vsel %vm10061_vm15, %v4172_v22, 0.0  ;;  %v3615_v45 = vmul.f32 %v9777_v30, %v3515_v52  ;;  %v3803_v47 = vmax.f32 %v3713_v19, 0.0  ;;  %v4365_v27 = vld [vmem:[#allocation4 + $0x38] sm:$0x1]  ;;  %5256 = vmatpush.bf16.msrb.mxu2 %v6883_v46  ;;  %4173 = vst [vmem:[#allocation1] ss:$4 sm:$0xff] %v3797_v51 }
 0x357   : > { %v3714_v60 = vadd.f32 %v9225_v1, %v3614_v21  ;;  %v7006_v23 = vor.u32 %v7005_v33, %v7004_v48  ;;  %v4267_v53 = vsel %vm9985_vm13, %v4171_v50, 0.0  ;;  %v4455_v49 = vunpack.c.l.b16 %v4365_v27  ;;  %v6875_v11 = vld [vmem:[%s10812_s2 + $0x18] sm:$0xff]  ;;  %v10097_v63 = vpop.f32.mrf.mxu0  ;;  %4174 = vst [vmem:[#allocation1 + $0x1] ss:$4 sm:$0xff] %v3798_v39 }
 0x358   : > { %v4525_v29 = vor.u32 %v4524_v26, %v4520_v61  ;;  %v3367_v2 = vrot.slane %v3278_v42, 2  ;;  %4179 = vst [vmem:[#allocation1 + $0x22] ss:$4 sm:$0xff] %v3803_v47  ;;  %v3368_v54 = vrot.slane %v3278_v42, 4  ;;  %v3369_v25 = vrot.slane %v3278_v42, 6  ;;  %5207 = vmatpush.bf16.msrb.mxu1 %v6875_v11 }
 0x359   : > { %v3804_v7 = vmax.f32 %v3714_v60, 0.0  ;;  %v3517_v22 = vadd.f32 %v3278_v42, %v9061_v62  ;;  %v4298_v52 = vpack.c.bf16 %v4268_v58, %v4268_v58  ;;  %v3716_v37 = vadd.f32 %v9798_v38, %v3616_v56  ;;  %v3211_v21 = vpop.f32.mrf.mxu3  ;;  %4175 = vst [vmem:[#allocation1 + $0x2] ss:$4 sm:$0xff] %v3799_v43 }
 0x35a   : > { %v4465_v18 = vpack.c.b16 %v4455_v49, %v4455_v49  ;;  %v3518_v36 = vadd.f32 %v3367_v2, %v2597_v55  ;;  %v4297_v26 = vpack.c.bf16 %v4267_v53, %v4267_v53  ;;  %v4643_v51 = vrot.slane %v7006_v23, 1  ;;  %4176 = vst [vmem:[#allocation1 + $0x3] ss:$4 sm:$0xff] %v3800_v57 }
 0x35b   : > { %4180 = vst [vmem:[#allocation1 + $0x23] ss:$4 sm:$0xff] %v3804_v7  ;;  %v11316_v48 = vrot.slane %v9061_v62, 4  ;;  %v11317_v19 = vrot.slane %v9061_v62, 6  ;;  %v3617_v46 = vmul.f32 %v9200_v4, %v3517_v22  ;;  %v3212_v60 = vadd.f32 %v3211_v21, %v10037_v10 }
 0x35c   : > { %v4644_v56 = vrot.slane %v4465_v18, 1  ;;  %v4527_v42 = vshll.u32 %v4465_v18, 16  ;;  %v3618_v55 = vmul.f32 %v9203_v20, %v3518_v36  ;;  %4327 = vst [vmem:[#allocation4 + $0x40] sm:$0xf] %v4297_v26  ;;  %v3715_v50 = vadd.f32 %v9798_v38, %v3615_v45 }
 0x35d   : > { %v3519_v33 = vadd.f32 %v3368_v54, %v11316_v48  ;;  %v3520_v61 = vadd.f32 %v3369_v25, %v11317_v19  ;;  %v3717_v62 = vadd.f32 %v9219_v44, %v3617_v46  ;;  %v3280_v10 = vadd.f32 %v10052_v16, %v3212_v60  ;;  %v10120_v49 = vpop.f32.mrf.mxu2  ;;  %4328 = vst [vmem:[#allocation4 + $0x44] sm:$0x1] %v4298_v52  ;;  %v7132_v48 = vld [vmem:[#allocation4 + $0x3c] sm:$0xe] }
 0x35e   : > { %v10111_v27 = vsel %vm11318_vm3, %v4643_v51, %v4644_v56  ;;  %v4529_v39 = vrot.slane %v4527_v42, 1  ;;  %v3718_v23 = vadd.f32 %v9222_v15, %v3618_v55  ;;  %v3806_v53 = vmax.f32 %v3716_v37, 0.0 }
 0x35f   : > { %v3619_v58 = vmul.f32 %v9206_v13, %v3519_v33  ;;  %v3620_v47 = vmul.f32 %v9777_v30, %v3520_v61  ;;  %5033 = vmatmul.bf16.gmra.mxu3 %v10111_v27  ;;  %v3840_v43 = vadd.s32 6, %v9312_v24  ;;  %v3370_v25 = vrot.slane %v3280_v10, 2  ;;  %v10135_v33 = vpop.f32.mrf.mxu0 }
 0x360   : > { %v10124_v2 = vsel %vm11319_vm4, %v4525_v29, %v4529_v39  ;;  %v3808_v54 = vmax.f32 %v3718_v23, 0.0  ;;  %v3371_v16 = vrot.slane %v3280_v10, 4  ;;  %v3807_v22 = vmax.f32 %v3717_v62, 0.0  ;;  %vm11343_vm4 = vmmov %vm11329_vm12 }
 0x361   : > { %v3719_v45 = vadd.f32 %v9225_v1, %v3619_v58  ;;  %v10118_v7 = vadd.f32 %v9798_v38, %v3620_v47  ;;  %4984 = vmatmul.bf16.gmra.mxu2 %v10124_v2  ;;  %v3372_v37 = vrot.slane %v3280_v10, 6  ;;  %v3521_v18 = vadd.f32 %v3280_v10, %v9573_v8  ;;  %v3214_v61 = vpop.f32.mrf.mxu3 }
 0x362   : > { %v10126_v57 = vld.sshfl [vmem:[#allocation1 + $0x20] sm:$0xff pattern:$0x73625140]  ;;  %v2607_v36 = vrot.slane %v9892_v5, 4  ;;  %v3805_v52 = vmax.f32 %v3715_v50, 0.0  ;;  %v11320_v26 = vrot.slane %v9573_v8, 2  ;;  %v3215_v58 = vadd.f32 %v3214_v61, %v10086_v34 }
 0x363   : > { %v3809_v11 = vmax.f32 %v3719_v45, 0.0  ;;  %4185 = vst [vmem:[#allocation1 + $0x20] ss:$4 sm:$0xff] %v3806_v53  ;;  %v11321_v51 = vrot.slane %v9573_v8, 4  ;;  %v11322_v46 = vrot.slane %v9573_v8, 6  ;;  %v3621_v60 = vmul.f32 %v9200_v4, %v3521_v18  ;;  %v10141_v42 = vld [vmem:[#allocation4 + $0x3c] sm:$0xff]  }
 0x364   : > { %v3522_v29 = vadd.f32 %v3370_v25, %v11320_v26  ;;  %4186 = vst [vmem:[#allocation1 + $0x21] ss:$4 sm:$0xff] %v3807_v22  ;;  %v7131_v55 = vld [vmem:[#allocation4 + $0x3c] sm:$0xf0]  ;;  %v10144_v50 = vadd.s32 7, %v9312_v24  ;;  %vm3854_vm6 = vcmp.ge.s32.totalorder %v3840_v43, 0  ;;  %v3283_v45 = vadd.f32 %v10097_v63, %v3215_v58 }
 0x365   : > { %v3523_v21 = vadd.f32 %v3371_v16, %v11321_v51  ;;  %v3524_v56 = vadd.f32 %v3372_v37, %v11322_v46  ;;  %4187 = vst [vmem:[#allocation1 + $0x22] ss:$4 sm:$0xff] %v3808_v54  ;;  %vm3864_vm7 = vcmp.lt.s32.totalorder %v3840_v43, 16  ;;  %v3810_v47 = vmax.f32 %v10118_v7, 0.0  ;;  %v4366_v53 = vld [vmem:[#allocation4 + $0x44] sm:$0x1]  ;;  %v10159_v25 = vpop.f32.mrf.mxu2  ;;  %4940 = vmatmul.bf16.gmra.mxu1 %v10141_v42  ;;  %5566 = vmatmul.bf16.gmra.mxu0 %v10141_v42 }
 0x366   : > { %4188 = vst [vmem:[#allocation1 + $0x23] ss:$4 sm:$0xff] %v3809_v11  ;;  %v10149_v8 = vld.sshfl [vmem:[#allocation1] sm:$0xff pattern:$0x73625140]  ;;  %v3622_v39 = vmul.f32 %v9203_v20, %v3522_v29  ;;  %v3721_v10 = vadd.f32 %v9219_v44, %v3621_v60  ;;  %v6882_v34 = vld [vmem:[%s10812_s2 + $0x50] sm:$0xff]  ;;  %v4456_v54 = vunpack.c.l.b16 %v4366_v53  ;;  %vm10163_vm1 = vmand %vm3854_vm6, %vm3864_vm7  ;;  %v7133_v22 = vor.u32 %v7132_v48, %v7131_v55 }
 0x367   : > { %v3624_v62 = vmul.f32 %v9777_v30, %v3524_v56  ;;  %v3623_v23 = vmul.f32 %v9206_v13, %v3523_v21  ;;  %4183 = vst [vmem:[#allocation1] ss:$4 sm:$0xff] %v3805_v52  ;;  %vm3855_vm2 = vcmp.ge.s32.totalorder %v10144_v50, 0  ;;  %v3373_v63 = vrot.slane %v3283_v45, 2  ;;  %5257 = vmatpush.bf16.msrb.mxu2 %v6882_v34  ;;  %v6874_v37 = vld [vmem:[%s10812_s2 + $0x10] sm:$0xff]  ;;  %v10179_v61 = vpop.f32.mrf.mxu0  ;;  %vm10189_vm9 = vmand %vm10163_vm1, %vm3878_vm5 }
 0x368   : > { %v4270_v11 = vsel %vm10163_vm1, %v10126_v57, 0.0  ;;  %vm3865_vm8 = vcmp.lt.s32.totalorder %v10144_v50, 16  ;;  %v4466_v18 = vpack.c.b16 %v4456_v54, %v4456_v54  ;;  %v3374_v52 = vrot.slane %v3283_v45, 4  ;;  %5208 = vmatpush.bf16.msrb.mxu1 %v6874_v37  ;;  %v11328_v34 = vld [vmem:[#allocation72_spill] sm:$0xff]  ;;  %vm10214_vm13 = vmand %vm10163_vm1, %vm3913_vm10 }
 0x369   : > { %v3724_v7 = vadd.f32 %v9798_v38, %v3624_v62  ;;  %v3375_v26 = vrot.slane %v3283_v45, 6  ;;  %v3722_v29 = vadd.f32 %v9222_v15, %v3622_v39  ;;  %v3723_v51 = vadd.f32 %v9225_v1, %v3623_v23  ;;  %v3216_v46 = vpop.f32.mrf.mxu3  ;;  %vm10228_vm14 = vmand %vm3855_vm2, %vm3865_vm8 }
 0x36a   : > { %v3811_v21 = vmax.f32 %v3721_v10, 0.0  ;;  %v4646_v48 = vrot.slane %v7133_v22, 1  ;;  %v4647_v56 = vrot.slane %v4466_v18, 1  ;;  %v3525_v60 = vadd.f32 %v3283_v45, %v9082_v9  ;;  %vm3902_vm15 = vmand %vm10228_vm14, %vm3878_vm5 }
 0x36b   : > { %v3814_v43 = vmax.f32 %v3724_v7, 0.0  ;;  %v3526_v55 = vadd.f32 %v3373_v63, %v2603_v40  ;;  %v4534_v58 = vshll.u32 %v10141_v42, 16  ;;  %v3217_v39 = vadd.f32 %v3216_v46, %v10120_v49  ;;  %v11327_v40 = vld [vmem:[#allocation75_spill] sm:$0xff]  ;;  %vm10268_vm11 = vmand %vm10228_vm14, %vm3913_vm10 }
 0x36c   : > { %v3527_v23 = vadd.f32 %v3374_v52, %v2604_v0  ;;  %v4532_v10 = vshrl.u32 %v10141_v42, 16  ;;  %v4539_v53 = vshll.u32 %v4466_v18, 16  ;;  %v10199_v7 = vadd.f32 %v11328_v34, %v11327_v40  ;;  %vm10303_vm3 = vmpackc.low %vm10163_vm1, %vm10189_vm9 }
 0x36d   : > { %v4189_v45 = vld.sshfl [vmem:[#allocation1 + $0x20] sm:$0xff pattern:$0x73625140]  ;;  %v10202_v54 = vsel %vm11329_vm12, %v4646_v48, %v4647_v56  ;;  %v11330_v22 = vrot.slane %v9082_v9, 6  ;;  %v4536_v37 = vrot.slane %v4534_v58, 1  ;;  %v3812_v49 = vmax.f32 %v3722_v29, 0.0  ;;  %v10222_v29 = vpop.f32.mrf.mxu2  ;;  %vm11345_vm6 = vmmov %vm11336_vm0 }
 0x36e   : > { %v4184_v19 = vld.sshfl [vmem:[#allocation1] sm:$0xff pattern:$0x73625140]  ;;  %4194 = vst [vmem:[#allocation1 + $0x20] ss:$4 sm:$0xff] %v3814_v43  ;;  %v4541_v46 = vrot.slane %v4539_v53, 1  ;;  %v3285_v0 = vadd.f32 %v10135_v33, %v3217_v39  ;;  %v3625_v43 = vmul.f32 %v9777_v30, %v3525_v60  ;;  %vm11354_vm12 = vmmov %vm11343_vm4 }
 0x36f   : > { %v3528_v63 = vadd.f32 %v3375_v26, %v11330_v22  ;;  %v4269_v18 = vsel %vm10189_vm9, %v10149_v8, 0.0  ;;  %4190 = vst [vmem:[#allocation1] ss:$4 sm:$0xff] %v3810_v47  ;;  %v3813_v9 = vmax.f32 %v3723_v51, 0.0  ;;  %5038 = vmatmul.bf16.gmra.mxu3 %v10202_v54  ;;  %v4537_v26 = vor.u32 %v4536_v37, %v4532_v10  ;;  %v11335_v60 = vld [vmem:[#allocation74_spill] sm:$0xff]  ;;  %v10247_v40 = vpop.f32.mrf.mxu0 }
 0x370   : > { %v10220_v33 = vpack.c.bf16 %v4270_v11, %v4269_v18  ;;  %v3626_v47 = vmul.f32 %v9200_v4, %v3526_v55  ;;  %v3627_v51 = vmul.f32 %v9203_v20, %v3527_v23  ;;  %v3376_v56 = vrot.slane %v3285_v0, 2  ;;  %4191 = vst [vmem:[#allocation1 + $0x1] ss:$4 sm:$0xff] %v3811_v21 }
 0x371   : > { %v3377_v58 = vrot.slane %v3285_v0, 4  ;;  %v2609_v11 = vrot.slane %v11335_v60, 2  ;;  %v2610_v39 = vrot.slane %v11335_v60, 4  ;;  %v3628_v10 = vmul.f32 %v9206_v13, %v3528_v63  ;;  %4192 = vst [vmem:[#allocation1 + $0x2] ss:$4 sm:$0xff] %v3812_v49  ;;  %v3219_v63 = vpop.f32.mrf.mxu3 }
 0x372   : > { %v10238_v53 = vsel %vm11336_vm0, %v4537_v26, %v4541_v46  ;;  %6992 = vst [vmem:[#allocation4 + $0x48] sm:$0xff] %v10220_v33   ;;  %v3378_v50 = vrot.slane %v3285_v0, 6  ;;  %v3529_v55 = vadd.f32 %v3285_v0, %v9892_v5  ;;  %v3530_v23 = vadd.f32 %v3376_v56, %v2606_v3  ;;  %v6881_v56 = vld [vmem:[%s10812_s2 + $0x48] sm:$0xff] }
 0x373   : > { %4989 = vmatmul.bf16.gmra.mxu2 %v10238_v53  ;;  %v4271_v21 = vsel %vm10214_vm13, %v4184_v19, 0.0  ;;  %v3725_v22 = vadd.f32 %v9798_v38, %v3625_v43  ;;  %v3531_v37 = vadd.f32 %v3377_v58, %v2607_v36  ;;  %4193 = vst [vmem:[#allocation1 + $0x3] ss:$4 sm:$0xff] %v3813_v9  ;;  %v3726_v49 = vadd.f32 %v9219_v44, %v3626_v47 }
 0x374   : > { %v4301_v3 = vpack.c.bf16 %v4271_v21, %v4271_v21  ;;  %v3727_v46 = vadd.f32 %v9222_v15, %v3627_v51  ;;  %v3220_v0 = vadd.f32 %v3219_v63, %v10159_v25  ;;  %v10262_v18 = vadd.f32 %v9225_v1, %v3628_v10  ;;  %5258 = vmatpush.bf16.msrb.mxu2 %v6881_v56 }
 0x375   : > { %v4272_v52 = vsel %vm3902_vm15, %v4189_v45, 0.0  ;;  %v4196_v9 = vld.sshfl [vmem:[#allocation1 + $0x20] sm:$0xff pattern:$0x73625140]  ;;  %v11339_v43 = vrot.slane %v9892_v5, 6  ;;  %v3629_v47 = vmul.f32 %v9777_v30, %v3529_v55  ;;  %v3630_v25 = vmul.f32 %v9200_v4, %v3530_v23  ;;  %v6895_v45 = vld [vmem:[%s10812_s2 + $0xb8] sm:$0xff]  ;;  %v10287_v55 = vpop.f32.mrf.mxu2 }
 0x376   : > { %4331 = vst [vmem:[#allocation4 + $0x50] sm:$0x1] %v4301_v3  ;;  %v10277_v51 = vadd.f32 %v10179_v61, %v3220_v0  ;;  %v3815_v10 = vmax.f32 %v3725_v22, 0.0  ;;  %v3631_v5 = vmul.f32 %v9203_v20, %v3531_v37  ;;  %v6873_v61 = vld [vmem:[%s10812_s2 + $0x8] sm:$0xff]  ;;  %v3816_v23 = vmax.f32 %v3726_v49, 0.0  ;;  %5301 = vmatpush.bf16.msrb.mxu3 %v6895_v45  ;;  %v6894_v22 = vld [vmem:[%s10812_s2 + $0xb0] sm:$0xff] }
 0x377   : > { %v3532_v26 = vadd.f32 %v3378_v50, %v11339_v43  ;;  %v4302_v50 = vpack.c.bf16 %v4272_v52, %v4272_v52  ;;  %v3817_v21 = vmax.f32 %v3727_v46, 0.0  ;;  %v4274_v3 = vsel %vm10268_vm11, %v4196_v9, 0.0  ;;  %v10324_v43 = vpop.f32.mrf.mxu0  ;;  %5209 = vmatpush.bf16.msrb.mxu1 %v6873_v61 }
 0x378   : > { %v3379_v63 = vrot.slane %v10277_v51, 2  ;;  %v3818_v37 = vmax.f32 %v10262_v18, 0.0  ;;  %v10309_v46 = vpack.c.bf16 %v10126_v57, %v10149_v8  ;;  %v3533_v16 = vadd.f32 %v10277_v51, %v11335_v60 }
 0x379   : > { %v7007_v0 = vld [vmem:[#allocation4 + $0x48] sm:$0xf0]  ;;  %v7008_v62 = vld [vmem:[#allocation4 + $0x48] sm:$0xe]  ;;  %v4546_v18 = vshll.u32 %v10220_v33, 16  ;;  %v3632_v52 = vmul.f32 %v9206_v13, %v3532_v26  ;;  %v3729_v57 = vadd.f32 %v9798_v38, %v3629_v47  ;;  %v3730_v8 = vadd.f32 %v9219_v44, %v3630_v25  ;;  %v3221_v56 = vpop.f32.mrf.mxu3 }
 0x37a   : > { %7136 = vmatmul.msk.bf16.gmra.mxu1 %vm10303_vm3, %v10309_v46  ;;  %7139 = vmatmul.msk.bf16.gmra.mxu0 %vm10303_vm3, %v10309_v46  ;;  %v3380_v36 = vrot.slane %v10277_v51, 4  ;;  %v4195_v9 = vld.sshfl [vmem:[#allocation1] sm:$0xff pattern:$0x73625140]  ;;  %4332 = vst [vmem:[#allocation4 + $0x54] sm:$0xf] %v4302_v50  ;;  %v10327_v45 = vadd.f32 %v9222_v15, %v3631_v5  ;;  %v3534_v58 = vadd.f32 %v3379_v63, %v2609_v11 }
 0x37b   : > { %v4273_v26 = vsel %vm10228_vm14, %v4195_v9, 0.0  ;;  %4197 = vst [vmem:[#allocation1] ss:$4 sm:$0xff] %v3815_v10  ;;  %v4304_v47 = vpack.c.bf16 %v4274_v3, %v4274_v3  ;;  %v3222_v25 = vadd.f32 %v3221_v56, %v10222_v29  ;;  %v3381_v50 = vrot.slane %v10277_v51, 6  ;;  %5302 = vmatpush.bf16.msrb.mxu3 %v6894_v22  ;;  %v6893_v5 = vld [vmem:[%s10812_s2 + $0xa8] sm:$0xff] }
 0x37c   : > { %v3633_v34 = vmul.f32 %v9777_v30, %v3533_v16  ;;  %v4303_v61 = vpack.c.bf16 %v4273_v26, %v4273_v26  ;;  %4198 = vst [vmem:[#allocation1 + $0x1] ss:$4 sm:$0xff] %v3816_v23  ;;  %v2614_v11 = vrot.slane %v10199_v7, 6  ;;  %v7009_v63 = vor.u32 %v7008_v62, %v7007_v0 }
 0x37d   : > { %v4367_v19 = vld [vmem:[#allocation4 + $0x50] sm:$0x1]  ;;  %v4544_v10 = vshrl.u32 %v10220_v33, 16  ;;  %4199 = vst [vmem:[#allocation1 + $0x2] ss:$4 sm:$0xff] %v3817_v21  ;;  %v3819_v29 = vmax.f32 %v3729_v57, 0.0  ;;  %v3535_v51 = vadd.f32 %v3380_v36, %v2610_v39  ;;  %v3290_v16 = vadd.f32 %v10247_v40, %v3222_v25 }
 0x37e   : > { %v4457_v48 = vunpack.c.l.b16 %v4367_v19  ;;  %v4548_v3 = vrot.slane %v4546_v18, 1  ;;  %4333 = vst [vmem:[#allocation4 + $0x58] sm:$0xf] %v4303_v61  ;;  %v3732_v23 = vadd.f32 %v9225_v1, %v3632_v52  ;;  %v3820_v22 = vmax.f32 %v3730_v8, 0.0  ;;  %v3158_v19 = vpop.f32.mrf.mxu2  ;;  %v10364_v61 = vld [vmem:[%s10814_s4] ss:$0 sm:$0xff] }
 0x37f   : > { %v3821_v9 = vmax.f32 %v10327_v45, 0.0  ;;  %4200 = vst [vmem:[#allocation1 + $0x3] ss:$4 sm:$0xff] %v3818_v37  ;;  %v11342_v0 = vrot.slane %v11335_v60, 6  ;;  %v3634_v21 = vmul.f32 %v9777_v30, %v3534_v58  ;;  %v3733_v62 = vadd.f32 %v9798_v38, %v3633_v34  ;;  %5303 = vmatpush.bf16.msrb.mxu3 %v6893_v5  ;;  %v6892_v37 = vld [vmem:[%s10812_s2 + $0xa0] sm:$0xff]  ;;  %v3294_v30 = vpop.f32.mrf.mxu0 }
 0x380   : > { %v4467_v56 = vpack.c.b16 %v4457_v48, %v4457_v48  ;;  %v3382_v39 = vrot.slane %v3290_v16, 2  ;;  %4334 = vst [vmem:[#allocation4 + $0x5c] sm:$0x1] %v4304_v47  ;;  %v4649_v40 = vrot.slane %v7009_v63, 1  ;;  %v3842_v52 = vadd.s32 8, %v9312_v24 }
 0x381   : > { %v3536_v33 = vadd.f32 %v3381_v50, %v11342_v0  ;;  %v3635_v8 = vmul.f32 %v9200_v4, %v3535_v51  ;;  %v4549_v60 = vor.u32 %v4548_v3, %v4544_v10  ;;  %v3383_v36 = vrot.slane %v3290_v16, 4  ;;  %4201 = vst [vmem:[#allocation1 + $0x20] ss:$4 sm:$0xff] %v3819_v29  ;;  %v3224_v47 = vpop.f32.mrf.mxu3  ;;  %v7141_v25 = vld [vmem:[#allocation4 + $0x54] sm:$0xe] }
 0x382   : > { %v4650_v18 = vrot.slane %v4467_v56, 1  ;;  %v4551_v57 = vshll.u32 %v4467_v56, 16  ;;  %v3384_v45 = vrot.slane %v3290_v16, 6  ;;  %v3822_v38 = vmax.f32 %v3732_v23, 0.0  ;;  %4202 = vst [vmem:[#allocation1 + $0x21] ss:$4 sm:$0xff] %v3820_v22 }
 0x383   : > { %v3537_v26 = vadd.f32 %v3290_v16, %v10199_v7  ;;  %v3636_v50 = vmul.f32 %v9203_v20, %v3536_v33  ;;  %v10367_v5 = vadd.f32 %v10364_v61, %v3634_v21  ;;  %v3823_v48 = vmax.f32 %v3733_v62, 0.0  ;;  %4203 = vst [vmem:[#allocation1 + $0x22] ss:$4 sm:$0xff] %v3821_v9  ;;  %5304 = vmatpush.bf16.msrb.mxu3 %v6892_v37  ;;  %v6891_v23 = vld [vmem:[%s10812_s2 + $0x98] sm:$0xff]  ;;  %v6872_v9 = vld [vmem:[%s10812_s2] sm:$0xff] }
 0x384   : > { %v10356_v34 = vsel %vm11343_vm4, %v4649_v40, %v4650_v18  ;;  %v4553_v58 = vrot.slane %v4551_v57, 1  ;;  %v11344_v63 = vrot.slane %v10199_v7, 2  ;;  %v3225_v16 = vadd.f32 %v3224_v47, %v10287_v55  ;;  %v6880_v55 = vld [vmem:[%s10812_s2 + $0x40] sm:$0xff]  ;;  %4204 = vst [vmem:[#allocation1 + $0x23] ss:$4 sm:$0xff] %v3822_v38  ;;  %v11347_v40 = vld [vmem:[#allocation77_spill] sm:$0xff]  ;;  %5210 = vmatpush.bf16.msrb.mxu1 %v6872_v9 }
 0x385   : > { %5043 = vmatmul.bf16.gmra.mxu3 %v10356_v34  ;;  %v10374_v51 = vld [vmem:[#allocation4 + $0x54] sm:$0xff]   ;;  %vm3856_vm7 = vcmp.ge.s32.totalorder %v3842_v52, 0  ;;  %vm3866_vm1 = vcmp.lt.s32.totalorder %v3842_v52, 16  ;;  %v3735_v22 = vadd.f32 %v9219_v44, %v3635_v8  ;;  %v11346_v56 = vrot.slane %v10199_v7, 4  ;;  %5259 = vmatpush.bf16.msrb.mxu2 %v6880_v55 }
 0x386   : > { %v3538_v10 = vadd.f32 %v3382_v39, %v11344_v63  ;;  %v10372_v29 = vsel %vm11345_vm6, %v4549_v60, %v4553_v58  ;;  %v7140_v3 = vld [vmem:[#allocation4 + $0x54] sm:$0xf0]  ;;  %v3540_v0 = vadd.f32 %v3384_v45, %v2614_v11  ;;  %v3637_v21 = vmul.f32 %v9206_v13, %v3537_v26  ;;  %vm10401_vm2 = vmand %vm3856_vm7, %vm3866_vm1 }
 0x387   : > { %4994 = vmatmul.bf16.gmra.mxu2 %v10372_v29  ;;  %v3539_v19 = vadd.f32 %v3383_v36, %v11346_v56  ;;  %v10384_v33 = vld.sshfl [vmem:[#allocation1] sm:$0xff pattern:$0x73625140]  ;;  %v3293_v39 = vadd.f32 %v10324_v43, %v3225_v16  ;;  %v2615_v7 = vrot.slane %v11347_v40, 2  ;;  %v3736_v11 = vadd.f32 %v9222_v15, %v3636_v50  ;;  %5305 = vmatpush.bf16.msrb.mxu3 %v6891_v23  ;;  %v6890_v43 = vld [vmem:[%s10812_s2 + $0x90] sm:$0xff]  ;;  %vm10421_vm8 = vmand %vm10401_vm2, %vm3878_vm5 }
 0x388   : > { %v4368_v62 = vld [vmem:[#allocation4 + $0x5c] sm:$0x1]  ;;  %v7109_v18 = vld [vmem:[%s10813_s3] ss:$0 sm:$0xff]  ;;  %4207 = vst [vmem:[#allocation1] ss:$4 sm:$0xff] %v3823_v48  ;;  %v7142_v8 = vor.u32 %v7141_v25, %v7140_v3  ;;  %v3640_v38 = vmul.f32 %v9203_v20, %v3540_v0  ;;  %v3737_v52 = vadd.f32 %v9225_v1, %v3637_v21  ;;  %vm10437_vm9 = vmand %vm10401_vm2, %vm3913_vm10 }
 0x389   : > { %v3638_v57 = vmul.f32 %v7109_v18, %v3538_v10  ;;  %v4458_v37 = vunpack.c.l.b16 %v4368_v62  ;;  %v3385_v60 = vrot.slane %v3293_v39, 2  ;;  %v3824_v45 = vmax.f32 %v10367_v5, 0.0  ;;  %v3226_v50 = vpop.f32.mrf.mxu3  ;;  %vm7143_vm4 = vmpackc.low %vm10401_vm2, %vm10421_vm8 }
 0x38a   : > { %v3639_v30 = vmul.f32 %v9200_v4, %v3539_v19  ;;  %v3541_v58 = vadd.f32 %v3293_v39, %v11347_v40  ;;  %v3825_v26 = vmax.f32 %v3735_v22, 0.0  ;;  %4950 = vmatmul.bf16.gmra.mxu1 %v10374_v51  ;;  %5576 = vmatmul.bf16.gmra.mxu0 %v10374_v51  ;;  %v3826_v48 = vmax.f32 %v3736_v11, 0.0  ;;  %vm11357_vm6 = vmmov %vm11354_vm12 }
 0x38b   : > { %v4468_v47 = vpack.c.b16 %v4458_v37, %v4458_v37  ;;  %v3542_v25 = vadd.f32 %v3385_v60, %v2615_v7  ;;  %v4558_v5 = vshll.u32 %v10374_v51, 16  ;;  %v3843_v20 = vadd.s32 9, %v9312_v24  ;;  %5306 = vmatpush.bf16.msrb.mxu3 %v6890_v43  ;;  %v4206_v55 = vld.sshfl [vmem:[#allocation1 + $0x20] sm:$0xff pattern:$0x73625140]  ;;  %vm11358_vm7 = vmmov %vm11336_vm0 }
 0x38c   : > { %v3641_v63 = vmul.f32 %v9206_v13, %v3541_v58  ;;  %v3738_v10 = vadd.f32 %v10364_v61, %v3638_v57  ;;  %v4652_v3 = vrot.slane %v7142_v8, 1  ;;  %v6889_v13 = vld [vmem:[%s10812_s2 + $0x88] sm:$0xff]  ;;  %v3739_v22 = vadd.f32 %v9219_v44, %v3639_v30  ;;  %4209 = vst [vmem:[#allocation1 + $0x20] ss:$4 sm:$0xff] %v3824_v45  ;;  %v6888_v8 = vld [vmem:[%s10812_s2 + $0x80] sm:$0xff]  ;;  %vm11360_vm1 = vmmov %vm11336_vm0 }
 0x38d   : > { %v4653_v16 = vrot.slane %v4468_v47, 1  ;;  %v4563_v23 = vshll.u32 %v4468_v47, 16  ;;  %v3740_v56 = vadd.f32 %v9222_v15, %v3640_v38  ;;  %v4556_v19 = vshrl.u32 %v10374_v51, 16  ;;  %4210 = vst [vmem:[#allocation1 + $0x21] ss:$4 sm:$0xff] %v3825_v26 }
 0x38e   : > { %v4560_v0 = vrot.slane %v4558_v5, 1  ;;  %v3827_v9 = vmax.f32 %v3737_v52, 0.0  ;;  %v3642_v21 = vmul.f32 %v7109_v18, %v3542_v25  ;;  %v4275_v44 = vsel %vm10421_vm8, %v10384_v33, 0.0  ;;  %4211 = vst [vmem:[#allocation1 + $0x22] ss:$4 sm:$0xff] %v3826_v48 }
 0x38f   : > { %v4276_v15 = vsel %vm10401_vm2, %v4206_v55, 0.0  ;;  %v3741_v62 = vadd.f32 %v9225_v1, %v3641_v63  ;;  %v4208_v7 = vld.sshfl [vmem:[#allocation1] sm:$0xff pattern:$0x73625140]  ;;  %v3828_v11 = vmax.f32 %v3738_v10, 0.0  ;;  %v10450_v57 = vsel %vm11354_vm12, %v4652_v3, %v4653_v16  ;;  %5307 = vmatpush.bf16.msrb.mxu3 %v6889_v13  ;;  %vm11362_vm2 = vmmov %vm11357_vm6 }
 0x390   : > { %v4561_v39 = vor.u32 %v4560_v0, %v4556_v19  ;;  %v10447_v40 = vpack.c.bf16 %v4276_v15, %v4275_v44  ;;  %v4565_v18 = vrot.slane %v4563_v23, 1  ;;  %v4277_v37 = vsel %vm10437_vm9, %v4208_v7, 0.0  ;;  %4212 = vst [vmem:[#allocation1 + $0x23] ss:$4 sm:$0xff] %v3827_v9  ;;  %v6942_v7 = vld [vmem:[%s10812_s2 + $0x230] sm:$0xff] }
 0x391   : > { %v3829_v1 = vmax.f32 %v3739_v22, 0.0  ;;  %v4307_v60 = vpack.c.bf16 %v4277_v37, %v4277_v37  ;;  %vm3857_vm13 = vcmp.ge.s32.totalorder %v3843_v20, 0  ;;  %vm3867_vm14 = vcmp.lt.s32.totalorder %v3843_v20, 16  ;;  %4214 = vst [vmem:[#allocation1] ss:$4 sm:$0xff] %v3828_v11  ;;  %v4921_v63 = vpop.f32.mrf.mxu1  ;;  %v6935_v20 = vld [vmem:[%s10812_s2 + $0x1f8] sm:$0xff] }
 0x392   : > { %6993 = vst [vmem:[#allocation4 + $0x60] sm:$0xff] %v10447_v40   ;;  %v3830_v43 = vmax.f32 %v3740_v56, 0.0  ;;  %v3742_v45 = vadd.f32 %v10364_v61, %v3642_v21  ;;  %v10460_v30 = vsel %vm11336_vm0, %v4561_v39, %v4565_v18  ;;  %v3831_v38 = vmax.f32 %v3741_v62, 0.0  ;;  %vm10463_vm15 = vmand %vm3857_vm13, %vm3867_vm14  ;;  %v6943_v61 = vld [vmem:[%s10812_s2 + $0x238] sm:$0xff]  ;;  %5592 = vmatpush.bf16.msra.mxu1 %v6935_v20  ;;  %v4361_v21 = vld [vmem:[#allocation4 + $0x8] sm:$0x1] }
 0x393   : > { %4337 = vst [vmem:[#allocation4 + $0x68] sm:$0x1] %v4307_v60  ;;  %5308 = vmatpush.bf16.msrb.mxu3 %v6888_v8  ;;  %vm3908_vm11 = vmand %vm10463_vm15, %vm3878_vm5  ;;  %5641 = vmatpush.bf16.msra.mxu2 %v6943_v61  ;;  %v4570_v25 = vshll.u32 %v10447_v40, 16  ;;  %v7144_v48 = vpack.c.bf16 %v4206_v55, %v10384_v33  ;;  %v4568_v36 = vshrl.u32 %v10447_v40, 16  ;;  %v4451_v40 = vunpack.c.l.b16 %v4361_v21  ;;  %v6998_v60 = vld [vmem:[#allocation4] sm:$0xf0] }
 0x394   : > { %4215 = vst [vmem:[#allocation1 + $0x1] ss:$4 sm:$0xff] %v3829_v1  ;;  %v3832_v26 = vmax.f32 %v3742_v45, 0.0  ;;  %vm3943_vm5 = vmand %vm10463_vm15, %vm3913_vm10  ;;  %v6934_v61 = vld [vmem:[%s10812_s2 + $0x1f0] sm:$0xff]  ;;  %v6940_v21 = vld [vmem:[%s10812_s2 + $0x220] sm:$0xff] }
 0x395   : > { %5048 = vmatmul.bf16.gmra.mxu3 %v10450_v57  ;;  %4216 = vst [vmem:[#allocation1 + $0x2] ss:$4 sm:$0xff] %v3830_v43  ;;  %v4572_v4 = vrot.slane %v4570_v25, 1  ;;  %v4461_v18 = vpack.c.b16 %v4451_v40, %v4451_v40  ;;  %v6999_v43 = vld [vmem:[#allocation4] sm:$0xe]  ;;  %vm11359_vm10 = vmmov %vm11357_vm6  ;;  %v6932_v40 = vld [vmem:[%s10812_s2 + $0x1e0] sm:$0xff] }
 0x396   : > { %4217 = vst [vmem:[#allocation1 + $0x3] ss:$4 sm:$0xff] %v3831_v38  ;;  %v7110_v38 = vld [vmem:[#allocation4] sm:$0xff]  ;;  %5593 = vmatpush.bf16.msra.mxu1 %v6934_v61 }
 0x397   : > { %4999 = vmatmul.bf16.gmra.mxu2 %v10460_v30  ;;  %v4213_v50 = vld.sshfl [vmem:[#allocation1 + $0x20] sm:$0xff pattern:$0x73625140]  ;;  %v4573_v55 = vor.u32 %v4572_v4, %v4568_v36  ;;  %v4474_v58 = vshll.u32 %v7110_v38, 16  ;;  %v6941_v36 = vld [vmem:[%s10812_s2 + $0x228] sm:$0xff] }
 0x398   : > { %v4278_v5 = vsel %vm3908_vm11, %v4213_v50, 0.0  ;;  %4218 = vst [vmem:[#allocation1 + $0x20] ss:$4 sm:$0xff] %v3832_v26  ;;  %5642 = vmatpush.bf16.msra.mxu2 %v6942_v7  ;;  %v7000_v26 = vor.u32 %v6999_v43, %v6998_v60 }
 0x399   : > { %v7010_v52 = vld [vmem:[#allocation4 + $0x60] sm:$0xf0]  ;;  %v7011_v47 = vld [vmem:[#allocation4 + $0x60] sm:$0xe]  ;;  %v4308_v16 = vpack.c.bf16 %v4278_v5, %v4278_v5  ;;  %v10498_v31 = vpop.f32.mrf.mxu1  ;;  %v4476_v25 = vrot.slane %v4474_v58, 1 }
 0x39a   : > { %7145 = vmatmul.msk.bf16.gmra.mxu1 %vm7143_vm4, %v7144_v48  ;;  %7148 = vmatmul.msk.bf16.gmra.mxu0 %vm7143_vm4, %v7144_v48  ;;  %v4369_v12 = vld [vmem:[#allocation4 + $0x68] sm:$0x1]  ;;  %v7012_v3 = vor.u32 %v7011_v47, %v7010_v52  ;;  %v4479_v52 = vshll.u32 %v4461_v18, 16  ;;  %v4632_v48 = vrot.slane %v4461_v18, 1  ;;  %v4631_v5 = vrot.slane %v7000_v26, 1 }
 0x39b   : > { %v4459_v10 = vunpack.c.l.b16 %v4369_v12  ;;  %4338 = vst [vmem:[#allocation4 + $0x6c] sm:$0xf] %v4308_v16  ;;  %v4472_v12 = vshrl.u32 %v7110_v38, 16 }
 0x39c   : > { %v4655_v13 = vrot.slane %v7012_v3, 1  ;;  %v4633_v3 = vsel %vm11359_vm10, %v4631_v5, %v4632_v48  ;;  %5643 = vmatpush.bf16.msra.mxu2 %v6941_v36 }
 0x39d   : > { %v4469_v23 = vpack.c.b16 %v4459_v10, %v4459_v10  ;;  %v4219_v33 = vld.sshfl [vmem:[#allocation1] sm:$0xff pattern:$0x73625140]  ;;  %v4477_v10 = vor.u32 %v4476_v25, %v4472_v12  ;;  %v6938_v12 = vld [vmem:[%s10812_s2 + $0x210] sm:$0xff] }
 0x39e   : > { %v4279_v19 = vsel %vm10463_vm15, %v4219_v33, 0.0  ;;  %v6933_v33 = vld [vmem:[%s10812_s2 + $0x1e8] sm:$0xff] }
 0x39f   : > { %v4656_v22 = vrot.slane %v4469_v23, 1  ;;  %v4575_v56 = vshll.u32 %v4469_v23, 16  ;;  %v4309_v0 = vpack.c.bf16 %v4279_v19, %v4279_v19  ;;  %v4220_v44 = vld.sshfl [vmem:[#allocation1 + $0x20] sm:$0xff pattern:$0x73625140]  ;;  %5594 = vmatpush.bf16.msra.mxu1 %v6933_v33 }
 0x3a0   : > { %v4280_v15 = vsel %vm3943_vm5, %v4220_v44, 0.0  ;;  %5644 = vmatpush.bf16.msra.mxu2 %v6940_v21 }
 0x3a1   : > { %v10492_v24 = vsel %vm11357_vm6, %v4655_v13, %v4656_v22  ;;  %v4577_v9 = vrot.slane %v4575_v56, 1  ;;  %4339 = vst [vmem:[#allocation4 + $0x70] sm:$0xf] %v4309_v0  ;;  %v4310_v39 = vpack.c.bf16 %v4280_v15, %v4280_v15  ;;  %v4926_v50 = vpop.f32.mrf.mxu1 }
 0x3a3   : > { %v10496_v62 = vsel %vm11358_vm7, %v4573_v55, %v4577_v9  ;;  %4340 = vst [vmem:[#allocation4 + $0x74] sm:$0x1] %v4310_v39  ;;  %v7111_v39 = vld [vmem:[#allocation4 + $0x18] sm:$0xff]  ;;  %5595 = vmatpush.bf16.msra.mxu1 %v6932_v40 }
 0x3a4   : > { %v5019_v11 = vpop.f32.mrf.mxu3 }
 0x3a5   : > { %5053 = vmatmul.bf16.gmra.mxu3 %v10492_v24 }
 0x3a7   : > { %5004 = vmatmul.bf16.gmra.mxu2 %v10496_v62 }
 0x3a8   : > { %v4970_v37 = vpop.f32.mrf.mxu2  ;;  %v10504_v8 = vld [vmem:[#allocation4 + $0x6c] sm:$0xff]  }
 0x3a9   : > { %v10506_v1 = vld [vmem:[#allocation4 + $0x6c] sm:$0xf0]  ;;  %v4971_v45 = vadd.f32 %v4970_v37, %v4921_v63  ;;  %v4481_v63 = vrot.slane %v4479_v52, 1  ;;  %v4928_v23 = vpop.f32.mrf.mxu1 }
 0x3aa   : > { %5211 = vmatmul.bf16.vlgmr.msrb.gmra.mxu1 %v7110_v38  ;;  %5586 = vmatmul.bf16.gmra.mxu0 %v10504_v8  ;;  %v6939_v37 = vld [vmem:[%s10812_s2 + $0x218] sm:$0xff] }
 0x3ab   : > { %v10511_v47 = vadd.f32 %v5019_v11, %v4971_v45  ;;  %v4482_v4 = vsel %vm11360_vm1, %v4477_v10, %v4481_v63  ;;  %5645 = vmatpush.bf16.msra.mxu2 %v6939_v37  ;;  %v6931_v38 = vld [vmem:[%s10812_s2 + $0x1d8] sm:$0xff] }
 0x3ac   : > { %v10514_v20 = vpop.f32.mrf.mxu3  ;;  %5596 = vmatpush.bf16.msra.mxu1 %v6931_v38 }
 0x3af   : > { %5646 = vmatpush.bf16.msra.mxu2 %v6938_v12 }
 0x3b0   : > { %v10517_v16 = vpop.f32.mrf.mxu2 }
 0x3b5   : > { %5309 = vmatmul.bf16.vlgmr.msrb.gmra.mxu3 %v4633_v3 }
 0x3b7   : > { %5260 = vmatmul.bf16.vlgmr.msrb.gmra.mxu2 %v4482_v4  ;;  %v6930_v4 = vld [vmem:[%s10812_s2 + $0x1d0] sm:$0xff] }
 0x3b8   : > { %5597 = vmatpush.bf16.msra.mxu1 %v6930_v4 }
 0x3b9   : > { %v5024_v13 = vpop.f32.mrf.mxu3 }
 0x3ba   : > { %5216 = vmatmul.bf16.gmra.mxu1 %v9610_v28 }
 0x3bc   : > { %v4975_v22 = vpop.f32.mrf.mxu2  ;;  %v4931_v19 = vpop.f32.mrf.mxu1 }
 0x3bd   : > { %v4976_v56 = vadd.f32 %v4975_v22, %v4926_v50 }
 0x3bf   : > { %v10527_v0 = vadd.f32 %v5024_v13, %v4976_v56 }
 0x3c1   : > { %v5026_v55 = vpop.f32.mrf.mxu3 }
 0x3c4   : > { %v4977_v9 = vpop.f32.mrf.mxu2  ;;  %v4933_v15 = vpop.f32.mrf.mxu1 }
 0x3c5   : > { %5314 = vmatmul.bf16.gmra.mxu3 %v9697_v6  ;;  %v4978_v44 = vadd.f32 %v4977_v9, %v4928_v23 }
 0x3c7   : > { %5265 = vmatmul.bf16.gmra.mxu2 %v9730_v32  ;;  %v10534_v28 = vadd.f32 %v5026_v55, %v4978_v44  ;;  %v6929_v44 = vld [vmem:[%s10812_s2 + $0x1c8] sm:$0xff] }
 0x3c8   : > { %5598 = vmatpush.bf16.msra.mxu1 %v6929_v44 }
 0x3ca   : > { %5221 = vmatmul.bf16.gmra.mxu1 %v7111_v39  ;;  %v5029_v6 = vpop.f32.mrf.mxu3 }
 0x3ce   : > { %v4980_v7 = vpop.f32.mrf.mxu2 }
 0x3cf   : > { %v4981_v11 = vadd.f32 %v4980_v7, %v4931_v19  ;;  %v6937_v19 = vld [vmem:[%s10812_s2 + $0x208] sm:$0xff] }
 0x3d0   : > { %5647 = vmatpush.bf16.msra.mxu2 %v6937_v19 }
 0x3d1   : > { %v10539_v32 = vadd.f32 %v5029_v6, %v4981_v11  ;;  %v6928_v11 = vld [vmem:[%s10812_s2 + $0x1c0] sm:$0xff] }
 0x3d2   : > { %v4936_v18 = vpop.f32.mrf.mxu1  ;;  %v5031_v45 = vpop.f32.mrf.mxu3  ;;  %5599 = vmatpush.bf16.msra.mxu1 %v6928_v11 }
 0x3d5   : > { %5319 = vmatmul.bf16.gmra.mxu3 %v9847_v41 }
 0x3d6   : > { %v4982_v60 = vpop.f32.mrf.mxu2 }
 0x3d7   : > { %5270 = vmatmul.bf16.gmra.mxu2 %v9863_v17  ;;  %v4983_v43 = vadd.f32 %v4982_v60, %v4933_v15 }
 0x3d9   : > { %v10550_v58 = vadd.f32 %v5031_v45, %v4983_v43 }
 0x3da   : > { %5226 = vmatmul.bf16.gmra.mxu1 %v9906_v14  ;;  %v4938_v61 = vpop.f32.mrf.mxu1  ;;  %v7112_v14 = vld [vmem:[#allocation4 + $0x30] sm:$0xff] }
 0x3e2   : > { %v5034_v26 = vpop.f32.mrf.mxu3  ;;  %v4941_v50 = vpop.f32.mrf.mxu1 }
 0x3e4   : > { %v4985_v52 = vpop.f32.mrf.mxu2 }
 0x3e5   : > { %5324 = vmatmul.bf16.gmra.mxu3 %v9965_v35  ;;  %v4986_v25 = vadd.f32 %v4985_v52, %v4936_v18 }
 0x3e7   : > { %5275 = vmatmul.bf16.gmra.mxu2 %v10006_v59  ;;  %v10554_v48 = vadd.f32 %v5034_v26, %v4986_v25 }
 0x3ea   : > { %v5036_v5 = vpop.f32.mrf.mxu3  ;;  %5231 = vmatmul.bf16.gmra.mxu1 %v7112_v14  ;;  %v4943_v3 = vpop.f32.mrf.mxu1 }
 0x3ec   : > { %v4987_v63 = vpop.f32.mrf.mxu2 }
 0x3ed   : > { %v4988_v10 = vadd.f32 %v4987_v63, %v4938_v61 }
 0x3ef   : > { %v10562_v23 = vadd.f32 %v5036_v5, %v4988_v10 }
 0x3f2   : > { %v5039_v36 = vpop.f32.mrf.mxu3 }
 0x3f5   : > { %5329 = vmatmul.bf16.gmra.mxu3 %v10111_v27 }
 0x3f6   : > { %v4990_v33 = vpop.f32.mrf.mxu2 }
 0x3f7   : > { %v4991_v13 = vadd.f32 %v4990_v33, %v4941_v50  ;;  %v4946_v22 = vpop.f32.mrf.mxu1  ;;  %5280 = vmatmul.bf16.gmra.mxu2 %v10124_v2 }
 0x3f9   : > { %v10566_v56 = vadd.f32 %v5039_v36, %v4991_v13 }
 0x3fa   : > { %5236 = vmatmul.bf16.gmra.mxu1 %v10141_v42  ;;  %v5041_v55 = vpop.f32.mrf.mxu3  ;;  %v6936_v42 = vld [vmem:[%s10812_s2 + $0x200] sm:$0xff] }
 0x3fb   : > { %5648 = vmatpush.bf16.msra.mxu2 %v6936_v42 }
 0x3fe   : > { %v4992_v9 = vpop.f32.mrf.mxu2 }
 0x3ff   : > { %v4993_v21 = vadd.f32 %v4992_v9, %v4943_v3  ;;  %v4948_v15 = vpop.f32.mrf.mxu1 }
 0x401   : > { %v10575_v39 = vadd.f32 %v5041_v55, %v4993_v21 }
 0x405   : > { %5334 = vmatmul.bf16.gmra.mxu3 %v10202_v54 }
 0x407   : > { %5285 = vmatmul.bf16.gmra.mxu2 %v10238_v53  ;;  %v4951_v6 = vpop.f32.mrf.mxu1 }
 0x408   : > { %v5044_v40 = vpop.f32.mrf.mxu3 }
 0x40a   : > { %v4995_v7 = vpop.f32.mrf.mxu2  ;;  %7151 = vmatmul.msk.bf16.gmra.mxu1 %vm10303_vm3, %v10309_v46  ;;  %vm11361_vm3 = vmmov %vm11336_vm0 }
 0x40b   : > { %v4996_v18 = vadd.f32 %v4995_v7, %v4946_v22 }
 0x40d   : > { %v10588_v37 = vadd.f32 %v5044_v40, %v4996_v18 }
 0x40f   : > { %v4953_v43 = vpop.f32.mrf.mxu1 }
 0x410   : > { %v5046_v60 = vpop.f32.mrf.mxu3 }
 0x412   : > { %v4997_v45 = vpop.f32.mrf.mxu2 }
 0x413   : > { %v4998_v38 = vadd.f32 %v4997_v45, %v4948_v15 }
 0x415   : > { %5339 = vmatmul.bf16.gmra.mxu3 %v10356_v34  ;;  %v10591_v61 = vadd.f32 %v5046_v60, %v4998_v38 }
 0x417   : > { %5290 = vmatmul.bf16.gmra.mxu2 %v10372_v29  ;;  %v4956_v52 = vpop.f32.mrf.mxu1 }
 0x418   : > { %v5049_v26 = vpop.f32.mrf.mxu3 }
 0x41a   : > { %v5000_v25 = vpop.f32.mrf.mxu2  ;;  %5246 = vmatmul.bf16.gmra.mxu1 %v10374_v51  ;;  %v4973_v51 = vadd.f32 %v10517_v16, %v10498_v31 }
 0x41b   : > { %v5001_v50 = vadd.f32 %v5000_v25, %v4951_v6 }
 0x41c   : > { %v5022_v22 = vadd.f32 %v10514_v20, %v4973_v51 }
 0x41d   : > { %v10595_v49 = vadd.f32 %v5049_v26, %v5001_v50 }
 0x41f   : > { %v4958_v46 = vpop.f32.mrf.mxu1 }
 0x420   : > { %v5051_v12 = vpop.f32.mrf.mxu3 }
 0x422   : > { %v5002_v5 = vpop.f32.mrf.mxu2 }
 0x423   : > { %v5003_v14 = vadd.f32 %v5002_v5, %v4953_v43 }
 0x425   : > { %5344 = vmatmul.bf16.gmra.mxu3 %v10450_v57  ;;  %v10598_v63 = vadd.f32 %v5051_v12, %v5003_v14 }
 0x427   : > { %5295 = vmatmul.bf16.gmra.mxu2 %v10460_v30  ;;  %v5212_v10 = vpop.f32.mrf.mxu1 }
 0x428   : > { %v5054_v3 = vpop.f32.mrf.mxu3  ;;  %v5213_v4 = vadd.f32 %v5212_v10, %v10511_v47 }
 0x42a   : > { %v5005_v36 = vpop.f32.mrf.mxu2  ;;  %5600 = vmatmul.bf16.vlgmr.msra.gmra.mxu1 %v9863_v17 }
 0x42b   : > { %v5006_v33 = vadd.f32 %v5005_v36, %v4956_v52 }
 0x42d   : > { %v10605_v13 = vadd.f32 %v5054_v3, %v5006_v33 }
 0x42f   : > { %v5214_v19 = vpop.f32.mrf.mxu1 }
 0x430   : > { %v5215_v55 = vadd.f32 %v5214_v19, %v5022_v22  ;;  %v5056_v44 = vpop.f32.mrf.mxu3 }
 0x432   : > { %v5007_v9 = vpop.f32.mrf.mxu2 }
 0x433   : > { %v5008_v21 = vadd.f32 %v5007_v9, %v4958_v46 }
 0x435   : > { %v10608_v15 = vadd.f32 %v5056_v44, %v5008_v21  ;;  %v4580_v21 = vshrl.u32 %v10504_v8, 16 }
 0x437   : > { %5649 = vmatmul.bf16.vlgmr.msra.gmra.mxu2 %v9847_v41  ;;  %v5217_v47 = vpop.f32.mrf.mxu1 }
 0x438   : > { %v5218_v42 = vadd.f32 %v5217_v47, %v10527_v0 }
 0x43a   : > { %v5261_v40 = vpop.f32.mrf.mxu2  ;;  %5605 = vmatmul.bf16.gmra.mxu1 %v10006_v59 }
 0x43b   : > { %v10612_v31 = vadd.f32 %v5261_v40, %v5213_v4 }
 0x43f   : > { %v5219_v17 = vpop.f32.mrf.mxu1 }
 0x440   : > { %v5220_v20 = vadd.f32 %v5219_v17, %v10534_v28 }
 0x442   : > { %v5263_v16 = vpop.f32.mrf.mxu2 }
 0x443   : > { %v10616_v6 = vadd.f32 %v5263_v16, %v5215_v55 }
 0x447   : > { %5654 = vmatmul.bf16.gmra.mxu2 %v9965_v35  ;;  %v5222_v7 = vpop.f32.mrf.mxu1 }
 0x448   : > { %v5223_v11 = vadd.f32 %v5222_v7, %v10539_v32  ;;  %v5552_v7 = vpop.f32.mrf.mxu0 }
 0x44a   : > { %v5266_v41 = vpop.f32.mrf.mxu2  ;;  %5610 = vmatmul.bf16.gmra.mxu1 %v10124_v2 }
 0x44b   : > { %v10620_v18 = vadd.f32 %v5266_v41, %v5218_v42 }
 0x44f   : > { %v5224_v0 = vpop.f32.mrf.mxu1 }
 0x450   : > { %v5225_v60 = vadd.f32 %v5224_v0, %v10550_v58 }
 0x452   : > { %v5268_v59 = vpop.f32.mrf.mxu2 }
 0x453   : > { %v10624_v43 = vadd.f32 %v5268_v59, %v5220_v20  ;;  %v5310_v20 = vpop.f32.mrf.mxu3 }
 0x457   : > { %5659 = vmatmul.bf16.gmra.mxu2 %v10111_v27  ;;  %v5227_v28 = vpop.f32.mrf.mxu1 }
 0x458   : > { %v5228_v45 = vadd.f32 %v5227_v28, %v10554_v48 }
 0x45a   : > { %v5271_v35 = vpop.f32.mrf.mxu2  ;;  %5615 = vmatmul.bf16.gmra.mxu1 %v10238_v53 }
 0x45b   : > { %v10628_v38 = vadd.f32 %v5271_v35, %v5223_v11  ;;  %v5554_v35 = vpop.f32.mrf.mxu0 }
 0x45f   : > { %v5229_v32 = vpop.f32.mrf.mxu1 }
 0x460   : > { %v5230_v26 = vadd.f32 %v5229_v32, %v10562_v23 }
 0x462   : > { %v5273_v2 = vpop.f32.mrf.mxu2 }
 0x463   : > { %v10632_v52 = vadd.f32 %v5273_v2, %v5225_v60 }
 0x467   : > { %5664 = vmatmul.bf16.gmra.mxu2 %v10202_v54  ;;  %v5232_v58 = vpop.f32.mrf.mxu1 }
 0x468   : > { %v5233_v25 = vadd.f32 %v5232_v58, %v10566_v56  ;;  %v5557_v58 = vpop.f32.mrf.mxu0 }
 0x46a   : > { %v5276_v27 = vpop.f32.mrf.mxu2  ;;  %5620 = vmatmul.bf16.gmra.mxu1 %v10372_v29 }
 0x46b   : > { %v10636_v50 = vadd.f32 %v5276_v27, %v5228_v45 }
 0x46f   : > { %v5234_v48 = vpop.f32.mrf.mxu1 }
 0x470   : > { %v5235_v46 = vadd.f32 %v5234_v48, %v10575_v39  ;;  %v4370_v39 = vld [vmem:[#allocation4 + $0x74] sm:$0x1] }
 0x472   : > { %v5278_v53 = vpop.f32.mrf.mxu2 }
 0x473   : > { %v10640_v12 = vadd.f32 %v5278_v53, %v5230_v26  ;;  %v5311_v53 = vadd.f32 %v5310_v20, %v10612_v31 }
 0x477   : > { %5669 = vmatmul.bf16.gmra.mxu2 %v10356_v34  ;;  %v5237_v23 = vpop.f32.mrf.mxu1 }
 0x478   : > { %v5238_v5 = vadd.f32 %v5237_v23, %v10588_v37  ;;  %v4460_v37 = vunpack.c.l.b16 %v4370_v39  ;;  %v6775_v39 = vld [vmem:[%s7421_s23 + $0x32] sm:$0xff] }
 0x47a   : > { %v5281_v54 = vpop.f32.mrf.mxu2  ;;  %5625 = vmatmul.bf16.gmra.mxu1 %v10460_v30  ;;  %v4582_v30 = vshll.u32 %v10504_v8, 16  ;;  %v4470_v51 = vpack.c.b16 %v4460_v37, %v4460_v37 }
 0x47b   : > { %v10644_v14 = vadd.f32 %v5281_v54, %v5233_v25  ;;  %v5559_v54 = vpop.f32.mrf.mxu0 }
 0x47c   : > { %v4587_v9 = vshll.u32 %v4470_v51, 16  ;;  %v4659_v41 = vrot.slane %v4470_v51, 1 }
 0x47e   : > { %v4589_v44 = vrot.slane %v4587_v9, 1 }
 0x47f   : > { %v5239_v56 = vpop.f32.mrf.mxu1 }
 0x480   : > { %v5240_v10 = vadd.f32 %v5239_v56, %v10591_v61 }
 0x482   : > { %v5283_v29 = vpop.f32.mrf.mxu2 }
 0x483   : > { %v10648_v3 = vadd.f32 %v5283_v29, %v5235_v46 }
 0x487   : > { %5674 = vmatmul.bf16.gmra.mxu2 %v10450_v57  ;;  %v5242_v4 = vpop.f32.mrf.mxu1  ;;  %v4584_v57 = vrot.slane %v4582_v30, 1 }
 0x488   : > { %v5243_v34 = vadd.f32 %v5242_v4, %v10595_v49 }
 0x489   : > { %v4585_v49 = vor.u32 %v4584_v57, %v4580_v21  ;;  %v5562_v57 = vpop.f32.mrf.mxu0  ;;  %v6776_v21 = vld [vmem:[%s7421_s23 + $0x3a] sm:$0xff] }
 0x48a   : > { %v5286_v36 = vpop.f32.mrf.mxu2  ;;  %5630 = vmatmul.bf16.gmra.mxu1 %v10496_v62 }
 0x48b   : > { %v10652_v33 = vadd.f32 %v5286_v36, %v5238_v5  ;;  %v4590_v17 = vsel %vm11361_vm3, %v4585_v49, %v4589_v44  ;;  %v10678_v5 = vld [vmem:[%s10815_s5] ss:$0 sm:$0xff] }
 0x48f   : > { %v5244_v22 = vpop.f32.mrf.mxu1 }
 0x490   : > { %v5245_v61 = vadd.f32 %v5244_v22, %v10598_v63  ;;  %v7153_v63 = vld [vmem:[#allocation4 + $0x6c] sm:$0xe] }
 0x491   : > { %v7154_v16 = vor.u32 %v7153_v63, %v10506_v1 }
 0x492   : > { %v5288_v19 = vpop.f32.mrf.mxu2 }
 0x493   : > { %v10657_v55 = vadd.f32 %v5288_v19, %v5240_v10  ;;  %v4658_v60 = vrot.slane %v7154_v16, 1  ;;  %v10683_v10 = vld [vmem:[%s10816_s6] ss:$0 sm:$0xff] }
 0x495   : > { %v4660_v59 = vsel %vm11362_vm2, %v4658_v60, %v4659_v41 }
 0x497   : > { %5679 = vmatmul.bf16.gmra.mxu2 %v10492_v24  ;;  %v5247_v47 = vpop.f32.mrf.mxu1 }
 0x498   : > { %v5248_v62 = vadd.f32 %v5247_v47, %v10605_v13  ;;  %v5312_v13 = vpop.f32.mrf.mxu3 }
 0x499   : > { %v5313_v37 = vadd.f32 %v5312_v13, %v10616_v6 }
 0x49a   : > { %v5291_v42 = vpop.f32.mrf.mxu2  ;;  %5635 = vmatmul.bf16.gmra.mxu1 %v4590_v17 }
 0x49b   : > { %v10662_v40 = vadd.f32 %v5291_v42, %v5243_v34 }
 0x49f   : > { %v5249_v11 = vpop.f32.mrf.mxu1 }
 0x4a0   : > { %v5250_v8 = vadd.f32 %v5249_v11, %v10608_v15  ;;  %v5315_v26 = vpop.f32.mrf.mxu3  ;;  %v6777_v11 = vld [vmem:[%s7421_s23 + $0x4a] sm:$0xff] }
 0x4a1   : > { %v5316_v42 = vadd.f32 %v5315_v26, %v10620_v18 }
 0x4a2   : > { %v5293_v24 = vpop.f32.mrf.mxu2 }
 0x4a3   : > { %v10667_v0 = vadd.f32 %v5293_v24, %v5245_v61 }
 0x4a7   : > { %5684 = vmatmul.bf16.gmra.mxu2 %v4660_v59  ;;  %v5601_v28 = vpop.f32.mrf.mxu1 }
 0x4a8   : > { %v5602_v25 = vadd.f32 %v5601_v28, %v5552_v7  ;;  %v5317_v48 = vpop.f32.mrf.mxu3 }
 0x4a9   : > { %v5318_v59 = vadd.f32 %v5317_v48, %v10624_v43 }
 0x4aa   : > { %v5296_v45 = vpop.f32.mrf.mxu2 }
 0x4ab   : > { %v10670_v32 = vadd.f32 %v5296_v45, %v5248_v62 }
 0x4af   : > { %v5603_v1 = vpop.f32.mrf.mxu1 }
 0x4b0   : > { %v5604_v4 = vadd.f32 %v5603_v1, %v5554_v35  ;;  %v5320_v22 = vpop.f32.mrf.mxu3 }
 0x4b2   : > { %v5298_v2 = vpop.f32.mrf.mxu2 }
 0x4b3   : > { %v10672_v15 = vadd.f32 %v5298_v2, %v5250_v8  ;;  %v5564_v8 = vpop.f32.mrf.mxu0  ;;  %v6778_v2 = vld [vmem:[%s7421_s23 + $0x52] sm:$0xff] }
 0x4b7   : > { %v5606_v27 = vpop.f32.mrf.mxu1 }
 0x4b8   : > { %v5607_v49 = vadd.f32 %v5606_v27, %v5557_v58  ;;  %v5322_v16 = vpop.f32.mrf.mxu3 }
 0x4ba   : > { %v5650_v46 = vpop.f32.mrf.mxu2 }
 0x4bb   : > { %v5651_v23 = vadd.f32 %v5650_v46, %v5602_v25  ;;  %v5567_v58 = vpop.f32.mrf.mxu0 }
 0x4bd   : > { %v5690_v56 = vadd.f32 %v5651_v23, %v5311_v53  ;;  %v5321_v23 = vadd.f32 %v5320_v22, %v10628_v38 }
 0x4bf   : > { %v5710_v29 = vmul.f32 %v10678_v5, %v5690_v56  ;;  %v5608_v34 = vpop.f32.mrf.mxu1 }
 0x4c0   : > { %v5609_v24 = vadd.f32 %v5608_v34, %v5559_v54  ;;  %v5325_v1 = vpop.f32.mrf.mxu3 }
 0x4c1   : > { %v5730_v31 = vadd.f32 %v10683_v10, %v5710_v29 }
 0x4c2   : > { %v5652_v36 = vpop.f32.mrf.mxu2 }
 0x4c3   : > { %v5763_v30 = vadd.f32 %v6775_v39, %v5730_v31  ;;  %v5653_v51 = vadd.f32 %v5652_v36, %v5604_v4  ;;  %v6779_v39 = vld [vmem:[%s7421_s23 + $0x62] sm:$0xff] }
 0x4c5   : > { %v5779_v61 = vmax.f32 %v5763_v30, 0.0  ;;  %v5691_v19 = vadd.f32 %v5653_v51, %v5313_v37  ;;  %v5569_v30 = vpop.f32.mrf.mxu0  ;;  %v5323_v51 = vadd.f32 %v5322_v16, %v10632_v52 }
 0x4c7   : > { %5795 = vst [vmem:[%s7374_s13] sm:$0xff] %v5779_v61  ;;  %v5711_v9 = vmul.f32 %v10678_v5, %v5691_v19  ;;  %v5611_v47 = vpop.f32.mrf.mxu1 }
 0x4c8   : > { %v5612_v25 = vadd.f32 %v5611_v47, %v5562_v57  ;;  %v5327_v36 = vpop.f32.mrf.mxu3 }
 0x4c9   : > { %v5731_v44 = vadd.f32 %v10683_v10, %v5711_v9  ;;  %v6780_v9 = vld [vmem:[%s7421_s23 + $0x6a] sm:$0xff] }
 0x4ca   : > { %v5655_v62 = vpop.f32.mrf.mxu2 }
 0x4cb   : > { %v5764_v6 = vadd.f32 %v6776_v21, %v5731_v44  ;;  %v5656_v17 = vadd.f32 %v5655_v62, %v5607_v49  ;;  %v5326_v62 = vadd.f32 %v5325_v1, %v10636_v50 }
 0x4cd   : > { %v5780_v63 = vmax.f32 %v5764_v6, 0.0  ;;  %v5692_v20 = vadd.f32 %v5656_v17, %v5316_v42  ;;  %v5572_v17 = vpop.f32.mrf.mxu0 }
 0x4cf   : > { %5796 = vst [vmem:[%s7374_s13 + $0x8] sm:$0xff] %v5780_v63  ;;  %v5712_v7 = vmul.f32 %v10678_v5, %v5692_v20  ;;  %v5613_v60 = vpop.f32.mrf.mxu1 }
 0x4d0   : > { %v5614_v4 = vadd.f32 %v5613_v60, %v5564_v8  ;;  %v5330_v52 = vpop.f32.mrf.mxu3  ;;  %v5328_v60 = vadd.f32 %v5327_v36, %v10640_v12 }
 0x4d1   : > { %v5732_v41 = vadd.f32 %v10683_v10, %v5712_v7  ;;  %v6781_v7 = vld [vmem:[%s7421_s23 + $0x7a] sm:$0xff] }
 0x4d2   : > { %v5657_v13 = vpop.f32.mrf.mxu2 }
 0x4d3   : > { %v5765_v18 = vadd.f32 %v6777_v11, %v5732_v41  ;;  %v5658_v28 = vadd.f32 %v5657_v13, %v5609_v24 }
 0x4d5   : > { %v5781_v45 = vmax.f32 %v5765_v18, 0.0  ;;  %v5693_v35 = vadd.f32 %v5658_v28, %v5318_v59 }
 0x4d7   : > { %5797 = vst [vmem:[%s7374_s13 + $0x10] sm:$0xff] %v5781_v45  ;;  %v5713_v26 = vmul.f32 %v10678_v5, %v5693_v35  ;;  %v5616_v46 = vpop.f32.mrf.mxu1  ;;  %v5574_v45 = vpop.f32.mrf.mxu0 }
 0x4d8   : > { %v5617_v21 = vadd.f32 %v5616_v46, %v5567_v58  ;;  %v5332_v28 = vpop.f32.mrf.mxu3 }
 0x4d9   : > { %v5733_v27 = vadd.f32 %v10683_v10, %v5713_v26  ;;  %v6782_v26 = vld [vmem:[%s7421_s23 + $0x82] sm:$0xff] }
 0x4da   : > { %v5660_v53 = vpop.f32.mrf.mxu2 }
 0x4db   : > { %v5766_v43 = vadd.f32 %v6778_v2, %v5733_v27  ;;  %v5661_v48 = vadd.f32 %v5660_v53, %v5612_v25  ;;  %v5331_v25 = vadd.f32 %v5330_v52, %v10644_v14 }
 0x4dd   : > { %v5782_v54 = vmax.f32 %v5766_v43, 0.0  ;;  %v5694_v56 = vadd.f32 %v5661_v48, %v5321_v23 }
 0x4df   : > { %5798 = vst [vmem:[%s7374_s13 + $0x18] sm:$0xff] %v5782_v54  ;;  %v5714_v29 = vmul.f32 %v10678_v5, %v5694_v56  ;;  %v5618_v34 = vpop.f32.mrf.mxu1  ;;  %v5577_v43 = vpop.f32.mrf.mxu0  ;;  %v6783_v56 = vld [vmem:[%s7421_s23 + $0x92] sm:$0xff] }
 0x4e0   : > { %v5619_v11 = vadd.f32 %v5618_v34, %v5569_v30  ;;  %v5335_v54 = vpop.f32.mrf.mxu3 }
 0x4e1   : > { %v5734_v31 = vadd.f32 %v10683_v10, %v5714_v29 }
 0x4e2   : > { %v5662_v37 = vpop.f32.mrf.mxu2 }
 0x4e3   : > { %v5767_v38 = vadd.f32 %v6779_v39, %v5734_v31  ;;  %v5663_v22 = vadd.f32 %v5662_v37, %v5614_v4  ;;  %v5333_v31 = vadd.f32 %v5332_v28, %v10648_v3 }
 0x4e5   : > { %v5783_v61 = vmax.f32 %v5767_v38, 0.0  ;;  %v5695_v19 = vadd.f32 %v5663_v22, %v5323_v51  ;;  %v6784_v38 = vld [vmem:[%s7421_s23 + $0x9a] sm:$0xff] }
 0x4e7   : > { %5799 = vst [vmem:[%s7374_s13 + $0x20] sm:$0xff] %v5783_v61  ;;  %v5715_v57 = vmul.f32 %v10678_v5, %v5695_v19  ;;  %v5621_v44 = vpop.f32.mrf.mxu1  ;;  %v5579_v22 = vpop.f32.mrf.mxu0 }
 0x4e8   : > { %v5622_v1 = vadd.f32 %v5621_v44, %v5572_v17 }
 0x4e9   : > { %v5735_v49 = vadd.f32 %v10683_v10, %v5715_v57  ;;  %v5337_v57 = vpop.f32.mrf.mxu3 }
 0x4ea   : > { %v5665_v47 = vpop.f32.mrf.mxu2 }
 0x4eb   : > { %v5768_v42 = vadd.f32 %v6780_v9, %v5735_v49  ;;  %v5666_v6 = vadd.f32 %v5665_v47, %v5617_v21  ;;  %v5336_v21 = vadd.f32 %v5335_v54, %v10652_v33 }
 0x4ed   : > { %v5784_v63 = vmax.f32 %v5768_v42, 0.0  ;;  %v5696_v20 = vadd.f32 %v5666_v6, %v5326_v62  ;;  %v6785_v6 = vld [vmem:[%s7421_s23 + $0xaa] sm:$0xff] }
 0x4ef   : > { %5800 = vst [vmem:[%s7374_s13 + $0x28] sm:$0xff] %v5784_v63  ;;  %v5716_v16 = vmul.f32 %v10678_v5, %v5696_v20  ;;  %v5623_v24 = vpop.f32.mrf.mxu1  ;;  %v5338_v20 = vadd.f32 %v5337_v57, %v10657_v55  ;;  %v5582_v33 = vpop.f32.mrf.mxu0 }
 0x4f0   : > { %v5624_v29 = vadd.f32 %v5623_v24, %v5574_v45 }
 0x4f1   : > { %v5736_v8 = vadd.f32 %v10683_v10, %v5716_v16 }
 0x4f2   : > { %v5667_v41 = vpop.f32.mrf.mxu2 }
 0x4f3   : > { %v5769_v50 = vadd.f32 %v6781_v7, %v5736_v8  ;;  %v5668_v13 = vadd.f32 %v5667_v41, %v5619_v11  ;;  %v5340_v11 = vpop.f32.mrf.mxu3 }
 0x4f4   : > { %v5341_v28 = vadd.f32 %v5340_v11, %v10662_v40 }
 0x4f5   : > { %v5785_v59 = vmax.f32 %v5769_v50, 0.0  ;;  %v5697_v18 = vadd.f32 %v5668_v13, %v5328_v60  ;;  %v6786_v60 = vld [vmem:[%s7421_s23 + $0xb2] sm:$0xff] }
 0x4f7   : > { %5801 = vst [vmem:[%s7374_s13 + $0x30] sm:$0xff] %v5785_v59  ;;  %v5717_v35 = vmul.f32 %v10678_v5, %v5697_v18  ;;  %v5626_v46 = vpop.f32.mrf.mxu1 }
 0x4f8   : > { %v5627_v61 = vadd.f32 %v5626_v46, %v5577_v43 }
 0x4f9   : > { %v5737_v2 = vadd.f32 %v10683_v10, %v5717_v35 }
 0x4fa   : > { %v5670_v58 = vpop.f32.mrf.mxu2 }
 0x4fb   : > { %v5770_v27 = vadd.f32 %v6782_v26, %v5737_v2  ;;  %v5671_v12 = vadd.f32 %v5670_v58, %v5622_v1  ;;  %v5584_v1 = vpop.f32.mrf.mxu0  ;;  %v5342_v2 = vpop.f32.mrf.mxu3 }
 0x4fd   : > { %v5786_v53 = vmax.f32 %v5770_v27, 0.0  ;;  %v5698_v23 = vadd.f32 %v5671_v12, %v5331_v25  ;;  %v6787_v25 = vld [vmem:[%s7421_s23 + $0xc2] sm:$0xff] }
 0x4ff   : > { %5802 = vst [vmem:[%s7374_s13 + $0x38] sm:$0xff] %v5786_v53  ;;  %v5718_v48 = vmul.f32 %v10678_v5, %v5698_v23  ;;  %v5628_v30 = vpop.f32.mrf.mxu1  ;;  %v5343_v53 = vadd.f32 %v5342_v2, %v10667_v0 }
 0x500   : > { %v5629_v52 = vadd.f32 %v5628_v30, %v5579_v22 }
 0x501   : > { %v5738_v39 = vadd.f32 %v10683_v10, %v5718_v48 }
 0x502   : > { %v5672_v4 = vpop.f32.mrf.mxu2 }
 0x503   : > { %v5771_v14 = vadd.f32 %v6783_v56, %v5738_v39  ;;  %v5673_v34 = vadd.f32 %v5672_v4, %v5624_v29  ;;  %v5587_v56 = vpop.f32.mrf.mxu0  ;;  %v5345_v39 = vpop.f32.mrf.mxu3  ;;  %v6788_v4 = vld [vmem:[%s7421_s23 + $0xca] sm:$0xff] }
 0x504   : > { %v5346_v0 = vadd.f32 %v5345_v39, %v10670_v32 }
 0x505   : > { %v5787_v36 = vmax.f32 %v5771_v14, 0.0  ;;  %v5699_v37 = vadd.f32 %v5673_v34, %v5333_v31 }
 0x507   : > { %5803 = vst [vmem:[%s7374_s13 + $0x40] sm:$0xff] %v5787_v36  ;;  %v5719_v51 = vmul.f32 %v10678_v5, %v5699_v37  ;;  %v5631_v42 = vpop.f32.mrf.mxu1 }
 0x508   : > { %v5632_v50 = vadd.f32 %v5631_v42, %v5582_v33 }
 0x509   : > { %v5739_v19 = vadd.f32 %v10683_v10, %v5719_v51 }
 0x50a   : > { %v5675_v9 = vpop.f32.mrf.mxu2 }
 0x50b   : > { %v5772_v3 = vadd.f32 %v6784_v38, %v5739_v19  ;;  %v5676_v49 = vadd.f32 %v5675_v9, %v5627_v61  ;;  %v5589_v61 = vpop.f32.mrf.mxu0  ;;  %v6789_v19 = vld [vmem:[%s7421_s23 + $0xda] sm:$0xff]  ;;  %v5347_v32 = vpop.f32.mrf.mxu3 }
 0x50d   : > { %v5788_v44 = vmax.f32 %v5772_v3, 0.0  ;;  %v5700_v47 = vadd.f32 %v5676_v49, %v5336_v21  ;;  %v5348_v3 = vadd.f32 %v5347_v32, %v10672_v15 }
 0x50f   : > { %5804 = vst [vmem:[%s7374_s13 + $0x48] sm:$0xff] %v5788_v44  ;;  %v5720_v62 = vmul.f32 %v10678_v5, %v5700_v47  ;;  %v5633_v59 = vpop.f32.mrf.mxu1 }
 0x510   : > { %v5634_v27 = vadd.f32 %v5633_v59, %v5584_v1 }
 0x511   : > { %v5740_v17 = vadd.f32 %v10683_v10, %v5720_v62 }
 0x512   : > { %v5677_v63 = vpop.f32.mrf.mxu2 }
 0x513   : > { %v5773_v16 = vadd.f32 %v6785_v6, %v5740_v17  ;;  %v5678_v7 = vadd.f32 %v5677_v63, %v5629_v52  ;;  %v6790_v6 = vld [vmem:[%s7421_s23 + $0xe2] sm:$0xff] }
 0x515   : > { %v5789_v8 = vmax.f32 %v5773_v16, 0.0  ;;  %v5701_v24 = vadd.f32 %v5678_v7, %v5338_v20 }
 0x517   : > { %5805 = vst [vmem:[%s7374_s13 + $0x50] sm:$0xff] %v5789_v8  ;;  %v5721_v41 = vmul.f32 %v10678_v5, %v5701_v24  ;;  %v5636_v43 = vpop.f32.mrf.mxu1 }
 0x518   : > { %v5637_v31 = vadd.f32 %v5636_v43, %v5587_v56 }
 0x519   : > { %v5741_v13 = vadd.f32 %v10683_v10, %v5721_v41 }
 0x51a   : > { %v5680_v18 = vpop.f32.mrf.mxu2 }
 0x51b   : > { %v5774_v55 = vadd.f32 %v6786_v60, %v5741_v13  ;;  %v5681_v45 = vadd.f32 %v5680_v18, %v5632_v50 }
 0x51d   : > { %v5790_v35 = vmax.f32 %v5774_v55, 0.0  ;;  %v5702_v26 = vadd.f32 %v5681_v45, %v5341_v28 }
 0x51f   : > { %5806 = vst [vmem:[%s7374_s13 + $0x58] sm:$0xff] %v5790_v35  ;;  %v5722_v58 = vmul.f32 %v10678_v5, %v5702_v26  ;;  %v5638_v38 = vpop.f32.mrf.mxu1 }
 0x520   : > { %v5639_v57 = vadd.f32 %v5638_v38, %v5589_v61 }
 0x521   : > { %v5742_v12 = vadd.f32 %v10683_v10, %v5722_v58 }
 0x522   : > { %v5682_v46 = vpop.f32.mrf.mxu2 }
 0x523   : > { %v5775_v23 = vadd.f32 %v6787_v25, %v5742_v12  ;;  %v5683_v40 = vadd.f32 %v5682_v46, %v5634_v27 }
 0x525   : > { %v5791_v48 = vmax.f32 %v5775_v23, 0.0  ;;  %v5703_v54 = vadd.f32 %v5683_v40, %v5343_v53 }
 0x527   : > { %5807 = vst [vmem:[%s7374_s13 + $0x60] sm:$0xff] %v5791_v48  ;;  %v5723_v29 = vmul.f32 %v10678_v5, %v5703_v54 }
 0x529   : > { %v5743_v14 = vadd.f32 %v10683_v10, %v5723_v29 }
 0x52a   : > { %v5685_v34 = vpop.f32.mrf.mxu2 }
 0x52b   : > { %v5776_v36 = vadd.f32 %v6788_v4, %v5743_v14  ;;  %v5686_v37 = vadd.f32 %v5685_v34, %v5637_v31 }
 0x52d   : > { %v5792_v30 = vmax.f32 %v5776_v36, 0.0  ;;  %v5704_v51 = vadd.f32 %v5686_v37, %v5346_v0 }
 0x52f   : > { %5808 = vst [vmem:[%s7374_s13 + $0x68] sm:$0xff] %v5792_v30  ;;  %v5724_v22 = vmul.f32 %v10678_v5, %v5704_v51 }
 0x531   : > { %v5744_v9 = vadd.f32 %v10683_v10, %v5724_v22 }
 0x532   : > { %v5687_v21 = vpop.f32.mrf.mxu2 }
 0x533   : > { %v5777_v49 = vadd.f32 %v6789_v19, %v5744_v9  ;;  %v5688_v44 = vadd.f32 %v5687_v21, %v5639_v57 }
 0x535   : > { %v5793_v47 = vmax.f32 %v5777_v49, 0.0  ;;  %v5705_v62 = vadd.f32 %v5688_v44, %v5348_v3 }
 0x537   : > { %5809 = vst [vmem:[%s7374_s13 + $0x70] sm:$0xff] %v5793_v47  ;;  %v5725_v42 = vmul.f32 %v10678_v5, %v5705_v62 }
 0x539   : > { %v5745_v52 = vadd.f32 %v10683_v10, %v5725_v42 }
 0x53b   : > { %v5778_v15 = vadd.f32 %v6790_v6, %v5745_v52 }
 0x53d   : > { %v5794_v17 = vmax.f32 %v5778_v15, 0.0 }
 0x53f   : > { %5810 = vst [vmem:[%s7374_s13 + $0x78] sm:$0xff] %v5794_v17 }
 0x540   : > { %7182 = shalt.err (!%p7179_p9)
}
 0x541   : > { %s7253_s13 = smov 128   ;;  %s7254_s28 = smov 8  }
 0x542   : > { %7029 = dma.vmem_to_hbm [thread:$0]  (%p7346_p3), %s5828_s17, 2048, %s5830_s18, %s5812_s30, %s7253_s13, %s7253_s13, %s7254_s28  }
 0x543 PF: > { %p7035_p10 = scmp.ge.s32.totalorder %s7251_s8, 2  ;;  %s5844_s21 = sand.u32 1, %s7223_s24  }
 0x544   : > { %s5845_s16 = scalar_lea.sflag [#allocation6], %s5844_s21 }
 0x545   : > { %p7032_p11 = pnand %p7035_p10, %p7355_p8 }
 0x547   : > { %p7033_p12 = pneg %p7032_p11 }
 0x549   : > { %7218 = dma.done.wait (%p7033_p12), %s5845_s16, 2048  }
 0x54a   : > { %7220 = vsyncadd (%p7033_p12), %s5845_s16, 4294965248  ;;  %s20_s8 = sadd.s32 1, %s7251_s8   ;;  %s11364_s28 = sld [smem:[#allocation11_spill]] }
 0x54b   : > { %p17_p13 = scmp.ge.s32.totalorder %s20_s8, 6   ;;  %s11365_s14 = sld [smem:[#allocation12_spill]] }
 0x54c   : > { %s11366_s30 = sld [smem:[#allocation13_spill]]  ;;  %s11367_s24 = smov %s7227_s25 }
 0x54d   : > { %s11368_s25 = smov %s7231_s26  ;;  %s11369_s26 = smov %s7364_s19 }
 0x54e   : > { %s11370_s27 = smov %s7243_s29  ;;  %19 = sbr.rel (!%p17_p13) target bundleno = 5 (0x5), region = 188 }
 0x551   : > { %s11371_s29 = smov %s11365_s14 }
 0x553   :  { %5851 = vsyncpa [#allocation6], 1 }
 0x554   :  { %5853 = vsyncpa [#allocation6 + $0x1], 1 }
 0x555   :  { %5854 = vsyncmov [#allocation3] }
 0x558   :  { %s5855_s15 = vpop.sfrf %5854 }
 0x559   :  { %p6798_p3 = scmp.ne.s32.totalorder %s5855_s15, 0 }
 0x55b   :  { %5859 = shalt.err (%p6798_p3)  }
 0x55c   :  { %5861 = vsyncmov [#allocation3 + $0x1] }
 0x55f   :  { %s5862_s17 = vpop.sfrf %5861 }
 0x560   :  { %p6799_p8 = scmp.ne.s32.totalorder %s5862_s17, 0 }
 0x562   :  { %5866 = shalt.err (%p6799_p8)  }

</bundles_post_ra>
